<compile_context>
chip_gen: v7x
topology: tpu7x:2x2x1
jax: 0.10.0
libtpu: 0.0.40
codegen_flags: <defaults>
</compile_context>

<pallas_src>
import math
import functools

import jax
import jax.numpy as jnp
import numpy as np
from jax.experimental import pallas as pl
from jax.experimental.pallas import tpu as pltpu

_INV_SQRT2 = 1.0 / math.sqrt(2.0)
_SEQ_ALIGN = 16   # bf16 sublane tile: keeps (B, L, D) <-> (B*L, D) reshapes tile-aligned


# ----------------------------- fused per-layer Pallas kernel -----------------------------

def _layer_norm_f32(x, gamma, beta, eps):
    """LayerNorm over the last dim: two-pass (centered) variance, rsqrt on the EUP."""
    m = jnp.mean(x, axis=-1, keepdims=True)
    xc = x - m
    var = jnp.mean(xc * xc, axis=-1, keepdims=True)
    return xc * jax.lax.rsqrt(var + eps) * gamma + beta


def _lxrt_layer_kernel(
    # activations / masks (per batch tile)
    img_ref, txt_ref, txt_bias_ref, img_bias_ref,
    # cross-attention params (img queries, txt keys/values)
    c_wq, c_bq, c_wk, c_bk, c_wv, c_bv, c_wo, c_bo, c_g, c_b,
    # self-attention params (img)
    s_wq, s_bq, s_wk, s_bk, s_wv, s_bv, s_wo, s_bo, s_g, s_b,
    # FFN params
    f_w1, f_b1, f_w2, f_b2, f_g, f_b,
    # output
    out_ref,
    # scratch
    ctx_scratch,
    *, num_heads, head_dim, eps):
    """One GraphLXRTXLayer (visn path): cross-attn -> self-attn -> FFN, all in VMEM."""
    B, Lv, D = img_ref.shape
    scale = 1.0 / math.sqrt(head_dim)

    def attention(hs_bf, ctx_bf, bias, wq, bq, wk, bk, wv, bv, wo, bo, g, b,
                  residual_f32=None):
        # hs_bf: (B, Lq, D) bf16; ctx_bf: (B, Lk, D) bf16; bias: (B, {1,Lq}, Lk) f32 additive
        Lq, Lk = hs_bf.shape[1], ctx_bf.shape[1]
        hs2 = hs_bf.reshape(B * Lq, D)
        ctx2 = ctx_bf.reshape(B * Lk, D)
        # Q/K/V projections: one big (B*L, D) x (D, D) bf16 matmul each, f32 accumulation.
        # 1/sqrt(head_dim) is folded into q here (once over (rows, D)) instead of being
        # applied to every per-head (B, Lq, Lk) score tile.
        q = ((jnp.dot(hs2, wq[...], preferred_element_type=jnp.float32) + bq[...]) * scale
             ).reshape(B, Lq, D).astype(jnp.bfloat16)
        k = (jnp.dot(ctx2, wk[...], preferred_element_type=jnp.float32)
             + bk[...]).reshape(B, Lk, D).astype(jnp.bfloat16)
        v = (jnp.dot(ctx2, wv[...], preferred_element_type=jnp.float32)
             + bv[...]).reshape(B, Lk, D).astype(jnp.bfloat16)
        # Additive-bias broadcast hoisted out of the head loop (no per-head broadcast_in_dim).
        bias_full = jnp.broadcast_to(bias, (B, Lq, Lk))
        # Per head, batched over the batch-tile axis with 3-D einsums (no explicit k.T).
        # Head outputs land in lane slices of the bf16 VMEM scratch so the output
        # projection stays a single big (rows, D) x (D, D) matmul.
        for h in range(num_heads):
            sl = slice(h * head_dim, (h + 1) * head_dim)
            s = jnp.einsum("bqd,bkd->bqk", q[:, :, sl], k[:, :, sl],
                           preferred_element_type=jnp.float32) + bias_full
            s = s - jnp.max(s, axis=-1, keepdims=True)
            p = jnp.exp(s)
            p = p * pl.reciprocal(jnp.sum(p, axis=-1, keepdims=True), approx=True)
            ctx_scratch[:, :, sl] = jnp.einsum(
                "bqk,bkd->bqd", p.astype(jnp.bfloat16), v[:, :, sl],
                preferred_element_type=jnp.float32).astype(jnp.bfloat16)
        ctx_all = ctx_scratch[...].reshape(B * Lq, D)          # bf16, lane-dense
        proj = jnp.dot(ctx_all, wo[...], preferred_element_type=jnp.float32) + bo[...]
        res = hs2.astype(jnp.float32) if residual_f32 is None else residual_f32
        return _layer_norm_f32(proj + res, g[...], b[...], eps)    # (B*Lq, D) f32

    img_bf = img_ref[...]   # (B, Lv, D) bf16
    txt_bf = txt_ref[...]   # (B, Lt, D) bf16

    # 1) cross-attention block: img attends to txt (+ dense + residual + LayerNorm)
    x1 = attention(img_bf, txt_bf, txt_bias_ref[...],
                   c_wq, c_bq, c_wk, c_bk, c_wv, c_bv, c_wo, c_bo, c_g, c_b)

    # 2) self-attention block on img (+ dense + residual + LayerNorm)
    x1_3d = x1.reshape(B, Lv, D).astype(jnp.bfloat16)
    x2 = attention(x1_3d, x1_3d, img_bias_ref[...],
                   s_wq, s_bq, s_wk, s_bk, s_wv, s_bv, s_wo, s_bo, s_g, s_b,
                   residual_f32=x1)

    # 3) FFN block: dense -> exact gelu -> dense + residual + LayerNorm
    # TODO(synk): if profiling shows this block VALU-bound on v6e, switch erf GELU to the
    #             tanh-approx GELU (EUP slot) at the cost of a tiny numerical deviation.
    x2_bf = x2.astype(jnp.bfloat16)
    h = jnp.dot(x2_bf, f_w1[...], preferred_element_type=jnp.float32) + f_b1[...]
    h = h * (0.5 * (1.0 + jax.lax.erf(h * _INV_SQRT2)))   # BERT exact gelu
    y = jnp.dot(h.astype(jnp.bfloat16), f_w2[...],
                preferred_element_type=jnp.float32) + f_b2[...]
    z = _layer_norm_f32(y + x2, f_g[...], f_b[...], eps)
    out_ref[...] = z.reshape(B, Lv, D).astype(out_ref.dtype)


# ----------------------------- Pallas wrapper (one layer) -----------------------------

try:
    _SINGLE_BUFFER = pl.Buffered(1)    # grid-invariant blocks don't need double-buffering
except Exception:                      # pragma: no cover - older pallas without Buffered
    _SINGLE_BUFFER = None


def _shared_spec(shape):
    """Grid-invariant weight/bias block: constant index_map, single-buffered."""
    idx = lambda i: (0,) * len(shape)
    if _SINGLE_BUFFER is not None:
        try:
            return pl.BlockSpec(shape, idx, pipeline_mode=_SINGLE_BUFFER)
        except TypeError:              # pragma: no cover - pipeline_mode kwarg missing
            pass
    return pl.BlockSpec(shape, idx)


@functools.lru_cache(maxsize=None)
def _vmem_limit_bytes():
    """Scoped VMEM limit: physical capacity minus ~25% headroom for compiler scratch.

    ~96 MiB on v5e/v6e (128 MiB physical), ~48 MiB on v7x (64 MiB physical per TC).
    """
    try:
        cap = int(pltpu.get_tpu_info().vmem_capacity_bytes)
    except Exception:
        cap = 128 << 20
    return max(32 << 20, (cap * 3) // 4)


def lxrt_x_layer(img, txt, txt_bias, img_bias, params, *, num_heads, b_tile, eps=1e-12):
    """One fused GraphLXRTXLayer (visn path).

    img: (N, Lv, D) bf16, txt: (N, Lt, D) bf16,
    txt_bias: (N, 1, Lt) f32 additive, img_bias: (N, {1,Lv}, Lv) f32 additive.
    Returns updated img embeddings, (N, Lv, D) bf16.
    """
    N, Lv, D = img.shape
    Lt = txt.shape[1]
    Lqm = img_bias.shape[1]            # 1, or Lv when graph_sprels is present
    cross, self_, ffn = params["cross"], params["self"], params["ffn"]
    inter = ffn[0].shape[1]

    batch3 = lambda shape: pl.BlockSpec(shape, lambda i: (i, 0, 0))

    attn_specs = ([_shared_spec((D, D)), _shared_spec((1, D))] * 4
                  + [_shared_spec((1, D)), _shared_spec((1, D))])
    in_specs = (
        [batch3((b_tile, Lv, D)),          # img
         batch3((b_tile, Lt, D)),          # txt
         batch3((b_tile, 1, Lt)),          # txt additive bias (broadcast over queries)
         batch3((b_tile, Lqm, Lv))]        # img additive bias
        + attn_specs + list(attn_specs)
        + [_shared_spec((D, inter)), _shared_spec((1, inter)),
           _shared_spec((inter, D)), _shared_spec((1, D)),
           _shared_spec((1, D)), _shared_spec((1, D))]
    )

    kernel = functools.partial(_lxrt_layer_kernel, num_heads=num_heads,
                               head_dim=D // num_heads, eps=eps)
    return pl.pallas_call(
        kernel,
        out_shape=jax.ShapeDtypeStruct((N, Lv, D), jnp.bfloat16),
        grid_spec=pltpu.PrefetchScalarGridSpec(
            num_scalar_prefetch=0,
            grid=(N // b_tile,),
            in_specs=in_specs,
            out_specs=batch3((b_tile, Lv, D)),
            # bf16 scratch: its f32 precision would be discarded by the bf16 out-proj anyway
            scratch_shapes=[pltpu.VMEM((b_tile, Lv, D), jnp.bfloat16)],
        ),
        compiler_params=pltpu.CompilerParams(
            dimension_semantics=("parallel",),
            vmem_limit_bytes=_vmem_limit_bytes()),
    )(img, txt, txt_bias, img_bias, *cross, *self_, *ffn)


# ----------------------------- CrossmodalEncoder -----------------------------

def _round_up(x, m):
    return (x + m - 1) // m * m


def _pad_len(L):
    """Pad moderately long sequences to a lane-dense 128, short ones to the bf16 sublane tile."""
    if L >= 96:
        return _round_up(L, 128)
    return _round_up(L, _SEQ_ALIGN)


def _pick_batch_tile(n, seq, target_rows=1024, min_steps=2):
    """Largest divisor d of n with d*seq <= target_rows, preferring >= min_steps grid steps
    (v7x shards the 'parallel' grid axis across its 2 TensorCores; a 1-step grid idles one)."""
    divisors = [d for d in range(1, n + 1) if n % d == 0]
    fits = [d for d in divisors if d * seq <= target_rows]
    multi = [d for d in fits if n // d >= min_steps]
    if multi:
        return max(multi)
    if fits:
        return max(fits)
    return 1


def _cast_params_bf16(p):
    """Weights -> bf16 (MXU), biases / LayerNorm params stay f32."""
    def attn(t):
        wq, bq, wk, bk, wv, bv, wo, bo, g, b = t
        bf = lambda w: w.astype(jnp.bfloat16)
        return (bf(wq), bq, bf(wk), bk, bf(wv), bv, bf(wo), bo, g, b)
    w1, b1, w2, b2, g, b = p["ffn"]
    return {"cross": attn(p["cross"]), "self": attn(p["self"]),
            "ffn": (w1.astype(jnp.bfloat16), b1, w2.astype(jnp.bfloat16), b2, g, b)}


def init_layer_params(key, hidden, intermediate):
    """Deterministic parameter init for one GraphLXRTXLayer (visn path only), f32."""
    keys = jax.random.split(key, 12)
    w = lambda k, shp: (0.02 * jax.random.normal(k, shp)).astype(jnp.float32)
    zeros = lambda d: jnp.zeros((1, d), jnp.float32)
    ones = lambda d: jnp.ones((1, d), jnp.float32)

    def attn_params(ks):
        return (w(ks[0], (hidden, hidden)), zeros(hidden),   # q
                w(ks[1], (hidden, hidden)), zeros(hidden),   # k
                w(ks[2], (hidden, hidden)), zeros(hidden),   # v
                w(ks[3], (hidden, hidden)), zeros(hidden),   # out dense
                ones(hidden), zeros(hidden))                 # LayerNorm

    cross = attn_params(keys[0:4])
    self_ = attn_params(keys[4:8])
    ffn = (w(keys[8], (hidden, intermediate)), zeros(intermediate),
           w(keys[9], (intermediate, hidden)), zeros(hidden),
           ones(hidden), zeros(hidden))
    return {"cross": cross, "self": self_, "ffn": ffn}


def crossmodal_encoder_forward(txt_embeds, txt_masks, img_embeds, img_masks,
                               layer_params, *, num_heads, graph_sprels=None,
                               b_tile=None):
    """Mirrors CrossmodalEncoder.forward (eval mode): only img_embeds is updated/returned."""
    N, Lt, D = txt_embeds.shape
    Lv = img_embeds.shape[1]

    # Pad sequence lengths so in-kernel (B, L, D) <-> (B*L, D) reshapes stay tile-aligned
    # (and score tiles are lane-dense for longer sequences). Padded keys get a -10000
    # bias; padded query rows are sliced off at the end.
    Lt_p, Lv_p = _pad_len(Lt), _pad_len(Lv)
    if Lt_p != Lt:
        txt_embeds = jnp.pad(txt_embeds, ((0, 0), (0, Lt_p - Lt), (0, 0)))
        txt_masks = jnp.pad(txt_masks, ((0, 0), (0, Lt_p - Lt)))
    if Lv_p != Lv:
        img_embeds = jnp.pad(img_embeds, ((0, 0), (0, Lv_p - Lv), (0, 0)))
        img_masks = jnp.pad(img_masks, ((0, 0), (0, Lv_p - Lv)))

    # Compact additive biases (N, 1, Lk): broadcast over queries inside the kernel
    # instead of materializing (N, Lq, Lk) in HBM.
    txt_bias = ((1.0 - txt_masks.astype(jnp.float32)) * -10000.0)[:, None, :]
    img_bias = ((1.0 - img_masks.astype(jnp.float32)) * -10000.0)[:, None, :]
    if graph_sprels is not None:
        gs = graph_sprels[:, 0]                                   # (N, Lv, Lv) additive
        if Lv_p != Lv:
            gs = jnp.pad(gs, ((0, 0), (0, Lv_p - Lv), (0, Lv_p - Lv)))
        img_bias = img_bias + gs                                  # full bias only here

    if b_tile is None:
        b_tile = _pick_batch_tile(N, max(Lv_p, Lt_p))

    img = img_embeds.astype(jnp.bfloat16)
    txt = txt_embeds.astype(jnp.bfloat16)
    for p in layer_params:
        img = lxrt_x_layer(img, txt, txt_bias, img_bias, _cast_params_bf16(p),
                           num_heads=num_heads, b_tile=b_tile)
    return img[:, :Lv].astype(jnp.float32)


# ----------------------------- pure-JAX reference (f32) -----------------------------

def _ref_extend(masks, lq):
    bias = (1.0 - masks.astype(jnp.float32)) * -10000.0
    return jnp.broadcast_to(bias[:, None, :], (masks.shape[0], lq, masks.shape[1]))


def _ref_ln(x, gamma, beta, eps=1e-12):
    u = x.mean(-1, keepdims=True)
    s = ((x - u) ** 2).mean(-1, keepdims=True)
    return gamma * (x - u) / jnp.sqrt(s + eps) + beta


def _ref_attn(hs, ctx, mask, params, num_heads):
    (wq, bq, wk, bk, wv, bv, wo, bo, gamma, beta) = params
    N, Lq, D = hs.shape
    dh = D // num_heads
    q = (hs @ wq + bq).reshape(N, Lq, num_heads, dh).transpose(0, 2, 1, 3)
    k = (ctx @ wk + bk).reshape(N, -1, num_heads, dh).transpose(0, 2, 1, 3)
    v = (ctx @ wv + bv).reshape(N, -1, num_heads, dh).transpose(0, 2, 1, 3)
    scores = jnp.einsum("nhqd,nhkd->nhqk", q, k) / math.sqrt(dh) + mask[:, None]
    p = jax.nn.softmax(scores, axis=-1)
    c = jnp.einsum("nhqk,nhkd->nhqd", p, v).transpose(0, 2, 1, 3).reshape(N, Lq, D)
    return _ref_ln(c @ wo + bo + hs, gamma, beta)


def _ref_ffn(x, params):
    (w1, b1, w2, b2, gamma, beta) = params
    h = x @ w1 + b1
    h = 0.5 * h * (1.0 + jax.lax.erf(h / math.sqrt(2.0)))
    return _ref_ln(h @ w2 + b2 + x, gamma, beta)


def reference_forward(txt, txt_m, img, img_m, layer_params, num_heads):
    N, Lv, D = img.shape
    ext_txt = _ref_extend(txt_m, Lv)
    ext_img = _ref_extend(img_m, Lv)
    for p in layer_params:
        a = _ref_attn(img, txt, ext_txt, p["cross"], num_heads)
        a = _ref_attn(a, a, ext_img, p["self"], num_heads)
        img = _ref_ffn(a, p["ffn"])
    return img


# ----------------------------- main -----------------------------

if __name__ == "__main__":
    # small config consistent with the module
    N = 2            # batch
    Lt = 8           # txt seq
    Lv = 8           # img seq
    D = 32           # hidden_size
    H = 4            # num_attention_heads
    I = 64           # intermediate_size
    NUM_X_LAYERS = 2

    key = jax.random.PRNGKey(0)
    k_txt, k_img, k_p = jax.random.split(key, 3)
    txt_embeds = jax.random.normal(k_txt, (N, Lt, D), jnp.float32)
    img_embeds = jax.random.normal(k_img, (N, Lv, D), jnp.float32)
    # masks: last positions padded out
    txt_masks = jnp.array([[1] * Lt, [1] * (Lt - 2) + [0, 0]], jnp.float32)
    img_masks = jnp.array([[1] * (Lv - 1) + [0], [1] * Lv], jnp.float32)

    layer_keys = jax.random.split(k_p, NUM_X_LAYERS)
    layer_params = [init_layer_params(k, D, I) for k in layer_keys]

    out = crossmodal_encoder_forward(txt_embeds, txt_masks, img_embeds, img_masks,
                                     layer_params, num_heads=H, graph_sprels=None)
    out = jax.block_until_ready(out)

    ref = reference_forward(txt_embeds, txt_masks, img_embeds, img_masks,
                            layer_params, H)
    assert out.shape == (N, Lv, D)
    # kernel stores weights/activations in bf16 (f32 accumulation) -> slightly looser tol
    assert np.allclose(np.asarray(out), np.asarray(ref), rtol=3e-2, atol=3e-2), \
        "Pallas output diverges from reference"
    print("KERNEL_OK")
</pallas_src>

<mosaic_0001>
module attributes {stable_mosaic.version = 11 : i64} {
  func.func @_lxrt_layer_kernel(%arg0: i32, %arg1: memref<1x16x32xbf16, #tpu.memory_space<vmem>>, %arg2: memref<1x16x32xbf16, #tpu.memory_space<vmem>>, %arg3: memref<1x1x16xf32, #tpu.memory_space<vmem>>, %arg4: memref<1x1x16xf32, #tpu.memory_space<vmem>>, %arg5: memref<32x32xbf16, #tpu.memory_space<vmem>>, %arg6: memref<1x32xf32, #tpu.memory_space<vmem>>, %arg7: memref<32x32xbf16, #tpu.memory_space<vmem>>, %arg8: memref<1x32xf32, #tpu.memory_space<vmem>>, %arg9: memref<32x32xbf16, #tpu.memory_space<vmem>>, %arg10: memref<1x32xf32, #tpu.memory_space<vmem>>, %arg11: memref<32x32xbf16, #tpu.memory_space<vmem>>, %arg12: memref<1x32xf32, #tpu.memory_space<vmem>>, %arg13: memref<1x32xf32, #tpu.memory_space<vmem>>, %arg14: memref<1x32xf32, #tpu.memory_space<vmem>>, %arg15: memref<32x32xbf16, #tpu.memory_space<vmem>>, %arg16: memref<1x32xf32, #tpu.memory_space<vmem>>, %arg17: memref<32x32xbf16, #tpu.memory_space<vmem>>, %arg18: memref<1x32xf32, #tpu.memory_space<vmem>>, %arg19: memref<32x32xbf16, #tpu.memory_space<vmem>>, %arg20: memref<1x32xf32, #tpu.memory_space<vmem>>, %arg21: memref<32x32xbf16, #tpu.memory_space<vmem>>, %arg22: memref<1x32xf32, #tpu.memory_space<vmem>>, %arg23: memref<1x32xf32, #tpu.memory_space<vmem>>, %arg24: memref<1x32xf32, #tpu.memory_space<vmem>>, %arg25: memref<32x64xbf16, #tpu.memory_space<vmem>>, %arg26: memref<1x64xf32, #tpu.memory_space<vmem>>, %arg27: memref<64x32xbf16, #tpu.memory_space<vmem>>, %arg28: memref<1x32xf32, #tpu.memory_space<vmem>>, %arg29: memref<1x32xf32, #tpu.memory_space<vmem>>, %arg30: memref<1x32xf32, #tpu.memory_space<vmem>>, %arg31: memref<1x16x32xbf16, #tpu.memory_space<vmem>>, %arg32: memref<1x16x32xbf16, #tpu.memory_space<vmem>>) attributes {dimension_semantics = [#tpu.dimension_semantics<parallel>], iteration_bounds = array<i64: 2>, scalar_prefetch = 0 : i64, scratch_operands = 1 : i64, tpu.core_type = #tpu.core_type<tc>, window_params = [{transform_indices = @transform_0, window_bounds = array<i64: 1, 16, 32>}, {transform_indices = @transform_1, window_bounds = array<i64: 1, 16, 32>}, {transform_indices = @transform_2, window_bounds = array<i64: 1, 1, 16>}, {transform_indices = @transform_3, window_bounds = array<i64: 1, 1, 16>}, {pipeline_mode = #tpu.pipeline_mode<synchronous>, transform_indices = @transform_4, window_bounds = array<i64: 32, 32>}, {pipeline_mode = #tpu.pipeline_mode<synchronous>, transform_indices = @transform_5, window_bounds = array<i64: 1, 32>}, {pipeline_mode = #tpu.pipeline_mode<synchronous>, transform_indices = @transform_6, window_bounds = array<i64: 32, 32>}, {pipeline_mode = #tpu.pipeline_mode<synchronous>, transform_indices = @transform_7, window_bounds = array<i64: 1, 32>}, {pipeline_mode = #tpu.pipeline_mode<synchronous>, transform_indices = @transform_8, window_bounds = array<i64: 32, 32>}, {pipeline_mode = #tpu.pipeline_mode<synchronous>, transform_indices = @transform_9, window_bounds = array<i64: 1, 32>}, {pipeline_mode = #tpu.pipeline_mode<synchronous>, transform_indices = @transform_10, window_bounds = array<i64: 32, 32>}, {pipeline_mode = #tpu.pipeline_mode<synchronous>, transform_indices = @transform_11, window_bounds = array<i64: 1, 32>}, {pipeline_mode = #tpu.pipeline_mode<synchronous>, transform_indices = @transform_12, window_bounds = array<i64: 1, 32>}, {pipeline_mode = #tpu.pipeline_mode<synchronous>, transform_indices = @transform_13, window_bounds = array<i64: 1, 32>}, {pipeline_mode = #tpu.pipeline_mode<synchronous>, transform_indices = @transform_14, window_bounds = array<i64: 32, 32>}, {pipeline_mode = #tpu.pipeline_mode<synchronous>, transform_indices = @transform_15, window_bounds = array<i64: 1, 32>}, {pipeline_mode = #tpu.pipeline_mode<synchronous>, transform_indices = @transform_16, window_bounds = array<i64: 32, 32>}, {pipeline_mode = #tpu.pipeline_mode<synchronous>, transform_indices = @transform_17, window_bounds = array<i64: 1, 32>}, {pipeline_mode = #tpu.pipeline_mode<synchronous>, transform_indices = @transform_18, window_bounds = array<i64: 32, 32>}, {pipeline_mode = #tpu.pipeline_mode<synchronous>, transform_indices = @transform_19, window_bounds = array<i64: 1, 32>}, {pipeline_mode = #tpu.pipeline_mode<synchronous>, transform_indices = @transform_20, window_bounds = array<i64: 32, 32>}, {pipeline_mode = #tpu.pipeline_mode<synchronous>, transform_indices = @transform_21, window_bounds = array<i64: 1, 32>}, {pipeline_mode = #tpu.pipeline_mode<synchronous>, transform_indices = @transform_22, window_bounds = array<i64: 1, 32>}, {pipeline_mode = #tpu.pipeline_mode<synchronous>, transform_indices = @transform_23, window_bounds = array<i64: 1, 32>}, {pipeline_mode = #tpu.pipeline_mode<synchronous>, transform_indices = @transform_24, window_bounds = array<i64: 32, 64>}, {pipeline_mode = #tpu.pipeline_mode<synchronous>, transform_indices = @transform_25, window_bounds = array<i64: 1, 64>}, {pipeline_mode = #tpu.pipeline_mode<synchronous>, transform_indices = @transform_26, window_bounds = array<i64: 64, 32>}, {pipeline_mode = #tpu.pipeline_mode<synchronous>, transform_indices = @transform_27, window_bounds = array<i64: 1, 32>}, {pipeline_mode = #tpu.pipeline_mode<synchronous>, transform_indices = @transform_28, window_bounds = array<i64: 1, 32>}, {pipeline_mode = #tpu.pipeline_mode<synchronous>, transform_indices = @transform_29, window_bounds = array<i64: 1, 32>}, {transform_indices = @transform_30, window_bounds = array<i64: 1, 16, 32>}]} {
    %c0 = arith.constant 0 : index
    %c0_0 = arith.constant 0 : index
    %c0_1 = arith.constant 0 : index
    %0 = vector.load %arg1[%c0, %c0_0, %c0_1] : memref<1x16x32xbf16, #tpu.memory_space<vmem>>, vector<1x16x32xbf16>
    %c0_2 = arith.constant 0 : index
    %c0_3 = arith.constant 0 : index
    %c0_4 = arith.constant 0 : index
    %1 = vector.load %arg2[%c0_2, %c0_3, %c0_4] : memref<1x16x32xbf16, #tpu.memory_space<vmem>>, vector<1x16x32xbf16>
    %c0_5 = arith.constant 0 : index
    %c0_6 = arith.constant 0 : index
    %c0_7 = arith.constant 0 : index
    %2 = vector.load %arg3[%c0_5, %c0_6, %c0_7] : memref<1x1x16xf32, #tpu.memory_space<vmem>>, vector<1x1x16xf32>
    %3 = vector.shape_cast %0 : vector<1x16x32xbf16> to vector<16x32xbf16>
    %4 = vector.shape_cast %1 : vector<1x16x32xbf16> to vector<16x32xbf16>
    %c0_8 = arith.constant 0 : index
    %c0_9 = arith.constant 0 : index
    %5 = vector.load %arg5[%c0_8, %c0_9] : memref<32x32xbf16, #tpu.memory_space<vmem>>, vector<32x32xbf16>
    %cst = arith.constant dense<0.000000e+00> : vector<16x32xf32>
    %6 = tpu.matmul %3, %5, %cst {dimension_numbers = #tpu.dot_dimension_numbers<[1], [0], [0], [1], [0, 0, 1, 1], [], []>} : vector<16x32xbf16>, vector<32x32xbf16>, vector<16x32xf32> -> vector<16x32xf32>
    %c0_10 = arith.constant 0 : index
    %c0_11 = arith.constant 0 : index
    %7 = vector.load %arg6[%c0_10, %c0_11] : memref<1x32xf32, #tpu.memory_space<vmem>>, vector<1x32xf32>
    %8 = vector.broadcast %7 : vector<1x32xf32> to vector<16x32xf32>
    %9 = arith.addf %6, %8 : vector<16x32xf32>
    %cst_12 = arith.constant 0.353553385 : f32
    %10 = vector.broadcast %cst_12 : f32 to vector<16x32xf32>
    %11 = arith.mulf %9, %10 : vector<16x32xf32>
    %12 = vector.shape_cast %11 : vector<16x32xf32> to vector<1x16x32xf32>
    %13 = arith.truncf %12 : vector<1x16x32xf32> to vector<1x16x32xbf16>
    %c0_13 = arith.constant 0 : index
    %c0_14 = arith.constant 0 : index
    %14 = vector.load %arg7[%c0_13, %c0_14] : memref<32x32xbf16, #tpu.memory_space<vmem>>, vector<32x32xbf16>
    %cst_15 = arith.constant dense<0.000000e+00> : vector<16x32xf32>
    %15 = tpu.matmul %4, %14, %cst_15 {dimension_numbers = #tpu.dot_dimension_numbers<[1], [0], [0], [1], [0, 0, 1, 1], [], []>} : vector<16x32xbf16>, vector<32x32xbf16>, vector<16x32xf32> -> vector<16x32xf32>
    %c0_16 = arith.constant 0 : index
    %c0_17 = arith.constant 0 : index
    %16 = vector.load %arg8[%c0_16, %c0_17] : memref<1x32xf32, #tpu.memory_space<vmem>>, vector<1x32xf32>
    %17 = vector.broadcast %16 : vector<1x32xf32> to vector<16x32xf32>
    %18 = arith.addf %15, %17 : vector<16x32xf32>
    %19 = vector.shape_cast %18 : vector<16x32xf32> to vector<1x16x32xf32>
    %20 = arith.truncf %19 : vector<1x16x32xf32> to vector<1x16x32xbf16>
    %c0_18 = arith.constant 0 : index
    %c0_19 = arith.constant 0 : index
    %21 = vector.load %arg9[%c0_18, %c0_19] : memref<32x32xbf16, #tpu.memory_space<vmem>>, vector<32x32xbf16>
    %cst_20 = arith.constant dense<0.000000e+00> : vector<16x32xf32>
    %22 = tpu.matmul %4, %21, %cst_20 {dimension_numbers = #tpu.dot_dimension_numbers<[1], [0], [0], [1], [0, 0, 1, 1], [], []>} : vector<16x32xbf16>, vector<32x32xbf16>, vector<16x32xf32> -> vector<16x32xf32>
    %c0_21 = arith.constant 0 : index
    %c0_22 = arith.constant 0 : index
    %23 = vector.load %arg10[%c0_21, %c0_22] : memref<1x32xf32, #tpu.memory_space<vmem>>, vector<1x32xf32>
    %24 = vector.broadcast %23 : vector<1x32xf32> to vector<16x32xf32>
    %25 = arith.addf %22, %24 : vector<16x32xf32>
    %26 = vector.shape_cast %25 : vector<16x32xf32> to vector<1x16x32xf32>
    %27 = arith.truncf %26 : vector<1x16x32xf32> to vector<1x16x32xbf16>
    %28 = vector.shape_cast %2 : vector<1x1x16xf32> to vector<1x1x16xf32>
    %29 = vector.broadcast %28 : vector<1x1x16xf32> to vector<1x16x16xf32>
    %30 = vector.extract_strided_slice %13 {offsets = [0, 0, 0], sizes = [1, 16, 8], strides = [1, 1, 1]} : vector<1x16x32xbf16> to vector<1x16x8xbf16>
    %31 = vector.extract_strided_slice %20 {offsets = [0, 0, 0], sizes = [1, 16, 8], strides = [1, 1, 1]} : vector<1x16x32xbf16> to vector<1x16x8xbf16>
    "tpu.trace_start"() <{level = 10 : i32, message = "bqd,bkd->bqk"}> : () -> ()
    %cst_23 = arith.constant dense<0.000000e+00> : vector<1x16x16xf32>
    %32 = tpu.matmul %30, %31, %cst_23 {dimension_numbers = #tpu.dot_dimension_numbers<[2], [2], [1], [1], [0, 0, 0, 1, 1, 1], [0], [0]>} : vector<1x16x8xbf16>, vector<1x16x8xbf16>, vector<1x16x16xf32> -> vector<1x16x16xf32>
    "tpu.trace_stop"() : () -> ()
    %33 = arith.addf %32, %29 : vector<1x16x16xf32>
    %cst_24 = arith.constant dense<0xFF800000> : vector<1x16xf32>
    %34 = vector.multi_reduction <maximumf>, %33, %cst_24 [2] : vector<1x16x16xf32> to vector<1x16xf32>
    %35 = vector.shape_cast %34 : vector<1x16xf32> to vector<1x16x1xf32>
    %36 = vector.broadcast %35 : vector<1x16x1xf32> to vector<1x16x16xf32>
    %37 = arith.subf %33, %36 : vector<1x16x16xf32>
    %38 = math.exp %37 : vector<1x16x16xf32>
    %cst_25 = arith.constant dense<0.000000e+00> : vector<1x16xf32>
    %39 = vector.multi_reduction <add>, %38, %cst_25 [2] : vector<1x16x16xf32> to vector<1x16xf32>
    %40 = vector.shape_cast %39 : vector<1x16xf32> to vector<1x16x1xf32>
    %41 = tpu.reciprocal %40 {approx = true} : vector<1x16x1xf32> -> vector<1x16x1xf32>
    %42 = vector.broadcast %41 : vector<1x16x1xf32> to vector<1x16x16xf32>
    %43 = arith.mulf %38, %42 : vector<1x16x16xf32>
    %44 = arith.truncf %43 : vector<1x16x16xf32> to vector<1x16x16xbf16>
    %45 = vector.extract_strided_slice %27 {offsets = [0, 0, 0], sizes = [1, 16, 8], strides = [1, 1, 1]} : vector<1x16x32xbf16> to vector<1x16x8xbf16>
    "tpu.trace_start"() <{level = 10 : i32, message = "bqk,bkd->bqd"}> : () -> ()
    %cst_26 = arith.constant dense<0.000000e+00> : vector<1x16x8xf32>
    %46 = tpu.matmul %44, %45, %cst_26 {dimension_numbers = #tpu.dot_dimension_numbers<[2], [1], [1], [2], [0, 0, 0, 1, 1, 2], [0], [0]>} : vector<1x16x16xbf16>, vector<1x16x8xbf16>, vector<1x16x8xf32> -> vector<1x16x8xf32>
    "tpu.trace_stop"() : () -> ()
    %47 = arith.truncf %46 : vector<1x16x8xf32> to vector<1x16x8xbf16>
    %c0_27 = arith.constant 0 : index
    %c0_28 = arith.constant 0 : index
    %c0_29 = arith.constant 0 : index
    %48 = vector.load %arg32[%c0_27, %c0_28, %c0_29] : memref<1x16x32xbf16, #tpu.memory_space<vmem>>, vector<1x16x8xbf16>
    tpu.vector_store %arg32[%c0_27, %c0_28, %c0_29], %47 {strides = array<i32>} : memref<1x16x32xbf16, #tpu.memory_space<vmem>>, vector<1x16x8xbf16>,
    %49 = vector.extract_strided_slice %13 {offsets = [0, 0, 8], sizes = [1, 16, 8], strides = [1, 1, 1]} : vector<1x16x32xbf16> to vector<1x16x8xbf16>
    %50 = vector.extract_strided_slice %20 {offsets = [0, 0, 8], sizes = [1, 16, 8], strides = [1, 1, 1]} : vector<1x16x32xbf16> to vector<1x16x8xbf16>
    "tpu.trace_start"() <{level = 10 : i32, message = "bqd,bkd->bqk"}> : () -> ()
    %cst_30 = arith.constant dense<0.000000e+00> : vector<1x16x16xf32>
    %51 = tpu.matmul %49, %50, %cst_30 {dimension_numbers = #tpu.dot_dimension_numbers<[2], [2], [1], [1], [0, 0, 0, 1, 1, 1], [0], [0]>} : vector<1x16x8xbf16>, vector<1x16x8xbf16>, vector<1x16x16xf32> -> vector<1x16x16xf32>
    "tpu.trace_stop"() : () -> ()
    %52 = arith.addf %51, %29 : vector<1x16x16xf32>
    %cst_31 = arith.constant dense<0xFF800000> : vector<1x16xf32>
    %53 = vector.multi_reduction <maximumf>, %52, %cst_31 [2] : vector<1x16x16xf32> to vector<1x16xf32>
    %54 = vector.shape_cast %53 : vector<1x16xf32> to vector<1x16x1xf32>
    %55 = vector.broadcast %54 : vector<1x16x1xf32> to vector<1x16x16xf32>
    %56 = arith.subf %52, %55 : vector<1x16x16xf32>
    %57 = math.exp %56 : vector<1x16x16xf32>
    %cst_32 = arith.constant dense<0.000000e+00> : vector<1x16xf32>
    %58 = vector.multi_reduction <add>, %57, %cst_32 [2] : vector<1x16x16xf32> to vector<1x16xf32>
    %59 = vector.shape_cast %58 : vector<1x16xf32> to vector<1x16x1xf32>
    %60 = tpu.reciprocal %59 {approx = true} : vector<1x16x1xf32> -> vector<1x16x1xf32>
    %61 = vector.broadcast %60 : vector<1x16x1xf32> to vector<1x16x16xf32>
    %62 = arith.mulf %57, %61 : vector<1x16x16xf32>
    %63 = arith.truncf %62 : vector<1x16x16xf32> to vector<1x16x16xbf16>
    %64 = vector.extract_strided_slice %27 {offsets = [0, 0, 8], sizes = [1, 16, 8], strides = [1, 1, 1]} : vector<1x16x32xbf16> to vector<1x16x8xbf16>
    "tpu.trace_start"() <{level = 10 : i32, message = "bqk,bkd->bqd"}> : () -> ()
    %cst_33 = arith.constant dense<0.000000e+00> : vector<1x16x8xf32>
    %65 = tpu.matmul %63, %64, %cst_33 {dimension_numbers = #tpu.dot_dimension_numbers<[2], [1], [1], [2], [0, 0, 0, 1, 1, 2], [0], [0]>} : vector<1x16x16xbf16>, vector<1x16x8xbf16>, vector<1x16x8xf32> -> vector<1x16x8xf32>
    "tpu.trace_stop"() : () -> ()
    %66 = arith.truncf %65 : vector<1x16x8xf32> to vector<1x16x8xbf16>
    %c0_34 = arith.constant 0 : index
    %c0_35 = arith.constant 0 : index
    %c8 = arith.constant 8 : index
    %67 = vector.load %arg32[%c0_34, %c0_35, %c8] : memref<1x16x32xbf16, #tpu.memory_space<vmem>>, vector<1x16x8xbf16>
    tpu.vector_store %arg32[%c0_34, %c0_35, %c8], %66 {strides = array<i32>} : memref<1x16x32xbf16, #tpu.memory_space<vmem>>, vector<1x16x8xbf16>,
    %68 = vector.extract_strided_slice %13 {offsets = [0, 0, 16], sizes = [1, 16, 8], strides = [1, 1, 1]} : vector<1x16x32xbf16> to vector<1x16x8xbf16>
    %69 = vector.extract_strided_slice %20 {offsets = [0, 0, 16], sizes = [1, 16, 8], strides = [1, 1, 1]} : vector<1x16x32xbf16> to vector<1x16x8xbf16>
    "tpu.trace_start"() <{level = 10 : i32, message = "bqd,bkd->bqk"}> : () -> ()
    %cst_36 = arith.constant dense<0.000000e+00> : vector<1x16x16xf32>
    %70 = tpu.matmul %68, %69, %cst_36 {dimension_numbers = #tpu.dot_dimension_numbers<[2], [2], [1], [1], [0, 0, 0, 1, 1, 1], [0], [0]>} : vector<1x16x8xbf16>, vector<1x16x8xbf16>, vector<1x16x16xf32> -> vector<1x16x16xf32>
    "tpu.trace_stop"() : () -> ()
    %71 = arith.addf %70, %29 : vector<1x16x16xf32>
    %cst_37 = arith.constant dense<0xFF800000> : vector<1x16xf32>
    %72 = vector.multi_reduction <maximumf>, %71, %cst_37 [2] : vector<1x16x16xf32> to vector<1x16xf32>
    %73 = vector.shape_cast %72 : vector<1x16xf32> to vector<1x16x1xf32>
    %74 = vector.broadcast %73 : vector<1x16x1xf32> to vector<1x16x16xf32>
    %75 = arith.subf %71, %74 : vector<1x16x16xf32>
    %76 = math.exp %75 : vector<1x16x16xf32>
    %cst_38 = arith.constant dense<0.000000e+00> : vector<1x16xf32>
    %77 = vector.multi_reduction <add>, %76, %cst_38 [2] : vector<1x16x16xf32> to vector<1x16xf32>
    %78 = vector.shape_cast %77 : vector<1x16xf32> to vector<1x16x1xf32>
    %79 = tpu.reciprocal %78 {approx = true} : vector<1x16x1xf32> -> vector<1x16x1xf32>
    %80 = vector.broadcast %79 : vector<1x16x1xf32> to vector<1x16x16xf32>
    %81 = arith.mulf %76, %80 : vector<1x16x16xf32>
    %82 = arith.truncf %81 : vector<1x16x16xf32> to vector<1x16x16xbf16>
    %83 = vector.extract_strided_slice %27 {offsets = [0, 0, 16], sizes = [1, 16, 8], strides = [1, 1, 1]} : vector<1x16x32xbf16> to vector<1x16x8xbf16>
    "tpu.trace_start"() <{level = 10 : i32, message = "bqk,bkd->bqd"}> : () -> ()
    %cst_39 = arith.constant dense<0.000000e+00> : vector<1x16x8xf32>
    %84 = tpu.matmul %82, %83, %cst_39 {dimension_numbers = #tpu.dot_dimension_numbers<[2], [1], [1], [2], [0, 0, 0, 1, 1, 2], [0], [0]>} : vector<1x16x16xbf16>, vector<1x16x8xbf16>, vector<1x16x8xf32> -> vector<1x16x8xf32>
    "tpu.trace_stop"() : () -> ()
    %85 = arith.truncf %84 : vector<1x16x8xf32> to vector<1x16x8xbf16>
    %c0_40 = arith.constant 0 : index
    %c0_41 = arith.constant 0 : index
    %c16 = arith.constant 16 : index
    %86 = vector.load %arg32[%c0_40, %c0_41, %c16] : memref<1x16x32xbf16, #tpu.memory_space<vmem>>, vector<1x16x8xbf16>
    tpu.vector_store %arg32[%c0_40, %c0_41, %c16], %85 {strides = array<i32>} : memref<1x16x32xbf16, #tpu.memory_space<vmem>>, vector<1x16x8xbf16>,
    %87 = vector.extract_strided_slice %13 {offsets = [0, 0, 24], sizes = [1, 16, 8], strides = [1, 1, 1]} : vector<1x16x32xbf16> to vector<1x16x8xbf16>
    %88 = vector.extract_strided_slice %20 {offsets = [0, 0, 24], sizes = [1, 16, 8], strides = [1, 1, 1]} : vector<1x16x32xbf16> to vector<1x16x8xbf16>
    "tpu.trace_start"() <{level = 10 : i32, message = "bqd,bkd->bqk"}> : () -> ()
    %cst_42 = arith.constant dense<0.000000e+00> : vector<1x16x16xf32>
    %89 = tpu.matmul %87, %88, %cst_42 {dimension_numbers = #tpu.dot_dimension_numbers<[2], [2], [1], [1], [0, 0, 0, 1, 1, 1], [0], [0]>} : vector<1x16x8xbf16>, vector<1x16x8xbf16>, vector<1x16x16xf32> -> vector<1x16x16xf32>
    "tpu.trace_stop"() : () -> ()
    %90 = arith.addf %89, %29 : vector<1x16x16xf32>
    %cst_43 = arith.constant dense<0xFF800000> : vector<1x16xf32>
    %91 = vector.multi_reduction <maximumf>, %90, %cst_43 [2] : vector<1x16x16xf32> to vector<1x16xf32>
    %92 = vector.shape_cast %91 : vector<1x16xf32> to vector<1x16x1xf32>
    %93 = vector.broadcast %92 : vector<1x16x1xf32> to vector<1x16x16xf32>
    %94 = arith.subf %90, %93 : vector<1x16x16xf32>
    %95 = math.exp %94 : vector<1x16x16xf32>
    %cst_44 = arith.constant dense<0.000000e+00> : vector<1x16xf32>
    %96 = vector.multi_reduction <add>, %95, %cst_44 [2] : vector<1x16x16xf32> to vector<1x16xf32>
    %97 = vector.shape_cast %96 : vector<1x16xf32> to vector<1x16x1xf32>
    %98 = tpu.reciprocal %97 {approx = true} : vector<1x16x1xf32> -> vector<1x16x1xf32>
    %99 = vector.broadcast %98 : vector<1x16x1xf32> to vector<1x16x16xf32>
    %100 = arith.mulf %95, %99 : vector<1x16x16xf32>
    %101 = arith.truncf %100 : vector<1x16x16xf32> to vector<1x16x16xbf16>
    %102 = vector.extract_strided_slice %27 {offsets = [0, 0, 24], sizes = [1, 16, 8], strides = [1, 1, 1]} : vector<1x16x32xbf16> to vector<1x16x8xbf16>
    "tpu.trace_start"() <{level = 10 : i32, message = "bqk,bkd->bqd"}> : () -> ()
    %cst_45 = arith.constant dense<0.000000e+00> : vector<1x16x8xf32>
    %103 = tpu.matmul %101, %102, %cst_45 {dimension_numbers = #tpu.dot_dimension_numbers<[2], [1], [1], [2], [0, 0, 0, 1, 1, 2], [0], [0]>} : vector<1x16x16xbf16>, vector<1x16x8xbf16>, vector<1x16x8xf32> -> vector<1x16x8xf32>
    "tpu.trace_stop"() : () -> ()
    %104 = arith.truncf %103 : vector<1x16x8xf32> to vector<1x16x8xbf16>
    %c0_46 = arith.constant 0 : index
    %c0_47 = arith.constant 0 : index
    %c24 = arith.constant 24 : index
    %105 = vector.load %arg32[%c0_46, %c0_47, %c24] : memref<1x16x32xbf16, #tpu.memory_space<vmem>>, vector<1x16x8xbf16>
    tpu.vector_store %arg32[%c0_46, %c0_47, %c24], %104 {strides = array<i32>} : memref<1x16x32xbf16, #tpu.memory_space<vmem>>, vector<1x16x8xbf16>,
    %c0_48 = arith.constant 0 : index
    %c0_49 = arith.constant 0 : index
    %c0_50 = arith.constant 0 : index
    %106 = vector.load %arg32[%c0_48, %c0_49, %c0_50] : memref<1x16x32xbf16, #tpu.memory_space<vmem>>, vector<1x16x32xbf16>
    %107 = vector.shape_cast %106 : vector<1x16x32xbf16> to vector<16x32xbf16>
    %c0_51 = arith.constant 0 : index
    %c0_52 = arith.constant 0 : index
    %108 = vector.load %arg11[%c0_51, %c0_52] : memref<32x32xbf16, #tpu.memory_space<vmem>>, vector<32x32xbf16>
    %cst_53 = arith.constant dense<0.000000e+00> : vector<16x32xf32>
    %109 = tpu.matmul %107, %108, %cst_53 {dimension_numbers = #tpu.dot_dimension_numbers<[1], [0], [0], [1], [0, 0, 1, 1], [], []>} : vector<16x32xbf16>, vector<32x32xbf16>, vector<16x32xf32> -> vector<16x32xf32>
    %c0_54 = arith.constant 0 : index
    %c0_55 = arith.constant 0 : index
    %110 = vector.load %arg12[%c0_54, %c0_55] : memref<1x32xf32, #tpu.memory_space<vmem>>, vector<1x32xf32>
    %111 = vector.broadcast %110 : vector<1x32xf32> to vector<16x32xf32>
    %112 = arith.addf %109, %111 : vector<16x32xf32>
    %113 = arith.extf %3 : vector<16x32xbf16> to vector<16x32xf32>
    %114 = arith.addf %112, %113 : vector<16x32xf32>
    %c0_56 = arith.constant 0 : index
    %c0_57 = arith.constant 0 : index
    %115 = vector.load %arg13[%c0_56, %c0_57] : memref<1x32xf32, #tpu.memory_space<vmem>>, vector<1x32xf32>
    %c0_58 = arith.constant 0 : index
    %c0_59 = arith.constant 0 : index
    %116 = vector.load %arg14[%c0_58, %c0_59] : memref<1x32xf32, #tpu.memory_space<vmem>>, vector<1x32xf32>
    %cst_60 = arith.constant dense<0.000000e+00> : vector<16xf32>
    %117 = vector.multi_reduction <add>, %114, %cst_60 [1] : vector<16x32xf32> to vector<16xf32>
    %118 = vector.shape_cast %117 : vector<16xf32> to vector<16x1xf32>
    %cst_61 = arith.constant 3.200000e+01 : f32
    %119 = vector.broadcast %cst_61 : f32 to vector<16x1xf32>
    %120 = arith.divf %118, %119 : vector<16x1xf32>
    %121 = vector.broadcast %120 : vector<16x1xf32> to vector<16x32xf32>
    %122 = arith.subf %114, %121 : vector<16x32xf32>
    %123 = arith.mulf %122, %122 : vector<16x32xf32>
    %cst_62 = arith.constant dense<0.000000e+00> : vector<16xf32>
    %124 = vector.multi_reduction <add>, %123, %cst_62 [1] : vector<16x32xf32> to vector<16xf32>
    %125 = vector.shape_cast %124 : vector<16xf32> to vector<16x1xf32>
    %cst_63 = arith.constant 3.200000e+01 : f32
    %126 = vector.broadcast %cst_63 : f32 to vector<16x1xf32>
    %127 = arith.divf %125, %126 : vector<16x1xf32>
    %cst_64 = arith.constant 9.99999996E-13 : f32
    %128 = vector.broadcast %cst_64 : f32 to vector<16x1xf32>
    %129 = arith.addf %127, %128 : vector<16x1xf32>
    %130 = math.rsqrt %129 : vector<16x1xf32>
    %131 = vector.broadcast %130 : vector<16x1xf32> to vector<16x32xf32>
    %132 = arith.mulf %122, %131 : vector<16x32xf32>
    %133 = vector.broadcast %115 : vector<1x32xf32> to vector<16x32xf32>
    %134 = arith.mulf %132, %133 : vector<16x32xf32>
    %135 = vector.broadcast %116 : vector<1x32xf32> to vector<16x32xf32>
    %136 = arith.addf %134, %135 : vector<16x32xf32>
    %137 = vector.shape_cast %136 : vector<16x32xf32> to vector<1x16x32xf32>
    %138 = arith.truncf %137 : vector<1x16x32xf32> to vector<1x16x32xbf16>
    %c0_65 = arith.constant 0 : index
    %c0_66 = arith.constant 0 : index
    %c0_67 = arith.constant 0 : index
    %139 = vector.load %arg4[%c0_65, %c0_66, %c0_67] : memref<1x1x16xf32, #tpu.memory_space<vmem>>, vector<1x1x16xf32>
    %140 = vector.shape_cast %138 : vector<1x16x32xbf16> to vector<16x32xbf16>
    %141 = vector.shape_cast %138 : vector<1x16x32xbf16> to vector<16x32xbf16>
    %c0_68 = arith.constant 0 : index
    %c0_69 = arith.constant 0 : index
    %142 = vector.load %arg15[%c0_68, %c0_69] : memref<32x32xbf16, #tpu.memory_space<vmem>>, vector<32x32xbf16>
    %cst_70 = arith.constant dense<0.000000e+00> : vector<16x32xf32>
    %143 = tpu.matmul %140, %142, %cst_70 {dimension_numbers = #tpu.dot_dimension_numbers<[1], [0], [0], [1], [0, 0, 1, 1], [], []>} : vector<16x32xbf16>, vector<32x32xbf16>, vector<16x32xf32> -> vector<16x32xf32>
    %c0_71 = arith.constant 0 : index
    %c0_72 = arith.constant 0 : index
    %144 = vector.load %arg16[%c0_71, %c0_72] : memref<1x32xf32, #tpu.memory_space<vmem>>, vector<1x32xf32>
    %145 = vector.broadcast %144 : vector<1x32xf32> to vector<16x32xf32>
    %146 = arith.addf %143, %145 : vector<16x32xf32>
    %cst_73 = arith.constant 0.353553385 : f32
    %147 = vector.broadcast %cst_73 : f32 to vector<16x32xf32>
    %148 = arith.mulf %146, %147 : vector<16x32xf32>
    %149 = vector.shape_cast %148 : vector<16x32xf32> to vector<1x16x32xf32>
    %150 = arith.truncf %149 : vector<1x16x32xf32> to vector<1x16x32xbf16>
    %c0_74 = arith.constant 0 : index
    %c0_75 = arith.constant 0 : index
    %151 = vector.load %arg17[%c0_74, %c0_75] : memref<32x32xbf16, #tpu.memory_space<vmem>>, vector<32x32xbf16>
    %cst_76 = arith.constant dense<0.000000e+00> : vector<16x32xf32>
    %152 = tpu.matmul %141, %151, %cst_76 {dimension_numbers = #tpu.dot_dimension_numbers<[1], [0], [0], [1], [0, 0, 1, 1], [], []>} : vector<16x32xbf16>, vector<32x32xbf16>, vector<16x32xf32> -> vector<16x32xf32>
    %c0_77 = arith.constant 0 : index
    %c0_78 = arith.constant 0 : index
    %153 = vector.load %arg18[%c0_77, %c0_78] : memref<1x32xf32, #tpu.memory_space<vmem>>, vector<1x32xf32>
    %154 = vector.broadcast %153 : vector<1x32xf32> to vector<16x32xf32>
    %155 = arith.addf %152, %154 : vector<16x32xf32>
    %156 = vector.shape_cast %155 : vector<16x32xf32> to vector<1x16x32xf32>
    %157 = arith.truncf %156 : vector<1x16x32xf32> to vector<1x16x32xbf16>
    %c0_79 = arith.constant 0 : index
    %c0_80 = arith.constant 0 : index
    %158 = vector.load %arg19[%c0_79, %c0_80] : memref<32x32xbf16, #tpu.memory_space<vmem>>, vector<32x32xbf16>
    %cst_81 = arith.constant dense<0.000000e+00> : vector<16x32xf32>
    %159 = tpu.matmul %141, %158, %cst_81 {dimension_numbers = #tpu.dot_dimension_numbers<[1], [0], [0], [1], [0, 0, 1, 1], [], []>} : vector<16x32xbf16>, vector<32x32xbf16>, vector<16x32xf32> -> vector<16x32xf32>
    %c0_82 = arith.constant 0 : index
    %c0_83 = arith.constant 0 : index
    %160 = vector.load %arg20[%c0_82, %c0_83] : memref<1x32xf32, #tpu.memory_space<vmem>>, vector<1x32xf32>
    %161 = vector.broadcast %160 : vector<1x32xf32> to vector<16x32xf32>
    %162 = arith.addf %159, %161 : vector<16x32xf32>
    %163 = vector.shape_cast %162 : vector<16x32xf32> to vector<1x16x32xf32>
    %164 = arith.truncf %163 : vector<1x16x32xf32> to vector<1x16x32xbf16>
    %165 = vector.shape_cast %139 : vector<1x1x16xf32> to vector<1x1x16xf32>
    %166 = vector.broadcast %165 : vector<1x1x16xf32> to vector<1x16x16xf32>
    %167 = vector.extract_strided_slice %150 {offsets = [0, 0, 0], sizes = [1, 16, 8], strides = [1, 1, 1]} : vector<1x16x32xbf16> to vector<1x16x8xbf16>
    %168 = vector.extract_strided_slice %157 {offsets = [0, 0, 0], sizes = [1, 16, 8], strides = [1, 1, 1]} : vector<1x16x32xbf16> to vector<1x16x8xbf16>
    "tpu.trace_start"() <{level = 10 : i32, message = "bqd,bkd->bqk"}> : () -> ()
    %cst_84 = arith.constant dense<0.000000e+00> : vector<1x16x16xf32>
    %169 = tpu.matmul %167, %168, %cst_84 {dimension_numbers = #tpu.dot_dimension_numbers<[2], [2], [1], [1], [0, 0, 0, 1, 1, 1], [0], [0]>} : vector<1x16x8xbf16>, vector<1x16x8xbf16>, vector<1x16x16xf32> -> vector<1x16x16xf32>
    "tpu.trace_stop"() : () -> ()
    %170 = arith.addf %169, %166 : vector<1x16x16xf32>
    %cst_85 = arith.constant dense<0xFF800000> : vector<1x16xf32>
    %171 = vector.multi_reduction <maximumf>, %170, %cst_85 [2] : vector<1x16x16xf32> to vector<1x16xf32>
    %172 = vector.shape_cast %171 : vector<1x16xf32> to vector<1x16x1xf32>
    %173 = vector.broadcast %172 : vector<1x16x1xf32> to vector<1x16x16xf32>
    %174 = arith.subf %170, %173 : vector<1x16x16xf32>
    %175 = math.exp %174 : vector<1x16x16xf32>
    %cst_86 = arith.constant dense<0.000000e+00> : vector<1x16xf32>
    %176 = vector.multi_reduction <add>, %175, %cst_86 [2] : vector<1x16x16xf32> to vector<1x16xf32>
    %177 = vector.shape_cast %176 : vector<1x16xf32> to vector<1x16x1xf32>
    %178 = tpu.reciprocal %177 {approx = true} : vector<1x16x1xf32> -> vector<1x16x1xf32>
    %179 = vector.broadcast %178 : vector<1x16x1xf32> to vector<1x16x16xf32>
    %180 = arith.mulf %175, %179 : vector<1x16x16xf32>
    %181 = arith.truncf %180 : vector<1x16x16xf32> to vector<1x16x16xbf16>
    %182 = vector.extract_strided_slice %164 {offsets = [0, 0, 0], sizes = [1, 16, 8], strides = [1, 1, 1]} : vector<1x16x32xbf16> to vector<1x16x8xbf16>
    "tpu.trace_start"() <{level = 10 : i32, message = "bqk,bkd->bqd"}> : () -> ()
    %cst_87 = arith.constant dense<0.000000e+00> : vector<1x16x8xf32>
    %183 = tpu.matmul %181, %182, %cst_87 {dimension_numbers = #tpu.dot_dimension_numbers<[2], [1], [1], [2], [0, 0, 0, 1, 1, 2], [0], [0]>} : vector<1x16x16xbf16>, vector<1x16x8xbf16>, vector<1x16x8xf32> -> vector<1x16x8xf32>
    "tpu.trace_stop"() : () -> ()
    %184 = arith.truncf %183 : vector<1x16x8xf32> to vector<1x16x8xbf16>
    %c0_88 = arith.constant 0 : index
    %c0_89 = arith.constant 0 : index
    %c0_90 = arith.constant 0 : index
    %185 = vector.load %arg32[%c0_88, %c0_89, %c0_90] : memref<1x16x32xbf16, #tpu.memory_space<vmem>>, vector<1x16x8xbf16>
    tpu.vector_store %arg32[%c0_88, %c0_89, %c0_90], %184 {strides = array<i32>} : memref<1x16x32xbf16, #tpu.memory_space<vmem>>, vector<1x16x8xbf16>,
    %186 = vector.extract_strided_slice %150 {offsets = [0, 0, 8], sizes = [1, 16, 8], strides = [1, 1, 1]} : vector<1x16x32xbf16> to vector<1x16x8xbf16>
    %187 = vector.extract_strided_slice %157 {offsets = [0, 0, 8], sizes = [1, 16, 8], strides = [1, 1, 1]} : vector<1x16x32xbf16> to vector<1x16x8xbf16>
    "tpu.trace_start"() <{level = 10 : i32, message = "bqd,bkd->bqk"}> : () -> ()
    %cst_91 = arith.constant dense<0.000000e+00> : vector<1x16x16xf32>
    %188 = tpu.matmul %186, %187, %cst_91 {dimension_numbers = #tpu.dot_dimension_numbers<[2], [2], [1], [1], [0, 0, 0, 1, 1, 1], [0], [0]>} : vector<1x16x8xbf16>, vector<1x16x8xbf16>, vector<1x16x16xf32> -> vector<1x16x16xf32>
    "tpu.trace_stop"() : () -> ()
    %189 = arith.addf %188, %166 : vector<1x16x16xf32>
    %cst_92 = arith.constant dense<0xFF800000> : vector<1x16xf32>
    %190 = vector.multi_reduction <maximumf>, %189, %cst_92 [2] : vector<1x16x16xf32> to vector<1x16xf32>
    %191 = vector.shape_cast %190 : vector<1x16xf32> to vector<1x16x1xf32>
    %192 = vector.broadcast %191 : vector<1x16x1xf32> to vector<1x16x16xf32>
    %193 = arith.subf %189, %192 : vector<1x16x16xf32>
    %194 = math.exp %193 : vector<1x16x16xf32>
    %cst_93 = arith.constant dense<0.000000e+00> : vector<1x16xf32>
    %195 = vector.multi_reduction <add>, %194, %cst_93 [2] : vector<1x16x16xf32> to vector<1x16xf32>
    %196 = vector.shape_cast %195 : vector<1x16xf32> to vector<1x16x1xf32>
    %197 = tpu.reciprocal %196 {approx = true} : vector<1x16x1xf32> -> vector<1x16x1xf32>
    %198 = vector.broadcast %197 : vector<1x16x1xf32> to vector<1x16x16xf32>
    %199 = arith.mulf %194, %198 : vector<1x16x16xf32>
    %200 = arith.truncf %199 : vector<1x16x16xf32> to vector<1x16x16xbf16>
    %201 = vector.extract_strided_slice %164 {offsets = [0, 0, 8], sizes = [1, 16, 8], strides = [1, 1, 1]} : vector<1x16x32xbf16> to vector<1x16x8xbf16>
    "tpu.trace_start"() <{level = 10 : i32, message = "bqk,bkd->bqd"}> : () -> ()
    %cst_94 = arith.constant dense<0.000000e+00> : vector<1x16x8xf32>
    %202 = tpu.matmul %200, %201, %cst_94 {dimension_numbers = #tpu.dot_dimension_numbers<[2], [1], [1], [2], [0, 0, 0, 1, 1, 2], [0], [0]>} : vector<1x16x16xbf16>, vector<1x16x8xbf16>, vector<1x16x8xf32> -> vector<1x16x8xf32>
    "tpu.trace_stop"() : () -> ()
    %203 = arith.truncf %202 : vector<1x16x8xf32> to vector<1x16x8xbf16>
    %c0_95 = arith.constant 0 : index
    %c0_96 = arith.constant 0 : index
    %c8_97 = arith.constant 8 : index
    %204 = vector.load %arg32[%c0_95, %c0_96, %c8_97] : memref<1x16x32xbf16, #tpu.memory_space<vmem>>, vector<1x16x8xbf16>
    tpu.vector_store %arg32[%c0_95, %c0_96, %c8_97], %203 {strides = array<i32>} : memref<1x16x32xbf16, #tpu.memory_space<vmem>>, vector<1x16x8xbf16>,
    %205 = vector.extract_strided_slice %150 {offsets = [0, 0, 16], sizes = [1, 16, 8], strides = [1, 1, 1]} : vector<1x16x32xbf16> to vector<1x16x8xbf16>
    %206 = vector.extract_strided_slice %157 {offsets = [0, 0, 16], sizes = [1, 16, 8], strides = [1, 1, 1]} : vector<1x16x32xbf16> to vector<1x16x8xbf16>
    "tpu.trace_start"() <{level = 10 : i32, message = "bqd,bkd->bqk"}> : () -> ()
    %cst_98 = arith.constant dense<0.000000e+00> : vector<1x16x16xf32>
    %207 = tpu.matmul %205, %206, %cst_98 {dimension_numbers = #tpu.dot_dimension_numbers<[2], [2], [1], [1], [0, 0, 0, 1, 1, 1], [0], [0]>} : vector<1x16x8xbf16>, vector<1x16x8xbf16>, vector<1x16x16xf32> -> vector<1x16x16xf32>
    "tpu.trace_stop"() : () -> ()
    %208 = arith.addf %207, %166 : vector<1x16x16xf32>
    %cst_99 = arith.constant dense<0xFF800000> : vector<1x16xf32>
    %209 = vector.multi_reduction <maximumf>, %208, %cst_99 [2] : vector<1x16x16xf32> to vector<1x16xf32>
    %210 = vector.shape_cast %209 : vector<1x16xf32> to vector<1x16x1xf32>
    %211 = vector.broadcast %210 : vector<1x16x1xf32> to vector<1x16x16xf32>
    %212 = arith.subf %208, %211 : vector<1x16x16xf32>
    %213 = math.exp %212 : vector<1x16x16xf32>
    %cst_100 = arith.constant dense<0.000000e+00> : vector<1x16xf32>
    %214 = vector.multi_reduction <add>, %213, %cst_100 [2] : vector<1x16x16xf32> to vector<1x16xf32>
    %215 = vector.shape_cast %214 : vector<1x16xf32> to vector<1x16x1xf32>
    %216 = tpu.reciprocal %215 {approx = true} : vector<1x16x1xf32> -> vector<1x16x1xf32>
    %217 = vector.broadcast %216 : vector<1x16x1xf32> to vector<1x16x16xf32>
    %218 = arith.mulf %213, %217 : vector<1x16x16xf32>
    %219 = arith.truncf %218 : vector<1x16x16xf32> to vector<1x16x16xbf16>
    %220 = vector.extract_strided_slice %164 {offsets = [0, 0, 16], sizes = [1, 16, 8], strides = [1, 1, 1]} : vector<1x16x32xbf16> to vector<1x16x8xbf16>
    "tpu.trace_start"() <{level = 10 : i32, message = "bqk,bkd->bqd"}> : () -> ()
    %cst_101 = arith.constant dense<0.000000e+00> : vector<1x16x8xf32>
    %221 = tpu.matmul %219, %220, %cst_101 {dimension_numbers = #tpu.dot_dimension_numbers<[2], [1], [1], [2], [0, 0, 0, 1, 1, 2], [0], [0]>} : vector<1x16x16xbf16>, vector<1x16x8xbf16>, vector<1x16x8xf32> -> vector<1x16x8xf32>
    "tpu.trace_stop"() : () -> ()
    %222 = arith.truncf %221 : vector<1x16x8xf32> to vector<1x16x8xbf16>
    %c0_102 = arith.constant 0 : index
    %c0_103 = arith.constant 0 : index
    %c16_104 = arith.constant 16 : index
    %223 = vector.load %arg32[%c0_102, %c0_103, %c16_104] : memref<1x16x32xbf16, #tpu.memory_space<vmem>>, vector<1x16x8xbf16>
    tpu.vector_store %arg32[%c0_102, %c0_103, %c16_104], %222 {strides = array<i32>} : memref<1x16x32xbf16, #tpu.memory_space<vmem>>, vector<1x16x8xbf16>,
    %224 = vector.extract_strided_slice %150 {offsets = [0, 0, 24], sizes = [1, 16, 8], strides = [1, 1, 1]} : vector<1x16x32xbf16> to vector<1x16x8xbf16>
    %225 = vector.extract_strided_slice %157 {offsets = [0, 0, 24], sizes = [1, 16, 8], strides = [1, 1, 1]} : vector<1x16x32xbf16> to vector<1x16x8xbf16>
    "tpu.trace_start"() <{level = 10 : i32, message = "bqd,bkd->bqk"}> : () -> ()
    %cst_105 = arith.constant dense<0.000000e+00> : vector<1x16x16xf32>
    %226 = tpu.matmul %224, %225, %cst_105 {dimension_numbers = #tpu.dot_dimension_numbers<[2], [2], [1], [1], [0, 0, 0, 1, 1, 1], [0], [0]>} : vector<1x16x8xbf16>, vector<1x16x8xbf16>, vector<1x16x16xf32> -> vector<1x16x16xf32>
    "tpu.trace_stop"() : () -> ()
    %227 = arith.addf %226, %166 : vector<1x16x16xf32>
    %cst_106 = arith.constant dense<0xFF800000> : vector<1x16xf32>
    %228 = vector.multi_reduction <maximumf>, %227, %cst_106 [2] : vector<1x16x16xf32> to vector<1x16xf32>
    %229 = vector.shape_cast %228 : vector<1x16xf32> to vector<1x16x1xf32>
    %230 = vector.broadcast %229 : vector<1x16x1xf32> to vector<1x16x16xf32>
    %231 = arith.subf %227, %230 : vector<1x16x16xf32>
    %232 = math.exp %231 : vector<1x16x16xf32>
    %cst_107 = arith.constant dense<0.000000e+00> : vector<1x16xf32>
    %233 = vector.multi_reduction <add>, %232, %cst_107 [2] : vector<1x16x16xf32> to vector<1x16xf32>
    %234 = vector.shape_cast %233 : vector<1x16xf32> to vector<1x16x1xf32>
    %235 = tpu.reciprocal %234 {approx = true} : vector<1x16x1xf32> -> vector<1x16x1xf32>
    %236 = vector.broadcast %235 : vector<1x16x1xf32> to vector<1x16x16xf32>
    %237 = arith.mulf %232, %236 : vector<1x16x16xf32>
    %238 = arith.truncf %237 : vector<1x16x16xf32> to vector<1x16x16xbf16>
    %239 = vector.extract_strided_slice %164 {offsets = [0, 0, 24], sizes = [1, 16, 8], strides = [1, 1, 1]} : vector<1x16x32xbf16> to vector<1x16x8xbf16>
    "tpu.trace_start"() <{level = 10 : i32, message = "bqk,bkd->bqd"}> : () -> ()
    %cst_108 = arith.constant dense<0.000000e+00> : vector<1x16x8xf32>
    %240 = tpu.matmul %238, %239, %cst_108 {dimension_numbers = #tpu.dot_dimension_numbers<[2], [1], [1], [2], [0, 0, 0, 1, 1, 2], [0], [0]>} : vector<1x16x16xbf16>, vector<1x16x8xbf16>, vector<1x16x8xf32> -> vector<1x16x8xf32>
    "tpu.trace_stop"() : () -> ()
    %241 = arith.truncf %240 : vector<1x16x8xf32> to vector<1x16x8xbf16>
    %c0_109 = arith.constant 0 : index
    %c0_110 = arith.constant 0 : index
    %c24_111 = arith.constant 24 : index
    %242 = vector.load %arg32[%c0_109, %c0_110, %c24_111] : memref<1x16x32xbf16, #tpu.memory_space<vmem>>, vector<1x16x8xbf16>
    tpu.vector_store %arg32[%c0_109, %c0_110, %c24_111], %241 {strides = array<i32>} : memref<1x16x32xbf16, #tpu.memory_space<vmem>>, vector<1x16x8xbf16>,
    %c0_112 = arith.constant 0 : index
    %c0_113 = arith.constant 0 : index
    %c0_114 = arith.constant 0 : index
    %243 = vector.load %arg32[%c0_112, %c0_113, %c0_114] : memref<1x16x32xbf16, #tpu.memory_space<vmem>>, vector<1x16x32xbf16>
    %244 = vector.shape_cast %243 : vector<1x16x32xbf16> to vector<16x32xbf16>
    %c0_115 = arith.constant 0 : index
    %c0_116 = arith.constant 0 : index
    %245 = vector.load %arg21[%c0_115, %c0_116] : memref<32x32xbf16, #tpu.memory_space<vmem>>, vector<32x32xbf16>
    %cst_117 = arith.constant dense<0.000000e+00> : vector<16x32xf32>
    %246 = tpu.matmul %244, %245, %cst_117 {dimension_numbers = #tpu.dot_dimension_numbers<[1], [0], [0], [1], [0, 0, 1, 1], [], []>} : vector<16x32xbf16>, vector<32x32xbf16>, vector<16x32xf32> -> vector<16x32xf32>
    %c0_118 = arith.constant 0 : index
    %c0_119 = arith.constant 0 : index
    %247 = vector.load %arg22[%c0_118, %c0_119] : memref<1x32xf32, #tpu.memory_space<vmem>>, vector<1x32xf32>
    %248 = vector.broadcast %247 : vector<1x32xf32> to vector<16x32xf32>
    %249 = arith.addf %246, %248 : vector<16x32xf32>
    %250 = arith.addf %249, %136 : vector<16x32xf32>
    %c0_120 = arith.constant 0 : index
    %c0_121 = arith.constant 0 : index
    %251 = vector.load %arg23[%c0_120, %c0_121] : memref<1x32xf32, #tpu.memory_space<vmem>>, vector<1x32xf32>
    %c0_122 = arith.constant 0 : index
    %c0_123 = arith.constant 0 : index
    %252 = vector.load %arg24[%c0_122, %c0_123] : memref<1x32xf32, #tpu.memory_space<vmem>>, vector<1x32xf32>
    %cst_124 = arith.constant dense<0.000000e+00> : vector<16xf32>
    %253 = vector.multi_reduction <add>, %250, %cst_124 [1] : vector<16x32xf32> to vector<16xf32>
    %254 = vector.shape_cast %253 : vector<16xf32> to vector<16x1xf32>
    %cst_125 = arith.constant 3.200000e+01 : f32
    %255 = vector.broadcast %cst_125 : f32 to vector<16x1xf32>
    %256 = arith.divf %254, %255 : vector<16x1xf32>
    %257 = vector.broadcast %256 : vector<16x1xf32> to vector<16x32xf32>
    %258 = arith.subf %250, %257 : vector<16x32xf32>
    %259 = arith.mulf %258, %258 : vector<16x32xf32>
    %cst_126 = arith.constant dense<0.000000e+00> : vector<16xf32>
    %260 = vector.multi_reduction <add>, %259, %cst_126 [1] : vector<16x32xf32> to vector<16xf32>
    %261 = vector.shape_cast %260 : vector<16xf32> to vector<16x1xf32>
    %cst_127 = arith.constant 3.200000e+01 : f32
    %262 = vector.broadcast %cst_127 : f32 to vector<16x1xf32>
    %263 = arith.divf %261, %262 : vector<16x1xf32>
    %cst_128 = arith.constant 9.99999996E-13 : f32
    %264 = vector.broadcast %cst_128 : f32 to vector<16x1xf32>
    %265 = arith.addf %263, %264 : vector<16x1xf32>
    %266 = math.rsqrt %265 : vector<16x1xf32>
    %267 = vector.broadcast %266 : vector<16x1xf32> to vector<16x32xf32>
    %268 = arith.mulf %258, %267 : vector<16x32xf32>
    %269 = vector.broadcast %251 : vector<1x32xf32> to vector<16x32xf32>
    %270 = arith.mulf %268, %269 : vector<16x32xf32>
    %271 = vector.broadcast %252 : vector<1x32xf32> to vector<16x32xf32>
    %272 = arith.addf %270, %271 : vector<16x32xf32>
    %273 = arith.truncf %272 : vector<16x32xf32> to vector<16x32xbf16>
    %c0_129 = arith.constant 0 : index
    %c0_130 = arith.constant 0 : index
    %274 = vector.load %arg25[%c0_129, %c0_130] : memref<32x64xbf16, #tpu.memory_space<vmem>>, vector<32x64xbf16>
    %cst_131 = arith.constant dense<0.000000e+00> : vector<16x64xf32>
    %275 = tpu.matmul %273, %274, %cst_131 {dimension_numbers = #tpu.dot_dimension_numbers<[1], [0], [0], [1], [0, 0, 1, 1], [], []>} : vector<16x32xbf16>, vector<32x64xbf16>, vector<16x64xf32> -> vector<16x64xf32>
    %c0_132 = arith.constant 0 : index
    %c0_133 = arith.constant 0 : index
    %276 = vector.load %arg26[%c0_132, %c0_133] : memref<1x64xf32, #tpu.memory_space<vmem>>, vector<1x64xf32>
    %277 = vector.broadcast %276 : vector<1x64xf32> to vector<16x64xf32>
    %278 = arith.addf %275, %277 : vector<16x64xf32>
    %cst_134 = arith.constant 0.707106769 : f32
    %279 = vector.broadcast %cst_134 : f32 to vector<16x64xf32>
    %280 = arith.mulf %278, %279 : vector<16x64xf32>
    %281 = math.erf %280 : vector<16x64xf32>
    %cst_135 = arith.constant 1.000000e+00 : f32
    %282 = vector.broadcast %cst_135 : f32 to vector<16x64xf32>
    %283 = arith.addf %282, %281 : vector<16x64xf32>
    %cst_136 = arith.constant 5.000000e-01 : f32
    %284 = vector.broadcast %cst_136 : f32 to vector<16x64xf32>
    %285 = arith.mulf %284, %283 : vector<16x64xf32>
    %286 = arith.mulf %278, %285 : vector<16x64xf32>
    %287 = arith.truncf %286 : vector<16x64xf32> to vector<16x64xbf16>
    %c0_137 = arith.constant 0 : index
    %c0_138 = arith.constant 0 : index
    %288 = vector.load %arg27[%c0_137, %c0_138] : memref<64x32xbf16, #tpu.memory_space<vmem>>, vector<64x32xbf16>
    %cst_139 = arith.constant dense<0.000000e+00> : vector<16x32xf32>
    %289 = tpu.matmul %287, %288, %cst_139 {dimension_numbers = #tpu.dot_dimension_numbers<[1], [0], [0], [1], [0, 0, 1, 1], [], []>} : vector<16x64xbf16>, vector<64x32xbf16>, vector<16x32xf32> -> vector<16x32xf32>
    %c0_140 = arith.constant 0 : index
    %c0_141 = arith.constant 0 : index
    %290 = vector.load %arg28[%c0_140, %c0_141] : memref<1x32xf32, #tpu.memory_space<vmem>>, vector<1x32xf32>
    %291 = vector.broadcast %290 : vector<1x32xf32> to vector<16x32xf32>
    %292 = arith.addf %289, %291 : vector<16x32xf32>
    %293 = arith.addf %292, %272 : vector<16x32xf32>
    %c0_142 = arith.constant 0 : index
    %c0_143 = arith.constant 0 : index
    %294 = vector.load %arg29[%c0_142, %c0_143] : memref<1x32xf32, #tpu.memory_space<vmem>>, vector<1x32xf32>
    %c0_144 = arith.constant 0 : index
    %c0_145 = arith.constant 0 : index
    %295 = vector.load %arg30[%c0_144, %c0_145] : memref<1x32xf32, #tpu.memory_space<vmem>>, vector<1x32xf32>
    %cst_146 = arith.constant dense<0.000000e+00> : vector<16xf32>
    %296 = vector.multi_reduction <add>, %293, %cst_146 [1] : vector<16x32xf32> to vector<16xf32>
    %297 = vector.shape_cast %296 : vector<16xf32> to vector<16x1xf32>
    %cst_147 = arith.constant 3.200000e+01 : f32
    %298 = vector.broadcast %cst_147 : f32 to vector<16x1xf32>
    %299 = arith.divf %297, %298 : vector<16x1xf32>
    %300 = vector.broadcast %299 : vector<16x1xf32> to vector<16x32xf32>
    %301 = arith.subf %293, %300 : vector<16x32xf32>
    %302 = arith.mulf %301, %301 : vector<16x32xf32>
    %cst_148 = arith.constant dense<0.000000e+00> : vector<16xf32>
    %303 = vector.multi_reduction <add>, %302, %cst_148 [1] : vector<16x32xf32> to vector<16xf32>
    %304 = vector.shape_cast %303 : vector<16xf32> to vector<16x1xf32>
    %cst_149 = arith.constant 3.200000e+01 : f32
    %305 = vector.broadcast %cst_149 : f32 to vector<16x1xf32>
    %306 = arith.divf %304, %305 : vector<16x1xf32>
    %cst_150 = arith.constant 9.99999996E-13 : f32
    %307 = vector.broadcast %cst_150 : f32 to vector<16x1xf32>
    %308 = arith.addf %306, %307 : vector<16x1xf32>
    %309 = math.rsqrt %308 : vector<16x1xf32>
    %310 = vector.broadcast %309 : vector<16x1xf32> to vector<16x32xf32>
    %311 = arith.mulf %301, %310 : vector<16x32xf32>
    %312 = vector.broadcast %294 : vector<1x32xf32> to vector<16x32xf32>
    %313 = arith.mulf %311, %312 : vector<16x32xf32>
    %314 = vector.broadcast %295 : vector<1x32xf32> to vector<16x32xf32>
    %315 = arith.addf %313, %314 : vector<16x32xf32>
    %316 = vector.shape_cast %315 : vector<16x32xf32> to vector<1x16x32xf32>
    %317 = arith.truncf %316 : vector<1x16x32xf32> to vector<1x16x32xbf16>
    %c0_151 = arith.constant 0 : index
    %c0_152 = arith.constant 0 : index
    %c0_153 = arith.constant 0 : index
    %318 = vector.load %arg31[%c0_151, %c0_152, %c0_153] : memref<1x16x32xbf16, #tpu.memory_space<vmem>>, vector<1x16x32xbf16>
    tpu.vector_store %arg31[%c0_151, %c0_152, %c0_153], %317 {strides = array<i32>} : memref<1x16x32xbf16, #tpu.memory_space<vmem>>, vector<1x16x32xbf16>,
    return
  }
  func.func @transform_0(%arg0: i32) -> (i32, i32, i32) {
    %c0_i32 = arith.constant 0 : i32
    %c0_i32_0 = arith.constant 0 : i32
    %c0_i32_1 = arith.constant 0 : i32
    return %arg0, %c0_i32, %c0_i32_0 : i32, i32, i32
  }
  func.func @transform_1(%arg0: i32) -> (i32, i32, i32) {
    %c0_i32 = arith.constant 0 : i32
    %c0_i32_0 = arith.constant 0 : i32
    %c0_i32_1 = arith.constant 0 : i32
    return %arg0, %c0_i32, %c0_i32_0 : i32, i32, i32
  }
  func.func @transform_2(%arg0: i32) -> (i32, i32, i32) {
    %c0_i32 = arith.constant 0 : i32
    %c0_i32_0 = arith.constant 0 : i32
    %c0_i32_1 = arith.constant 0 : i32
    return %arg0, %c0_i32, %c0_i32_0 : i32, i32, i32
  }
  func.func @transform_3(%arg0: i32) -> (i32, i32, i32) {
    %c0_i32 = arith.constant 0 : i32
    %c0_i32_0 = arith.constant 0 : i32
    %c0_i32_1 = arith.constant 0 : i32
    return %arg0, %c0_i32, %c0_i32_0 : i32, i32, i32
  }
  func.func @transform_4(%arg0: i32) -> (i32, i32) {
    %c0_i32 = arith.constant 0 : i32
    %c0_i32_0 = arith.constant 0 : i32
    %c0_i32_1 = arith.constant 0 : i32
    return %c0_i32, %c0_i32_0 : i32, i32
  }
  func.func @transform_5(%arg0: i32) -> (i32, i32) {
    %c0_i32 = arith.constant 0 : i32
    %c0_i32_0 = arith.constant 0 : i32
    %c0_i32_1 = arith.constant 0 : i32
    return %c0_i32, %c0_i32_0 : i32, i32
  }
  func.func @transform_6(%arg0: i32) -> (i32, i32) {
    %c0_i32 = arith.constant 0 : i32
    %c0_i32_0 = arith.constant 0 : i32
    %c0_i32_1 = arith.constant 0 : i32
    return %c0_i32, %c0_i32_0 : i32, i32
  }
  func.func @transform_7(%arg0: i32) -> (i32, i32) {
    %c0_i32 = arith.constant 0 : i32
    %c0_i32_0 = arith.constant 0 : i32
    %c0_i32_1 = arith.constant 0 : i32
    return %c0_i32, %c0_i32_0 : i32, i32
  }
  func.func @transform_8(%arg0: i32) -> (i32, i32) {
    %c0_i32 = arith.constant 0 : i32
    %c0_i32_0 = arith.constant 0 : i32
    %c0_i32_1 = arith.constant 0 : i32
    return %c0_i32, %c0_i32_0 : i32, i32
  }
  func.func @transform_9(%arg0: i32) -> (i32, i32) {
    %c0_i32 = arith.constant 0 : i32
    %c0_i32_0 = arith.constant 0 : i32
    %c0_i32_1 = arith.constant 0 : i32
    return %c0_i32, %c0_i32_0 : i32, i32
  }
  func.func @transform_10(%arg0: i32) -> (i32, i32) {
    %c0_i32 = arith.constant 0 : i32
    %c0_i32_0 = arith.constant 0 : i32
    %c0_i32_1 = arith.constant 0 : i32
    return %c0_i32, %c0_i32_0 : i32, i32
  }
  func.func @transform_11(%arg0: i32) -> (i32, i32) {
    %c0_i32 = arith.constant 0 : i32
    %c0_i32_0 = arith.constant 0 : i32
    %c0_i32_1 = arith.constant 0 : i32
    return %c0_i32, %c0_i32_0 : i32, i32
  }
  func.func @transform_12(%arg0: i32) -> (i32, i32) {
    %c0_i32 = arith.constant 0 : i32
    %c0_i32_0 = arith.constant 0 : i32
    %c0_i32_1 = arith.constant 0 : i32
    return %c0_i32, %c0_i32_0 : i32, i32
  }
  func.func @transform_13(%arg0: i32) -> (i32, i32) {
    %c0_i32 = arith.constant 0 : i32
    %c0_i32_0 = arith.constant 0 : i32
    %c0_i32_1 = arith.constant 0 : i32
    return %c0_i32, %c0_i32_0 : i32, i32
  }
  func.func @transform_14(%arg0: i32) -> (i32, i32) {
    %c0_i32 = arith.constant 0 : i32
    %c0_i32_0 = arith.constant 0 : i32
    %c0_i32_1 = arith.constant 0 : i32
    return %c0_i32, %c0_i32_0 : i32, i32
  }
  func.func @transform_15(%arg0: i32) -> (i32, i32) {
    %c0_i32 = arith.constant 0 : i32
    %c0_i32_0 = arith.constant 0 : i32
    %c0_i32_1 = arith.constant 0 : i32
    return %c0_i32, %c0_i32_0 : i32, i32
  }
  func.func @transform_16(%arg0: i32) -> (i32, i32) {
    %c0_i32 = arith.constant 0 : i32
    %c0_i32_0 = arith.constant 0 : i32
    %c0_i32_1 = arith.constant 0 : i32
    return %c0_i32, %c0_i32_0 : i32, i32
  }
  func.func @transform_17(%arg0: i32) -> (i32, i32) {
    %c0_i32 = arith.constant 0 : i32
    %c0_i32_0 = arith.constant 0 : i32
    %c0_i32_1 = arith.constant 0 : i32
    return %c0_i32, %c0_i32_0 : i32, i32
  }
  func.func @transform_18(%arg0: i32) -> (i32, i32) {
    %c0_i32 = arith.constant 0 : i32
    %c0_i32_0 = arith.constant 0 : i32
    %c0_i32_1 = arith.constant 0 : i32
    return %c0_i32, %c0_i32_0 : i32, i32
  }
  func.func @transform_19(%arg0: i32) -> (i32, i32) {
    %c0_i32 = arith.constant 0 : i32
    %c0_i32_0 = arith.constant 0 : i32
    %c0_i32_1 = arith.constant 0 : i32
    return %c0_i32, %c0_i32_0 : i32, i32
  }
  func.func @transform_20(%arg0: i32) -> (i32, i32) {
    %c0_i32 = arith.constant 0 : i32
    %c0_i32_0 = arith.constant 0 : i32
    %c0_i32_1 = arith.constant 0 : i32
    return %c0_i32, %c0_i32_0 : i32, i32
  }
  func.func @transform_21(%arg0: i32) -> (i32, i32) {
    %c0_i32 = arith.constant 0 : i32
    %c0_i32_0 = arith.constant 0 : i32
    %c0_i32_1 = arith.constant 0 : i32
    return %c0_i32, %c0_i32_0 : i32, i32
  }
  func.func @transform_22(%arg0: i32) -> (i32, i32) {
    %c0_i32 = arith.constant 0 : i32
    %c0_i32_0 = arith.constant 0 : i32
    %c0_i32_1 = arith.constant 0 : i32
    return %c0_i32, %c0_i32_0 : i32, i32
  }
  func.func @transform_23(%arg0: i32) -> (i32, i32) {
    %c0_i32 = arith.constant 0 : i32
    %c0_i32_0 = arith.constant 0 : i32
    %c0_i32_1 = arith.constant 0 : i32
    return %c0_i32, %c0_i32_0 : i32, i32
  }
  func.func @transform_24(%arg0: i32) -> (i32, i32) {
    %c0_i32 = arith.constant 0 : i32
    %c0_i32_0 = arith.constant 0 : i32
    %c0_i32_1 = arith.constant 0 : i32
    return %c0_i32, %c0_i32_0 : i32, i32
  }
  func.func @transform_25(%arg0: i32) -> (i32, i32) {
    %c0_i32 = arith.constant 0 : i32
    %c0_i32_0 = arith.constant 0 : i32
    %c0_i32_1 = arith.constant 0 : i32
    return %c0_i32, %c0_i32_0 : i32, i32
  }
  func.func @transform_26(%arg0: i32) -> (i32, i32) {
    %c0_i32 = arith.constant 0 : i32
    %c0_i32_0 = arith.constant 0 : i32
    %c0_i32_1 = arith.constant 0 : i32
    return %c0_i32, %c0_i32_0 : i32, i32
  }
  func.func @transform_27(%arg0: i32) -> (i32, i32) {
    %c0_i32 = arith.constant 0 : i32
    %c0_i32_0 = arith.constant 0 : i32
    %c0_i32_1 = arith.constant 0 : i32
    return %c0_i32, %c0_i32_0 : i32, i32
  }
  func.func @transform_28(%arg0: i32) -> (i32, i32) {
    %c0_i32 = arith.constant 0 : i32
    %c0_i32_0 = arith.constant 0 : i32
    %c0_i32_1 = arith.constant 0 : i32
    return %c0_i32, %c0_i32_0 : i32, i32
  }
  func.func @transform_29(%arg0: i32) -> (i32, i32) {
    %c0_i32 = arith.constant 0 : i32
    %c0_i32_0 = arith.constant 0 : i32
    %c0_i32_1 = arith.constant 0 : i32
    return %c0_i32, %c0_i32_0 : i32, i32
  }
  func.func @transform_30(%arg0: i32) -> (i32, i32, i32) {
    %c0_i32 = arith.constant 0 : i32
    %c0_i32_0 = arith.constant 0 : i32
    %c0_i32_1 = arith.constant 0 : i32
    return %arg0, %c0_i32, %c0_i32_0 : i32, i32, i32
  }
}

</mosaic_0001>

<bundles_post_ra>
// kernel: tpu_custom_call.1
= control target key start
LH: loop header
LB: loop body
LE: loop exit
PB: predicated region body
PF: predicated region fallthrough
CT: control target
= control target key end

     0   :  { %s5553_s6 = smov 1   ;;  %s5554_s10 = smov 2   ;;  %s6651_s0 = inlined_call_operand.smem [shape: u32[31], index: -1, kind: input, shape index: {}] }
   0x1   :  { %s5634_s5 = sld [smem:[%s6651_s0]]   ;;  %s5555_s14 = smov 3  }
   0x2   :  { %s5639_s9 = sld [smem:[%s6651_s0 + %s5553_s6]]   ;;  %s5556_s18 = smov 4  }
   0x3   :  { %s5644_s13 = sld [smem:[%s6651_s0 + %s5554_s10]]   ;;  %s5557_s22 = smov 5  }
   0x4   :  { %s5649_s17 = sld [smem:[%s6651_s0 + %s5555_s14]]   ;;  %s5558_s26 = smov 6  }
   0x5   :  { %s5654_s21 = sld [smem:[%s6651_s0 + %s5556_s18]]   ;;  %s5559_s30 = smov 7  }
   0x6   :  { %s5659_s25 = sld [smem:[%s6651_s0 + %s5557_s22]]   ;;  %s5560_s4 = smov 8  }
   0x7   :  { %6710 = sst [smem:[#allocation69_spill]] %s5634_s5  ;;  %s5561_s10 = smov 9  }
   0x8   :  { %6711 = sst [smem:[#allocation70_spill]] %s5639_s9  ;;  %s5562_s15 = smov 10  }
   0x9   :  { %6712 = sst [smem:[#allocation71_spill]] %s5644_s13  ;;  %s5563_s20 = smov 11  }
   0xa   :  { %6713 = sst [smem:[#allocation72_spill]] %s5649_s17  ;;  %s5565_s1 = smov 13  }
   0xb   :  { %6714 = sst [smem:[#allocation73_spill]] %s5654_s21  ;;  %s5566_s7 = smov 14  }
   0xc   :  { %6715 = sst [smem:[#allocation74_spill]] %s5659_s25  ;;  %s5568_s22 = smov 16  }
   0xd   :  { %s5664_s29 = sld [smem:[%s6651_s0 + %s5558_s26]]   ;;  %s5564_s26 = smov 12  }
   0xe   :  { %s5669_s3 = sld [smem:[%s6651_s0 + %s5559_s30]]   ;;  %s5569_s28 = smov 17  }
   0xf   :  { %s5674_s8 = sld [smem:[%s6651_s0 + %s5560_s4]]  }
  0x10   :  { %s5679_s14 = sld [smem:[%s6651_s0 + %s5561_s10]]  }
  0x11   :  { %s5684_s19 = sld [smem:[%s6651_s0 + %s5562_s15]]   ;;  %s5567_s15 = smov 15  }
  0x12   :  { %s5689_s24 = sld [smem:[%s6651_s0 + %s5563_s20]]  }
  0x13   :  { %s5694_s30 = sld [smem:[%s6651_s0 + %s5564_s26]]  }
  0x14   :  { %6716 = sst [smem:[#allocation75_spill]] %s5669_s3 }
  0x15   :  { %6717 = sst [smem:[#allocation76_spill]] %s5674_s8 }
  0x16   :  { %6718 = sst [smem:[#allocation77_spill]] %s5679_s14 }
  0x17   :  { %6719 = sst [smem:[#allocation78_spill]] %s5684_s19 }
  0x18   :  { %6720 = sst [smem:[#allocation79_spill]] %s5689_s24 }
  0x19   :  { %6721 = sst [smem:[#allocation80_spill]] %s5694_s30 }
  0x1a   :  { %s5699_s6 = sld [smem:[%s6651_s0 + %s5565_s1]]  }
  0x1b   :  { %s5704_s12 = sld [smem:[%s6651_s0 + %s5566_s7]]   ;;  %s5570_s7 = smov 18  }
  0x1c   :  { %s5709_s20 = sld [smem:[%s6651_s0 + %s5567_s15]]   ;;  %s5571_s15 = smov 19  }
  0x1d   :  { %s5714_s27 = sld [smem:[%s6651_s0 + %s5568_s22]]   ;;  %s5572_s22 = smov 20  }
  0x1e   :  { %s5719_s4 = sld [smem:[%s6651_s0 + %s5569_s28]]   ;;  %s5573_s28 = smov 21  }
  0x1f   :  { %s5724_s17 = sld [smem:[%s6651_s0 + %s5570_s7]]   ;;  %s5574_s7 = smov 22  }
  0x20   :  { %6722 = sst [smem:[#allocation81_spill]] %s5699_s6 }
  0x21   :  { %6723 = sst [smem:[#allocation82_spill]] %s5704_s12 }
  0x22   :  { %6724 = sst [smem:[#allocation83_spill]] %s5709_s20 }
  0x23   :  { %6725 = sst [smem:[#allocation84_spill]] %s5714_s27 }
  0x24   :  { %6726 = sst [smem:[#allocation85_spill]] %s5719_s4 }
  0x25   :  { %6727 = sst [smem:[#allocation86_spill]] %s5724_s17 }
  0x26   :  { %s5729_s13 = sld [smem:[%s6651_s0 + %s5571_s15]]   ;;  %s5575_s15 = smov 23  }
  0x27   :  { %s5734_s5 = sld [smem:[%s6651_s0 + %s5572_s22]]   ;;  %s5576_s22 = smov 24  }
  0x28   :  { %s5739_s27 = sld [smem:[%s6651_s0 + %s5573_s28]]   ;;  %s5577_s28 = smov 25  }
  0x29   :  { %s5744_s17 = sld [smem:[%s6651_s0 + %s5574_s7]]   ;;  %s5578_s7 = smov 26  }
  0x2a   :  { %s5749_s12 = sld [smem:[%s6651_s0 + %s5575_s15]]   ;;  %s5579_s15 = smov 27  }
  0x2b   :  { %s5759_s30 = sld [smem:[%s6651_s0 + %s5577_s28]]   ;;  %s5581_s28 = smov 29  }
  0x2c   :  { %6728 = sst [smem:[#allocation87_spill]] %s5729_s13 }
  0x2d   :  { %6729 = sst [smem:[#allocation88_spill]] %s5734_s5 }
  0x2e   :  { %6730 = sst [smem:[#allocation89_spill]] %s5739_s27 }
  0x2f   :  { %6731 = sst [smem:[#allocation90_spill]] %s5744_s17 }
  0x30   :  { %6732 = sst [smem:[#allocation91_spill]] %s5749_s12 }
  0x31   :  { %s5754_s5 = sld [smem:[%s6651_s0 + %s5576_s22]]   ;;  %s5580_s22 = smov 28  }
  0x32   :  { %s5764_s17 = sld [smem:[%s6651_s0 + %s5578_s7]]   ;;  %s5582_s7 = smov 30  }
  0x33   :  { %s5769_s19 = sld [smem:[%s6651_s0 + %s5579_s15]]  }
  0x34   :  { %s5779_s8 = sld [smem:[%s6651_s0 + %s5581_s28]]  }
  0x37   :  { %6733 = sst [smem:[#allocation92_spill]] %s5754_s5 }
  0x38   :  { %6734 = sst [smem:[#allocation93_spill]] %s5764_s17 }
  0x39   :  { %6735 = sst [smem:[#allocation94_spill]] %s5769_s19 }
  0x3a   :  { %s5774_s5 = sld [smem:[%s6651_s0 + %s5580_s22]]  }
  0x3b   :  { %6737 = sst [smem:[#allocation96_spill]] %s5779_s8 }
  0x3c   :  { %s5784_s17 = sld [smem:[%s6651_s0 + %s5582_s7]]  }
  0x40   :  { %6736 = sst [smem:[#allocation95_spill]] %s5774_s5 }
  0x42   :  { %6738 = sst [smem:[#allocation97_spill]] %s5784_s17 }
  0x43   :  { %66 = vsyncpa [#allocation4], 0 }
  0x44   :  { %68 = vsyncpa [#allocation4 + $0x1], 0 }
  0x45   :  { %69 = vsyncpa [#allocation7], 0 }
  0x46   :  { %71 = vsyncpa [#allocation7 + $0x1], 0 }
  0x47   :  { %72 = vsyncpa [#allocation10], 0 }
  0x48   :  { %74 = vsyncpa [#allocation10 + $0x1], 0 }
  0x49   :  { %75 = vsyncpa [#allocation13], 0 }
  0x4a   :  { %76 = vsyncpa [#allocation16], 0 }
  0x4b   :  { %77 = vsyncpa [#allocation19], 0 }
  0x4c   :  { %78 = vsyncpa [#allocation22], 0 }
  0x4d   :  { %79 = vsyncpa [#allocation25], 0 }
  0x4e   :  { %80 = vsyncpa [#allocation28], 0 }
  0x4f   :  { %81 = vsyncpa [#allocation31], 0 }
  0x50   :  { %82 = vsyncpa [#allocation34], 0 }
  0x51   :  { %83 = vsyncpa [#allocation37], 0 }
  0x52   :  { %84 = vsyncpa [#allocation40], 0 }
  0x53   :  { %85 = vsyncpa [#allocation43], 0 }
  0x54   :  { %86 = vsyncpa [#allocation46], 0 }
  0x55   :  { %87 = vsyncpa [#allocation49], 0 }
  0x56   :  { %88 = vsyncpa [#allocation5], 0 }
  0x57   :  { %90 = vsyncpa [#allocation5 + $0x1], 0  ;;  %s5786_s0 = smov 0   ;;  %s5788_s15 = smov 0  }
  0x58   :  { %s5790_s16 = smov 0   ;;  %s5792_s18 = smov 0  }
  0x59 LB: > { %s6739_s5 = sld [smem:[#allocation95_spill]]  ;;  %s6740_s27 = sld [smem:[#allocation89_spill]]  ;;  %s5543_s15 = sphi %s5788_s15, %s6823_s15   ;;  %s5539_s0 = sphi %s5786_s0, %s6822_s0   ;;  %s5551_s18 = sphi %s5792_s18, %s6825_s18   ;;  %s5547_s16 = sphi %s5790_s16, %s6824_s16  }
  0x5a   : > { %s6741_s25 = sld [smem:[#allocation74_spill]]  ;;  %s6742_s24 = sld [smem:[#allocation79_spill]] }
  0x5b   : > { %s6743_s9 = sld [smem:[#allocation70_spill]]  ;;  %s6744_s21 = sld [smem:[#allocation73_spill]] }
  0x5c   : > { %s6745_s20 = sld [smem:[#allocation83_spill]]  ;;  %s6746_s19 = sld [smem:[#allocation94_spill]] }
  0x5d   : > { %s6747_s14 = sld [smem:[#allocation77_spill]]  ;;  %s6748_s13 = sld [smem:[#allocation87_spill]] }
  0x5e   : > { %s6749_s12 = sld [smem:[#allocation91_spill]]  ;;  %s6750_s6 = sld [smem:[#allocation81_spill]] }
  0x5f   : > { %s6751_s4 = sld [smem:[#allocation85_spill]]  ;;  %s6752_s3 = sld [smem:[#allocation75_spill]] }
  0x60   : > { %s5583_s22 = smov [#allocation11]   ;;  %s5807_s26 = sadd.s32 4294967295, %s5551_s18  }
  0x61   : > { %s789_s23 = sshll.u32 %s5583_s22, 4  ;;  %p3714_p0 = scmp.ge.s32.totalorder %s5551_s18, 1  ;;  %s5812_s23 = int_to_ptr.vmem [resolvable:$true] %s789_s23 }
  0x62   : > { %p6666_p1 = scmp.eq.s32.totalorder %s5807_s26, 0  ;;  %p777_p2 = scmp.lt.s32.totalorder %s5551_s18, 3 }
  0x63   : > { %s5584_s1 = smov [#allocation12]   ;;  %s5585_s10 = smov [#allocation15]  }
  0x64   : > { %p5814_p3 = pnand %p3714_p0, %p777_p2  ;;  %s803_s2 = sshll.u32 %s5584_s1, 4  ;;  %s5827_s2 = int_to_ptr.vmem [resolvable:$true] %s803_s2 }
  0x65   : > { %s827_s11 = sshll.u32 %s5585_s10, 4  ;;  %s4573_s22 = scalar_lea.hbm %s6744_s21, 256  ;;  %s5829_s11 = int_to_ptr.vmem [resolvable:$true] %s827_s11 }
  0x66   : > { %s6753_s28 = scalar_select %p5814_p3, 1, 0 }
  0x67   : > { %p4218_p5 = pneg %p5814_p3  ;;  %p4574_p7 = scmp.ne.s32.totalorder %s6744_s21, %s4573_s22 }
  0x68   : > { %6754 = sst [smem:[#allocation98_spill]] %s6753_s28  ;;  %p4580_p11 = scmp.lt.u32.totalorder %s4573_s22, %s6744_s21 }
  0x69   : > { %p5823_p6 = pnand %p4218_p5, %p6666_p1 }
  0x6b   : > { %s6755_s7 = scalar_select %p5823_p6, 1, 0 }
  0x6c   : > { %p5835_p8 = pneg %p5823_p6 }
  0x6e   : > { %s6756_s17 = scalar_select %p5835_p8, 1, 0 }
  0x6f   : > { %p4576_p9 = pnand %p5835_p8, %p4574_p7 }
  0x71   : > { %p4577_p10 = pneg %p4576_p9 }
  0x73   : > { %p4582_p12 = pnand %p4580_p11, %p4577_p10 }
  0x75   : > { %4585 = shalt.err (!%p4582_p12)
}
  0x76   : > { %s4586_s1 = scalar_lea.vmem %s5812_s23, 256  ;;  %p4594_p5 = scmp.lt.s32.totalorder %s5812_s23, %s5812_s23 }
  0x77   : > { %p4587_p13 = scmp.ne.s32.totalorder %s5812_s23, %s4586_s1  ;;  %p4595_p4 = scmp.lt.s32.totalorder %s4586_s1, %s4586_s1 }
  0x79   : > { %p4589_p0 = pnand %p4587_p13, %p5835_p8  ;;  %p4596_p1 = por %p4595_p4, %p4594_p5 }
  0x7b   : > { %p4590_p2 = pneg %p4589_p0 }
  0x7d   : > { %p4597_p3 = pnand %p4596_p1, %p4590_p2 }
  0x7f   : > { %4600 = shalt.err (!%p4597_p3)
}
  0x80   : > { %s6670_s10 = smov 64   ;;  %s6672_s22 = smov 4  }
  0x81   : > { %4221 = dma.hbm_to_vmem [thread:$0]  (!%p5823_p6), %s6744_s21, 256, %s5812_s23, [#allocation10], %s6670_s10, %s6670_s10, %s6672_s22  }
  0x82   : > { %s4601_s28 = scalar_lea.hbm %s6741_s25, 16 }
  0x83   : > { %p4602_p7 = scmp.ne.s32.totalorder %s6741_s25, %s4601_s28  ;;  %p4608_p3 = scmp.lt.u32.totalorder %s4601_s28, %s6741_s25 }
  0x85   : > { %p4604_p4 = pnand %p4602_p7, %p5835_p8 }
  0x87   : > { %p4605_p1 = pneg %p4604_p4 }
  0x89   : > { %p4610_p9 = pnand %p4608_p3, %p4605_p1 }
  0x8b   : > { %4613 = shalt.err (!%p4610_p9)
}
  0x8c   : > { %s4614_s1 = scalar_lea.vmem %s5827_s2, 16  ;;  %s4621_s8 = scalar_lea.vmem %s5827_s2, 32 }
  0x8d   : > { %p4615_p10 = scmp.ne.s32.totalorder %s5827_s2, %s4614_s1  ;;  %p4622_p13 = scmp.lt.s32.totalorder %s5827_s2, %s5827_s2 }
  0x8e   : > { %p4623_p0 = scmp.lt.s32.totalorder %s4621_s8, %s4614_s1 }
  0x8f   : > { %p4617_p11 = pnand %p4615_p10, %p5835_p8 }
  0x90   : > { %p4624_p2 = por %p4623_p0, %p4622_p13 }
  0x91   : > { %p4618_p12 = pneg %p4617_p11 }
  0x93   : > { %p4625_p5 = pnand %p4624_p2, %p4618_p12 }
  0x95   : > { %4628 = shalt.err (!%p4625_p5)
}
  0x96   : > { %4224 = dma.hbm_to_vmem [thread:$0]  (!%p5823_p6), %s6741_s25, 16, %s5827_s2, [#allocation13]  }
  0x97   : > { %s4629_s23 = scalar_lea.hbm %s6752_s3, 16 }
  0x98   : > { %p4630_p7 = scmp.ne.s32.totalorder %s6752_s3, %s4629_s23  ;;  %p4636_p3 = scmp.lt.u32.totalorder %s4629_s23, %s6752_s3 }
  0x9a   : > { %p4632_p4 = pnand %p4630_p7, %p5835_p8 }
  0x9c   : > { %p4633_p1 = pneg %p4632_p4 }
  0x9e   : > { %p4638_p9 = pnand %p4636_p3, %p4633_p1 }
  0xa0   : > { %4641 = shalt.err (!%p4638_p9)
}
  0xa1   : > { %s4642_s8 = scalar_lea.vmem %s5829_s11, 16  ;;  %s4649_s28 = scalar_lea.vmem %s5829_s11, 32 }
  0xa2   : > { %p4643_p10 = scmp.ne.s32.totalorder %s5829_s11, %s4642_s8  ;;  %p4650_p13 = scmp.lt.s32.totalorder %s5829_s11, %s5829_s11 }
  0xa3   : > { %p4651_p0 = scmp.lt.s32.totalorder %s4649_s28, %s4642_s8 }
  0xa4   : > { %p4645_p11 = pnand %p4643_p10, %p5835_p8 }
  0xa5   : > { %p4652_p2 = por %p4651_p0, %p4650_p13 }
  0xa6   : > { %p4646_p12 = pneg %p4645_p11 }
  0xa8   : > { %p4653_p5 = pnand %p4652_p2, %p4646_p12 }
  0xaa   : > { %4656 = shalt.err (!%p4653_p5)
}
  0xab   : > { %4230 = dma.hbm_to_vmem [thread:$0]  (!%p5823_p6), %s6752_s3, 16, %s5829_s11, [#allocation16]  }
  0xac   : > { %s5588_s2 = smov [#allocation18]   ;;  %s5589_s23 = smov [#allocation21]  }
  0xad   : > { %s851_s1 = sshll.u32 %s5588_s2, 4  ;;  %s875_s10 = sshll.u32 %s5589_s23, 4  ;;  %s852_s1 = int_to_ptr.vmem [resolvable:$true] %s851_s1  ;;  %s876_s10 = int_to_ptr.vmem [resolvable:$true] %s875_s10 }
  0xae   : > { %s4657_s22 = scalar_lea.hbm %s6747_s14, 16 }
  0xaf   : > { %p4658_p7 = scmp.ne.s32.totalorder %s6747_s14, %s4657_s22  ;;  %p4664_p3 = scmp.lt.u32.totalorder %s4657_s22, %s6747_s14 }
  0xb1   : > { %p4660_p4 = pnand %p4658_p7, %p5835_p8 }
  0xb3   : > { %p4661_p1 = pneg %p4660_p4 }
  0xb5   : > { %p4666_p9 = pnand %p4664_p3, %p4661_p1 }
  0xb7   : > { %4669 = shalt.err (!%p4666_p9)
}
  0xb8   : > { %s4670_s8 = scalar_lea.vmem %s852_s1, 16  ;;  %s4677_s11 = scalar_lea.vmem %s852_s1, 32 }
  0xb9   : > { %p4671_p10 = scmp.ne.s32.totalorder %s852_s1, %s4670_s8  ;;  %p4678_p13 = scmp.lt.s32.totalorder %s852_s1, %s852_s1 }
  0xba   : > { %p4679_p0 = scmp.lt.s32.totalorder %s4677_s11, %s4670_s8 }
  0xbb   : > { %p4673_p11 = pnand %p4671_p10, %p5835_p8 }
  0xbc   : > { %p4680_p2 = por %p4679_p0, %p4678_p13 }
  0xbd   : > { %p4674_p12 = pneg %p4673_p11 }
  0xbf   : > { %p4681_p5 = pnand %p4680_p2, %p4674_p12 }
  0xc1   : > { %4684 = shalt.err (!%p4681_p5)
}
  0xc2   : > { %4236 = dma.hbm_to_vmem [thread:$0]  (!%p5823_p6), %s6747_s14, 16, %s852_s1, [#allocation19]  }
  0xc3   : > { %s4685_s22 = scalar_lea.hbm %s6742_s24, 16 }
  0xc4   : > { %p4686_p7 = scmp.ne.s32.totalorder %s6742_s24, %s4685_s22  ;;  %p4692_p3 = scmp.lt.u32.totalorder %s4685_s22, %s6742_s24 }
  0xc6   : > { %p4688_p4 = pnand %p4686_p7, %p5835_p8 }
  0xc8   : > { %p4689_p1 = pneg %p4688_p4 }
  0xca   : > { %p4694_p9 = pnand %p4692_p3, %p4689_p1 }
  0xcc   : > { %4697 = shalt.err (!%p4694_p9)
}
  0xcd   : > { %s4698_s28 = scalar_lea.vmem %s876_s10, 16  ;;  %s4705_s2 = scalar_lea.vmem %s876_s10, 32 }
  0xce   : > { %p4699_p10 = scmp.ne.s32.totalorder %s876_s10, %s4698_s28  ;;  %p4706_p13 = scmp.lt.s32.totalorder %s876_s10, %s876_s10 }
  0xcf   : > { %p4707_p0 = scmp.lt.s32.totalorder %s4705_s2, %s4698_s28 }
  0xd0   : > { %p4701_p11 = pnand %p4699_p10, %p5835_p8 }
  0xd1   : > { %p4708_p2 = por %p4707_p0, %p4706_p13 }
  0xd2   : > { %p4702_p12 = pneg %p4701_p11 }
  0xd4   : > { %p4709_p5 = pnand %p4708_p2, %p4702_p12 }
  0xd6   : > { %4712 = shalt.err (!%p4709_p5)
}
  0xd7   : > { %4242 = dma.hbm_to_vmem [thread:$0]  (!%p5823_p6), %s6742_s24, 16, %s876_s10, [#allocation22]  }
  0xd8   : > { %s5590_s1 = smov [#allocation24]   ;;  %s5591_s8 = smov [#allocation27]  }
  0xd9   : > { %s897_s23 = sshll.u32 %s5590_s1, 4  ;;  %s921_s11 = sshll.u32 %s5591_s8, 4  ;;  %s898_s23 = int_to_ptr.vmem [resolvable:$true] %s897_s23  ;;  %s922_s11 = int_to_ptr.vmem [resolvable:$true] %s921_s11 }
  0xda   : > { %s4713_s22 = scalar_lea.hbm %s6750_s6, 16 }
  0xdb   : > { %p4714_p7 = scmp.ne.s32.totalorder %s6750_s6, %s4713_s22  ;;  %p4720_p3 = scmp.lt.u32.totalorder %s4713_s22, %s6750_s6 }
  0xdd   : > { %p4716_p4 = pnand %p4714_p7, %p5835_p8 }
  0xdf   : > { %p4717_p1 = pneg %p4716_p4 }
  0xe1   : > { %p4722_p9 = pnand %p4720_p3, %p4717_p1 }
  0xe3   : > { %4725 = shalt.err (!%p4722_p9)
}
  0xe4   : > { %s4726_s28 = scalar_lea.vmem %s898_s23, 16  ;;  %s4733_s10 = scalar_lea.vmem %s898_s23, 32 }
  0xe5   : > { %p4727_p10 = scmp.ne.s32.totalorder %s898_s23, %s4726_s28  ;;  %p4734_p13 = scmp.lt.s32.totalorder %s898_s23, %s898_s23 }
  0xe6   : > { %p4735_p0 = scmp.lt.s32.totalorder %s4733_s10, %s4726_s28 }
  0xe7   : > { %p4729_p11 = pnand %p4727_p10, %p5835_p8 }
  0xe8   : > { %p4736_p2 = por %p4735_p0, %p4734_p13 }
  0xe9   : > { %p4730_p12 = pneg %p4729_p11 }
  0xeb   : > { %p4737_p5 = pnand %p4736_p2, %p4730_p12 }
  0xed   : > { %4740 = shalt.err (!%p4737_p5)
}
  0xee   : > { %4248 = dma.hbm_to_vmem [thread:$0]  (!%p5823_p6), %s6750_s6, 16, %s898_s23, [#allocation25]  }
  0xef   : > { %s4741_s2 = scalar_lea.hbm %s6745_s20, 16 }
  0xf0   : > { %p4742_p7 = scmp.ne.s32.totalorder %s6745_s20, %s4741_s2  ;;  %p4748_p3 = scmp.lt.u32.totalorder %s4741_s2, %s6745_s20 }
  0xf2   : > { %p4744_p4 = pnand %p4742_p7, %p5835_p8 }
  0xf4   : > { %p4745_p1 = pneg %p4744_p4 }
  0xf6   : > { %p4750_p9 = pnand %p4748_p3, %p4745_p1 }
  0xf8   : > { %4753 = shalt.err (!%p4750_p9)
}
  0xf9   : > { %s4754_s1 = scalar_lea.vmem %s922_s11, 16  ;;  %s4761_s8 = scalar_lea.vmem %s922_s11, 32 }
  0xfa   : > { %p4755_p10 = scmp.ne.s32.totalorder %s922_s11, %s4754_s1  ;;  %p4762_p13 = scmp.lt.s32.totalorder %s922_s11, %s922_s11 }
  0xfb   : > { %p4763_p0 = scmp.lt.s32.totalorder %s4761_s8, %s4754_s1 }
  0xfc   : > { %p4757_p11 = pnand %p4755_p10, %p5835_p8 }
  0xfd   : > { %p4764_p2 = por %p4763_p0, %p4762_p13 }
  0xfe   : > { %p4758_p12 = pneg %p4757_p11 }
 0x100   : > { %p4765_p5 = pnand %p4764_p2, %p4758_p12 }
 0x102   : > { %4768 = shalt.err (!%p4765_p5)
}
 0x103   : > { %4254 = dma.hbm_to_vmem [thread:$0]  (!%p5823_p6), %s6745_s20, 16, %s922_s11, [#allocation28]  }
 0x104   : > { %s5592_s23 = smov [#allocation30]   ;;  %s5593_s28 = smov [#allocation33]  }
 0x105   : > { %s945_s22 = sshll.u32 %s5592_s23, 4  ;;  %s969_s10 = sshll.u32 %s5593_s28, 4  ;;  %s946_s22 = int_to_ptr.vmem [resolvable:$true] %s945_s22  ;;  %s970_s10 = int_to_ptr.vmem [resolvable:$true] %s969_s10 }
 0x106   : > { %s4769_s2 = scalar_lea.hbm %s6751_s4, 16 }
 0x107   : > { %p4770_p7 = scmp.ne.s32.totalorder %s6751_s4, %s4769_s2  ;;  %p4776_p3 = scmp.lt.u32.totalorder %s4769_s2, %s6751_s4 }
 0x109   : > { %p4772_p4 = pnand %p4770_p7, %p5835_p8 }
 0x10b   : > { %p4773_p1 = pneg %p4772_p4 }
 0x10d   : > { %p4778_p9 = pnand %p4776_p3, %p4773_p1 }
 0x10f   : > { %4781 = shalt.err (!%p4778_p9)
}
 0x110   : > { %s4782_s1 = scalar_lea.vmem %s946_s22, 16  ;;  %s4789_s11 = scalar_lea.vmem %s946_s22, 32 }
 0x111   : > { %p4783_p10 = scmp.ne.s32.totalorder %s946_s22, %s4782_s1  ;;  %p4790_p13 = scmp.lt.s32.totalorder %s946_s22, %s946_s22 }
 0x112   : > { %p4791_p0 = scmp.lt.s32.totalorder %s4789_s11, %s4782_s1 }
 0x113   : > { %p4785_p11 = pnand %p4783_p10, %p5835_p8 }
 0x114   : > { %p4792_p2 = por %p4791_p0, %p4790_p13 }
 0x115   : > { %p4786_p12 = pneg %p4785_p11 }
 0x117   : > { %p4793_p5 = pnand %p4792_p2, %p4786_p12 }
 0x119   : > { %4796 = shalt.err (!%p4793_p5)
}
 0x11a   : > { %4260 = dma.hbm_to_vmem [thread:$0]  (!%p5823_p6), %s6751_s4, 16, %s946_s22, [#allocation31]  }
 0x11b   : > { %s4797_s8 = scalar_lea.hbm %s6748_s13, 16 }
 0x11c   : > { %p4798_p7 = scmp.ne.s32.totalorder %s6748_s13, %s4797_s8  ;;  %p4804_p3 = scmp.lt.u32.totalorder %s4797_s8, %s6748_s13 }
 0x11e   : > { %p4800_p4 = pnand %p4798_p7, %p5835_p8 }
 0x120   : > { %p4801_p1 = pneg %p4800_p4 }
 0x122   : > { %p4806_p9 = pnand %p4804_p3, %p4801_p1 }
 0x124   : > { %4809 = shalt.err (!%p4806_p9)
}
 0x125   : > { %s4810_s23 = scalar_lea.vmem %s970_s10, 16  ;;  %s4817_s28 = scalar_lea.vmem %s970_s10, 32 }
 0x126   : > { %p4811_p10 = scmp.ne.s32.totalorder %s970_s10, %s4810_s23  ;;  %p4818_p13 = scmp.lt.s32.totalorder %s970_s10, %s970_s10 }
 0x127   : > { %p4819_p0 = scmp.lt.s32.totalorder %s4817_s28, %s4810_s23 }
 0x128   : > { %p4813_p11 = pnand %p4811_p10, %p5835_p8 }
 0x129   : > { %p4820_p2 = por %p4819_p0, %p4818_p13 }
 0x12a   : > { %p4814_p12 = pneg %p4813_p11 }
 0x12c   : > { %p4821_p5 = pnand %p4820_p2, %p4814_p12 }
 0x12e   : > { %4824 = shalt.err (!%p4821_p5)
}
 0x12f   : > { %4266 = dma.hbm_to_vmem [thread:$0]  (!%p5823_p6), %s6748_s13, 16, %s970_s10, [#allocation34]  }
 0x130   : > { %s5594_s22 = smov [#allocation36]   ;;  %s5595_s1 = smov [#allocation39]  }
 0x131   : > { %s993_s2 = sshll.u32 %s5594_s22, 4  ;;  %s1015_s11 = sshll.u32 %s5595_s1, 4  ;;  %s994_s2 = int_to_ptr.vmem [resolvable:$true] %s993_s2  ;;  %s1016_s11 = int_to_ptr.vmem [resolvable:$true] %s1015_s11 }
 0x132   : > { %s4825_s8 = scalar_lea.hbm %s6740_s27, 16 }
 0x133   : > { %p4826_p7 = scmp.ne.s32.totalorder %s6740_s27, %s4825_s8  ;;  %p4832_p3 = scmp.lt.u32.totalorder %s4825_s8, %s6740_s27 }
 0x135   : > { %p4828_p4 = pnand %p4826_p7, %p5835_p8 }
 0x137   : > { %p4829_p1 = pneg %p4828_p4 }
 0x139   : > { %p4834_p9 = pnand %p4832_p3, %p4829_p1 }
 0x13b   : > { %4837 = shalt.err (!%p4834_p9)
}
 0x13c   : > { %s4838_s23 = scalar_lea.vmem %s994_s2, 16  ;;  %s4845_s10 = scalar_lea.vmem %s994_s2, 32 }
 0x13d   : > { %p4839_p10 = scmp.ne.s32.totalorder %s994_s2, %s4838_s23  ;;  %p4846_p13 = scmp.lt.s32.totalorder %s994_s2, %s994_s2 }
 0x13e   : > { %p4847_p0 = scmp.lt.s32.totalorder %s4845_s10, %s4838_s23 }
 0x13f   : > { %p4841_p11 = pnand %p4839_p10, %p5835_p8 }
 0x140   : > { %p4848_p2 = por %p4847_p0, %p4846_p13 }
 0x141   : > { %p4842_p12 = pneg %p4841_p11 }
 0x143   : > { %p4849_p5 = pnand %p4848_p2, %p4842_p12 }
 0x145   : > { %4852 = shalt.err (!%p4849_p5)
}
 0x146   : > { %4272 = dma.hbm_to_vmem [thread:$0]  (!%p5823_p6), %s6740_s27, 16, %s994_s2, [#allocation37]  }
 0x147   : > { %s4853_s28 = scalar_lea.hbm %s6749_s12, 16 }
 0x148   : > { %p4854_p7 = scmp.ne.s32.totalorder %s6749_s12, %s4853_s28  ;;  %p4860_p3 = scmp.lt.u32.totalorder %s4853_s28, %s6749_s12 }
 0x14a   : > { %p4856_p4 = pnand %p4854_p7, %p5835_p8 }
 0x14c   : > { %p4857_p1 = pneg %p4856_p4 }
 0x14e   : > { %p4862_p9 = pnand %p4860_p3, %p4857_p1 }
 0x150   : > { %4865 = shalt.err (!%p4862_p9)
}
 0x151   : > { %s4866_s22 = scalar_lea.vmem %s1016_s11, 16  ;;  %s4873_s1 = scalar_lea.vmem %s1016_s11, 32 }
 0x152   : > { %p4867_p10 = scmp.ne.s32.totalorder %s1016_s11, %s4866_s22  ;;  %p4874_p13 = scmp.lt.s32.totalorder %s1016_s11, %s1016_s11 }
 0x153   : > { %p4875_p0 = scmp.lt.s32.totalorder %s4873_s1, %s4866_s22 }
 0x154   : > { %p4869_p11 = pnand %p4867_p10, %p5835_p8 }
 0x155   : > { %p4876_p2 = por %p4875_p0, %p4874_p13 }
 0x156   : > { %p4870_p12 = pneg %p4869_p11 }
 0x158   : > { %p4877_p5 = pnand %p4876_p2, %p4870_p12 }
 0x15a   : > { %4880 = shalt.err (!%p4877_p5)
}
 0x15b   : > { %4278 = dma.hbm_to_vmem [thread:$0]  (!%p5823_p6), %s6749_s12, 16, %s1016_s11, [#allocation40]  }
 0x15c   : > { %s5596_s2 = smov [#allocation42]   ;;  %s5597_s23 = smov [#allocation45]  }
 0x15d   : > { %s1039_s8 = sshll.u32 %s5596_s2, 4  ;;  %s1063_s10 = sshll.u32 %s5597_s23, 4  ;;  %s1040_s8 = int_to_ptr.vmem [resolvable:$true] %s1039_s8  ;;  %s1064_s10 = int_to_ptr.vmem [resolvable:$true] %s1063_s10 }
 0x15e   : > { %s4881_s28 = scalar_lea.hbm %s5759_s30, 16 }
 0x15f   : > { %p4882_p7 = scmp.ne.s32.totalorder %s5759_s30, %s4881_s28  ;;  %p4888_p3 = scmp.lt.u32.totalorder %s4881_s28, %s5759_s30 }
 0x161   : > { %p4884_p4 = pnand %p4882_p7, %p5835_p8 }
 0x163   : > { %p4885_p1 = pneg %p4884_p4 }
 0x165   : > { %p4890_p9 = pnand %p4888_p3, %p4885_p1 }
 0x167   : > { %4893 = shalt.err (!%p4890_p9)
}
 0x168   : > { %s4894_s22 = scalar_lea.vmem %s1040_s8, 16  ;;  %s4901_s11 = scalar_lea.vmem %s1040_s8, 32 }
 0x169   : > { %p4895_p10 = scmp.ne.s32.totalorder %s1040_s8, %s4894_s22  ;;  %p4902_p13 = scmp.lt.s32.totalorder %s1040_s8, %s1040_s8 }
 0x16a   : > { %p4903_p0 = scmp.lt.s32.totalorder %s4901_s11, %s4894_s22 }
 0x16b   : > { %p4897_p11 = pnand %p4895_p10, %p5835_p8 }
 0x16c   : > { %p4904_p2 = por %p4903_p0, %p4902_p13 }
 0x16d   : > { %p4898_p12 = pneg %p4897_p11 }
 0x16f   : > { %p4905_p5 = pnand %p4904_p2, %p4898_p12 }
 0x171   : > { %4908 = shalt.err (!%p4905_p5)
}
 0x172   : > { %4284 = dma.hbm_to_vmem [thread:$0]  (!%p5823_p6), %s5759_s30, 16, %s1040_s8, [#allocation43]  }
 0x173   : > { %s4909_s1 = scalar_lea.hbm %s6746_s19, 16 }
 0x174   : > { %p4910_p7 = scmp.ne.s32.totalorder %s6746_s19, %s4909_s1  ;;  %p4916_p3 = scmp.lt.u32.totalorder %s4909_s1, %s6746_s19 }
 0x176   : > { %p4912_p4 = pnand %p4910_p7, %p5835_p8 }
 0x178   : > { %p4913_p1 = pneg %p4912_p4 }
 0x17a   : > { %p4918_p9 = pnand %p4916_p3, %p4913_p1 }
 0x17c   : > { %4921 = shalt.err (!%p4918_p9)
}
 0x17d   : > { %s4922_s2 = scalar_lea.vmem %s1064_s10, 16  ;;  %s4929_s23 = scalar_lea.vmem %s1064_s10, 32 }
 0x17e   : > { %p4923_p10 = scmp.ne.s32.totalorder %s1064_s10, %s4922_s2  ;;  %p4930_p13 = scmp.lt.s32.totalorder %s1064_s10, %s1064_s10 }
 0x17f   : > { %p4931_p0 = scmp.lt.s32.totalorder %s4929_s23, %s4922_s2 }
 0x180   : > { %p4925_p11 = pnand %p4923_p10, %p5835_p8 }
 0x181   : > { %p4932_p2 = por %p4931_p0, %p4930_p13 }
 0x182   : > { %p4926_p12 = pneg %p4925_p11 }
 0x184   : > { %p4933_p5 = pnand %p4932_p2, %p4926_p12 }
 0x186   : > { %4936 = shalt.err (!%p4933_p5)
}
 0x187   : > { %4290 = dma.hbm_to_vmem [thread:$0]  (!%p5823_p6), %s6746_s19, 16, %s1064_s10, [#allocation46]  }
 0x188   : > { %s3713_s8 = sadd.s32 4294967294, %s5551_s18   ;;  %s5989_s28 = sadd.s32 1, %s5551_s18  }
 0x189   : > { %s103_s22 = sadd.s32 1, %s5547_s16  ;;  %s100_s11 = ssub.s32 %s5551_s18, %s5989_s28 }
 0x18a   : > { %p110_p7 = scmp.ne.s32.totalorder %s5547_s16, %s5543_s15  ;;  %p101_p4 = scmp.eq.s32.totalorder %s100_s11, 0 }
 0x18b   : > { %p111_p1 = scmp.eq.s32.totalorder %s5551_s18, 0  ;;  %p116_p3 = scmp.ne.s32.totalorder %s5543_s15, %s5539_s0 }
 0x18c   : > { %p764_p9 = scmp.eq.s32.totalorder %s5807_s26, 1  ;;  %p6757_p11 = scmp.eq.s32.totalorder %s5807_s26, 0 }
 0x18d   : > { %s6001_s1 = scalar_select %p101_p4, %s5547_s16, %s103_s22  }
 0x18e   : > { %p112_p10 = por %p111_p1, %p110_p7  ;;  %p6005_p12 = por %p6757_p11, %p116_p3 }
 0x18f   : > { %p6009_p13 = por %p764_p9, %p110_p7  ;;  %p770_p0 = scmp.eq.s32.totalorder %s3713_s8, 1 }
 0x190   : > { %s6758_s10 = scalar_select %p6005_p12, 1, 0 }
 0x191   : > { %s6759_s2 = scalar_select %p6009_p13, 1, 0 }
 0x192   : > { %p4340_p2 = scmp.lt.s32.totalorder %s5551_s18, 2  ;;  %s6015_s23 = sand.u32 1, %s5547_s16  }
 0x193   : > { %p6017_p5 = por %p770_p0, %p116_p3  ;;  %s6690_s11 = sshll.u32 %s6015_s23, 3 }
 0x194   : > { %s6682_s3 = sshll.u32 %s5551_s18, 7  ;;  %p6023_p4 = pnand %p4340_p2, %p112_p10 }
 0x195   : > { %s6760_s22 = scalar_select %p6017_p5, 1, 0 }
 0x196   : > { %s6761_s4 = scalar_select %p6023_p4, 1, 0 }
 0x197   : > { %s6689_s6 = sand.u32 1, %s5551_s18   ;;  %s6031_s8 = scalar_lea.hbm %s6743_s9, %s6682_s3 }
 0x198   : > { %s1121_s12 = scalar_lea.vmem [#allocation6], %s6690_s11  ;;  %s6039_s14 = scalar_lea.sflag [#allocation7], %s6689_s6 }
 0x199   : > { %s1128_s13 = sshll.u32 %s1121_s12, 4  ;;  %s4937_s19 = scalar_lea.hbm %s6031_s8, 128  ;;  %s6035_s13 = int_to_ptr.vmem [resolvable:$true] %s1128_s13 }
 0x19a   : > { %p4938_p7 = scmp.ne.s32.totalorder %s6031_s8, %s4937_s19  ;;  %p6045_p1 = pneg %p6023_p4 }
 0x19b   : > { %s4942_s3 = scalar_lea.hbm %s6743_s9, 256  ;;  %p4943_p10 = scmp.lt.u32.totalorder %s6031_s8, %s6743_s9 }
 0x19c   : > { %s6762_s20 = scalar_select %p6045_p1, 1, 0 }
 0x19d   : > { %p4940_p3 = pnand %p6045_p1, %p4938_p7  ;;  %p4944_p11 = scmp.lt.u32.totalorder %s4942_s3, %s4937_s19 }
 0x19e   : > { %p4946_p2 = scmp.lt.u32.totalorder %s4937_s19, %s6031_s8 }
 0x19f   : > { %p4941_p9 = pneg %p4940_p3  ;;  %p4945_p0 = por %p4944_p11, %p4943_p10 }
 0x1a1   : > { %p4947_p5 = por %p4946_p2, %p4945_p0 }
 0x1a3   : > { %p4948_p13 = pnand %p4947_p5, %p4941_p9 }
 0x1a5   : > { %4951 = shalt.err (!%p4948_p13)
}
 0x1a6   : > { %s4952_s12 = scalar_lea.vmem %s6035_s13, 128  ;;  %s5598_s6 = smov [#allocation6]  }
 0x1a7   : > { %p4953_p12 = scmp.ne.s32.totalorder %s6035_s13, %s4952_s12  ;;  %s4957_s11 = sshll.u32 %s5598_s6, 4  ;;  %s4958_s11 = int_to_ptr.vmem [resolvable:$false] %s4957_s11 }
 0x1a8   : > { %s4959_s21 = scalar_lea.vmem %s4958_s11, 256  ;;  %p4960_p7 = scmp.lt.s32.totalorder %s6035_s13, %s4958_s11 }
 0x1a9   : > { %p4955_p6 = pnand %p4953_p12, %p6045_p1  ;;  %p4961_p3 = scmp.lt.s32.totalorder %s4959_s21, %s4952_s12 }
 0x1ab   : > { %p4956_p8 = pneg %p4955_p6  ;;  %p4962_p10 = por %p4961_p3, %p4960_p7 }
 0x1ad   : > { %p4963_p11 = pnand %p4962_p10, %p4956_p8 }
 0x1af   : > { %4966 = shalt.err (!%p4963_p11)
}
 0x1b0   : > { %s6763_s3 = smov 4   ;;  %s6764_s19 = smov 64  }
 0x1b1   : > { %4303 = dma.hbm_to_vmem [thread:$0]  (!%p6023_p4), %s6031_s8, 128, %s6035_s13, %s6039_s14, %s6764_s19, %s6764_s19, %s6763_s3  }
 0x1b2   : > { %s5599_s6 = smov [#allocation14]   ;;  %s5600_s21 = smov [#allocation17]  }
 0x1b3   : > { %s813_s9 = sshll.u32 %s5599_s6, 4  ;;  %s837_s11 = sshll.u32 %s5600_s21, 4  ;;  %s814_s9 = int_to_ptr.vmem [resolvable:$true] %s813_s9  ;;  %s838_s11 = int_to_ptr.vmem [resolvable:$true] %s837_s11 }
 0x1b4   : > { %s4967_s12 = scalar_lea.hbm %s5664_s29, 256  ;;  %p6765_p8 = scmp.ne.s32.totalorder %s6756_s17, 0 }
 0x1b5   : > { %p4968_p6 = scmp.ne.s32.totalorder %s5664_s29, %s4967_s12  ;;  %p4974_p5 = scmp.lt.u32.totalorder %s4967_s12, %s5664_s29 }
 0x1b7   : > { %p4970_p12 = pnand %p4968_p6, %p6765_p8 }
 0x1b9   : > { %p4971_p13 = pneg %p4970_p12 }
 0x1bb   : > { %p4976_p9 = pnand %p4974_p5, %p4971_p13 }
 0x1bd   : > { %4979 = shalt.err (!%p4976_p9)
}
 0x1be   : > { %s4980_s24 = scalar_lea.vmem %s814_s9, 256  ;;  %p4988_p3 = scmp.lt.s32.totalorder %s814_s9, %s814_s9 }
 0x1bf   : > { %p4981_p0 = scmp.ne.s32.totalorder %s814_s9, %s4980_s24  ;;  %p4989_p10 = scmp.lt.s32.totalorder %s4980_s24, %s4980_s24 }
 0x1c1   : > { %p4983_p2 = pnand %p4981_p0, %p6765_p8  ;;  %p4990_p11 = por %p4989_p10, %p4988_p3 }
 0x1c3   : > { %p4984_p7 = pneg %p4983_p2 }
 0x1c5   : > { %p4991_p4 = pnand %p4990_p11, %p4984_p7 }
 0x1c7   : > { %4994 = shalt.err (!%p4991_p4)
}
 0x1c8   : > { %p6766_p1 = scmp.ne.s32.totalorder %s6755_s7, 0  ;;  %s6767_s13 = sld [smem:[#allocation76_spill]] }
 0x1ca   : > { %4227 = dma.hbm_to_vmem [thread:$0]  (!%p6766_p1), %s5664_s29, 256, %s814_s9, [#allocation13], %s6764_s19, %s6764_s19, %s6763_s3  }
 0x1ce   : > { %s4995_s8 = scalar_lea.hbm %s6767_s13, 256 }
 0x1cf   : > { %p4996_p6 = scmp.ne.s32.totalorder %s6767_s13, %s4995_s8  ;;  %p5002_p5 = scmp.lt.u32.totalorder %s4995_s8, %s6767_s13 }
 0x1d1   : > { %p4998_p12 = pnand %p4996_p6, %p6765_p8 }
 0x1d3   : > { %p4999_p13 = pneg %p4998_p12 }
 0x1d5   : > { %p5004_p9 = pnand %p5002_p5, %p4999_p13 }
 0x1d7   : > { %5007 = shalt.err (!%p5004_p9)
}
 0x1d8   : > { %s5008_s24 = scalar_lea.vmem %s838_s11, 256  ;;  %p5016_p7 = scmp.lt.s32.totalorder %s838_s11, %s838_s11 }
 0x1d9   : > { %p5009_p4 = scmp.ne.s32.totalorder %s838_s11, %s5008_s24  ;;  %p5017_p3 = scmp.lt.s32.totalorder %s5008_s24, %s5008_s24 }
 0x1db   : > { %p5011_p0 = pnand %p5009_p4, %p6765_p8  ;;  %p5018_p10 = por %p5017_p3, %p5016_p7 }
 0x1dd   : > { %p5012_p2 = pneg %p5011_p0 }
 0x1df   : > { %p5019_p11 = pnand %p5018_p10, %p5012_p2 }
 0x1e1   : > { %5022 = shalt.err (!%p5019_p11)
}
 0x1e2   : > { %s6768_s9 = sld [smem:[#allocation78_spill]]  ;;  %s5601_s6 = smov [#allocation20]  }
 0x1e3   : > { %4233 = dma.hbm_to_vmem [thread:$0]  (!%p6766_p1), %s6767_s13, 256, %s838_s11, [#allocation16], %s6764_s19, %s6764_s19, %s6763_s3  }
 0x1e4   : > { %s861_s21 = sshll.u32 %s5601_s6, 4  ;;  %s5602_s12 = smov [#allocation23]   ;;  %s862_s21 = int_to_ptr.vmem [resolvable:$true] %s861_s21 }
 0x1e5   : > { %s886_s8 = sshll.u32 %s5602_s12, 4  ;;  %s887_s8 = int_to_ptr.vmem [resolvable:$true] %s886_s8 }
 0x1e8   : > { %s5023_s24 = scalar_lea.hbm %s6768_s9, 256 }
 0x1e9   : > { %p5024_p6 = scmp.ne.s32.totalorder %s6768_s9, %s5023_s24  ;;  %p5030_p5 = scmp.lt.u32.totalorder %s5023_s24, %s6768_s9 }
 0x1eb   : > { %p5026_p12 = pnand %p5024_p6, %p6765_p8 }
 0x1ed   : > { %p5027_p13 = pneg %p5026_p12 }
 0x1ef   : > { %p5032_p9 = pnand %p5030_p5, %p5027_p13 }
 0x1f1   : > { %5035 = shalt.err (!%p5032_p9)
}
 0x1f2   : > { %s5036_s25 = scalar_lea.vmem %s862_s21, 256  ;;  %p5044_p7 = scmp.lt.s32.totalorder %s862_s21, %s862_s21 }
 0x1f3   : > { %p5037_p4 = scmp.ne.s32.totalorder %s862_s21, %s5036_s25  ;;  %p5045_p3 = scmp.lt.s32.totalorder %s5036_s25, %s5036_s25 }
 0x1f5   : > { %p5039_p0 = pnand %p5037_p4, %p6765_p8  ;;  %p5046_p10 = por %p5045_p3, %p5044_p7 }
 0x1f7   : > { %p5040_p2 = pneg %p5039_p0 }
 0x1f9   : > { %p5047_p11 = pnand %p5046_p10, %p5040_p2 }
 0x1fb   : > { %5050 = shalt.err (!%p5047_p11)
}
 0x1fc   : > { %s6769_s11 = sld [smem:[#allocation80_spill]] }
 0x1fd   : > { %4239 = dma.hbm_to_vmem [thread:$0]  (!%p6766_p1), %s6768_s9, 256, %s862_s21, [#allocation19], %s6764_s19, %s6764_s19, %s6763_s3  }
 0x202   : > { %s5051_s6 = scalar_lea.hbm %s6769_s11, 16 }
 0x203   : > { %p5052_p6 = scmp.ne.s32.totalorder %s6769_s11, %s5051_s6  ;;  %p5058_p5 = scmp.lt.u32.totalorder %s5051_s6, %s6769_s11 }
 0x205   : > { %p5054_p12 = pnand %p5052_p6, %p6765_p8 }
 0x207   : > { %p5055_p13 = pneg %p5054_p12 }
 0x209   : > { %p5060_p9 = pnand %p5058_p5, %p5055_p13 }
 0x20b   : > { %5063 = shalt.err (!%p5060_p9)
}
 0x20c   : > { %s5064_s25 = scalar_lea.vmem %s887_s8, 16  ;;  %s5071_s12 = scalar_lea.vmem %s887_s8, 32 }
 0x20d   : > { %p5065_p4 = scmp.ne.s32.totalorder %s887_s8, %s5064_s25  ;;  %p5072_p7 = scmp.lt.s32.totalorder %s887_s8, %s887_s8 }
 0x20e   : > { %p5073_p3 = scmp.lt.s32.totalorder %s5071_s12, %s5064_s25 }
 0x20f   : > { %p5067_p0 = pnand %p5065_p4, %p6765_p8 }
 0x210   : > { %p5074_p10 = por %p5073_p3, %p5072_p7 }
 0x211   : > { %p5068_p2 = pneg %p5067_p0 }
 0x213   : > { %p5075_p11 = pnand %p5074_p10, %p5068_p2 }
 0x215   : > { %5078 = shalt.err (!%p5075_p11)
}
 0x216   : > { %s6770_s21 = sld [smem:[#allocation82_spill]]  ;;  %s5603_s24 = smov [#allocation26]  }
 0x217   : > { %4245 = dma.hbm_to_vmem [thread:$0]  (!%p6766_p1), %s6769_s11, 16, %s887_s8, [#allocation22]  }
 0x218   : > { %s907_s6 = sshll.u32 %s5603_s24, 4  ;;  %s5604_s9 = smov [#allocation29]   ;;  %s908_s6 = int_to_ptr.vmem [resolvable:$true] %s907_s6 }
 0x219   : > { %s931_s13 = sshll.u32 %s5604_s9, 4  ;;  %s932_s13 = int_to_ptr.vmem [resolvable:$true] %s931_s13 }
 0x21c   : > { %s5079_s27 = scalar_lea.hbm %s6770_s21, 256 }
 0x21d   : > { %p5080_p6 = scmp.ne.s32.totalorder %s6770_s21, %s5079_s27  ;;  %p5086_p5 = scmp.lt.u32.totalorder %s5079_s27, %s6770_s21 }
 0x21f   : > { %p5082_p12 = pnand %p5080_p6, %p6765_p8 }
 0x221   : > { %p5083_p13 = pneg %p5082_p12 }
 0x223   : > { %p5088_p9 = pnand %p5086_p5, %p5083_p13 }
 0x225   : > { %5091 = shalt.err (!%p5088_p9)
}
 0x226   : > { %s5092_s25 = scalar_lea.vmem %s908_s6, 256  ;;  %p5100_p7 = scmp.lt.s32.totalorder %s908_s6, %s908_s6 }
 0x227   : > { %p5093_p4 = scmp.ne.s32.totalorder %s908_s6, %s5092_s25  ;;  %p5101_p3 = scmp.lt.s32.totalorder %s5092_s25, %s5092_s25 }
 0x229   : > { %p5095_p0 = pnand %p5093_p4, %p6765_p8  ;;  %p5102_p10 = por %p5101_p3, %p5100_p7 }
 0x22b   : > { %p5096_p2 = pneg %p5095_p0 }
 0x22d   : > { %p5103_p11 = pnand %p5102_p10, %p5096_p2 }
 0x22f   : > { %5106 = shalt.err (!%p5103_p11)
}
 0x230   : > { %s6771_s27 = sld [smem:[#allocation84_spill]] }
 0x231   : > { %4251 = dma.hbm_to_vmem [thread:$0]  (!%p6766_p1), %s6770_s21, 256, %s908_s6, [#allocation25], %s6764_s19, %s6764_s19, %s6763_s3  }
 0x236   : > { %s5107_s9 = scalar_lea.hbm %s6771_s27, 256 }
 0x237   : > { %p5108_p6 = scmp.ne.s32.totalorder %s6771_s27, %s5107_s9  ;;  %p5114_p5 = scmp.lt.u32.totalorder %s5107_s9, %s6771_s27 }
 0x239   : > { %p5110_p12 = pnand %p5108_p6, %p6765_p8 }
 0x23b   : > { %p5111_p13 = pneg %p5110_p12 }
 0x23d   : > { %p5116_p9 = pnand %p5114_p5, %p5111_p13 }
 0x23f   : > { %5119 = shalt.err (!%p5116_p9)
}
 0x240   : > { %s5120_s8 = scalar_lea.vmem %s932_s13, 256  ;;  %p5128_p7 = scmp.lt.s32.totalorder %s932_s13, %s932_s13 }
 0x241   : > { %p5121_p4 = scmp.ne.s32.totalorder %s932_s13, %s5120_s8  ;;  %p5129_p3 = scmp.lt.s32.totalorder %s5120_s8, %s5120_s8 }
 0x243   : > { %p5123_p0 = pnand %p5121_p4, %p6765_p8  ;;  %p5130_p10 = por %p5129_p3, %p5128_p7 }
 0x245   : > { %p5124_p2 = pneg %p5123_p0 }
 0x247   : > { %p5131_p11 = pnand %p5130_p10, %p5124_p2 }
 0x249   : > { %5134 = shalt.err (!%p5131_p11)
}
 0x24a   : > { %s6772_s12 = sld [smem:[#allocation86_spill]]  ;;  %s5605_s24 = smov [#allocation32]  }
 0x24b   : > { %4257 = dma.hbm_to_vmem [thread:$0]  (!%p6766_p1), %s6771_s27, 256, %s932_s13, [#allocation28], %s6764_s19, %s6764_s19, %s6763_s3  }
 0x24c   : > { %s955_s6 = sshll.u32 %s5605_s24, 4  ;;  %s5606_s25 = smov [#allocation35]   ;;  %s956_s6 = int_to_ptr.vmem [resolvable:$true] %s955_s6 }
 0x24d   : > { %s979_s9 = sshll.u32 %s5606_s25, 4  ;;  %s980_s9 = int_to_ptr.vmem [resolvable:$true] %s979_s9 }
 0x250   : > { %s5135_s8 = scalar_lea.hbm %s6772_s12, 256 }
 0x251   : > { %p5136_p6 = scmp.ne.s32.totalorder %s6772_s12, %s5135_s8  ;;  %p5142_p5 = scmp.lt.u32.totalorder %s5135_s8, %s6772_s12 }
 0x253   : > { %p5138_p12 = pnand %p5136_p6, %p6765_p8 }
 0x255   : > { %p5139_p13 = pneg %p5138_p12 }
 0x257   : > { %p5144_p9 = pnand %p5142_p5, %p5139_p13 }
 0x259   : > { %5147 = shalt.err (!%p5144_p9)
}
 0x25a   : > { %s5148_s11 = scalar_lea.vmem %s956_s6, 256  ;;  %p5156_p7 = scmp.lt.s32.totalorder %s956_s6, %s956_s6 }
 0x25b   : > { %p5149_p4 = scmp.ne.s32.totalorder %s956_s6, %s5148_s11  ;;  %p5157_p3 = scmp.lt.s32.totalorder %s5148_s11, %s5148_s11 }
 0x25d   : > { %p5151_p0 = pnand %p5149_p4, %p6765_p8  ;;  %p5158_p10 = por %p5157_p3, %p5156_p7 }
 0x25f   : > { %p5152_p2 = pneg %p5151_p0 }
 0x261   : > { %p5159_p11 = pnand %p5158_p10, %p5152_p2 }
 0x263   : > { %5162 = shalt.err (!%p5159_p11)
}
 0x264   : > { %s6773_s13 = sld [smem:[#allocation88_spill]] }
 0x265   : > { %4263 = dma.hbm_to_vmem [thread:$0]  (!%p6766_p1), %s6772_s12, 256, %s956_s6, [#allocation31], %s6764_s19, %s6764_s19, %s6763_s3  }
 0x26a   : > { %s5163_s24 = scalar_lea.hbm %s6773_s13, 256 }
 0x26b   : > { %p5164_p6 = scmp.ne.s32.totalorder %s6773_s13, %s5163_s24  ;;  %p5170_p5 = scmp.lt.u32.totalorder %s5163_s24, %s6773_s13 }
 0x26d   : > { %p5166_p12 = pnand %p5164_p6, %p6765_p8 }
 0x26f   : > { %p5167_p13 = pneg %p5166_p12 }
 0x271   : > { %p5172_p9 = pnand %p5170_p5, %p5167_p13 }
 0x273   : > { %5175 = shalt.err (!%p5172_p9)
}
 0x274   : > { %s5176_s11 = scalar_lea.vmem %s980_s9, 256  ;;  %p5184_p7 = scmp.lt.s32.totalorder %s980_s9, %s980_s9 }
 0x275   : > { %p5177_p4 = scmp.ne.s32.totalorder %s980_s9, %s5176_s11  ;;  %p5185_p3 = scmp.lt.s32.totalorder %s5176_s11, %s5176_s11 }
 0x277   : > { %p5179_p0 = pnand %p5177_p4, %p6765_p8  ;;  %p5186_p10 = por %p5185_p3, %p5184_p7 }
 0x279   : > { %p5180_p2 = pneg %p5179_p0 }
 0x27b   : > { %p5187_p11 = pnand %p5186_p10, %p5180_p2 }
 0x27d   : > { %5190 = shalt.err (!%p5187_p11)
}
 0x27e   : > { %s6774_s6 = sld [smem:[#allocation90_spill]]  ;;  %s5607_s25 = smov [#allocation38]  }
 0x27f   : > { %4269 = dma.hbm_to_vmem [thread:$0]  (!%p6766_p1), %s6773_s13, 256, %s980_s9, [#allocation34], %s6764_s19, %s6764_s19, %s6763_s3  }
 0x280   : > { %s1004_s8 = sshll.u32 %s5607_s25, 4  ;;  %s5608_s24 = smov [#allocation41]   ;;  %s1005_s8 = int_to_ptr.vmem [resolvable:$true] %s1004_s8 }
 0x281   : > { %s1025_s12 = sshll.u32 %s5608_s24, 4  ;;  %s1026_s12 = int_to_ptr.vmem [resolvable:$true] %s1025_s12 }
 0x284   : > { %s5191_s11 = scalar_lea.hbm %s6774_s6, 16 }
 0x285   : > { %p5192_p6 = scmp.ne.s32.totalorder %s6774_s6, %s5191_s11  ;;  %p5198_p5 = scmp.lt.u32.totalorder %s5191_s11, %s6774_s6 }
 0x287   : > { %p5194_p12 = pnand %p5192_p6, %p6765_p8 }
 0x289   : > { %p5195_p13 = pneg %p5194_p12 }
 0x28b   : > { %p5200_p9 = pnand %p5198_p5, %p5195_p13 }
 0x28d   : > { %5203 = shalt.err (!%p5200_p9)
}
 0x28e   : > { %s5204_s21 = scalar_lea.vmem %s1005_s8, 16  ;;  %s5211_s9 = scalar_lea.vmem %s1005_s8, 32 }
 0x28f   : > { %p5205_p4 = scmp.ne.s32.totalorder %s1005_s8, %s5204_s21  ;;  %p5212_p7 = scmp.lt.s32.totalorder %s1005_s8, %s1005_s8 }
 0x290   : > { %p5213_p3 = scmp.lt.s32.totalorder %s5211_s9, %s5204_s21 }
 0x291   : > { %p5207_p0 = pnand %p5205_p4, %p6765_p8 }
 0x292   : > { %p5214_p10 = por %p5213_p3, %p5212_p7 }
 0x293   : > { %p5208_p2 = pneg %p5207_p0 }
 0x295   : > { %p5215_p11 = pnand %p5214_p10, %p5208_p2 }
 0x297   : > { %5218 = shalt.err (!%p5215_p11)
}
 0x298   : > { %s6775_s25 = sld [smem:[#allocation92_spill]] }
 0x299   : > { %4275 = dma.hbm_to_vmem [thread:$0]  (!%p6766_p1), %s6774_s6, 16, %s1005_s8, [#allocation37]  }
 0x29e   : > { %s5219_s24 = scalar_lea.hbm %s6775_s25, 256 }
 0x29f   : > { %p5220_p6 = scmp.ne.s32.totalorder %s6775_s25, %s5219_s24  ;;  %p5226_p5 = scmp.lt.u32.totalorder %s5219_s24, %s6775_s25 }
 0x2a1   : > { %p5222_p12 = pnand %p5220_p6, %p6765_p8 }
 0x2a3   : > { %p5223_p13 = pneg %p5222_p12 }
 0x2a5   : > { %p5228_p9 = pnand %p5226_p5, %p5223_p13 }
 0x2a7   : > { %5231 = shalt.err (!%p5228_p9)
}
 0x2a8   : > { %s5232_s21 = scalar_lea.vmem %s1026_s12, 256  ;;  %p5240_p7 = scmp.lt.s32.totalorder %s1026_s12, %s1026_s12 }
 0x2a9   : > { %p5233_p4 = scmp.ne.s32.totalorder %s1026_s12, %s5232_s21  ;;  %p5241_p3 = scmp.lt.s32.totalorder %s5232_s21, %s5232_s21 }
 0x2ab   : > { %p5235_p0 = pnand %p5233_p4, %p6765_p8  ;;  %p5242_p10 = por %p5241_p3, %p5240_p7 }
 0x2ad   : > { %p5236_p2 = pneg %p5235_p0 }
 0x2af   : > { %p5243_p11 = pnand %p5242_p10, %p5236_p2 }
 0x2b1   : > { %5246 = shalt.err (!%p5243_p11)
}
 0x2b2   : > { %s6776_s8 = sld [smem:[#allocation93_spill]]  ;;  %s5609_s11 = smov [#allocation44]  }
 0x2b3   : > { %4281 = dma.hbm_to_vmem [thread:$0]  (!%p6766_p1), %s6775_s25, 256, %s1026_s12, [#allocation40], %s6764_s19, %s6764_s19, %s6763_s3  }
 0x2b4   : > { %s1049_s9 = sshll.u32 %s5609_s11, 4  ;;  %s5610_s24 = smov [#allocation47]   ;;  %s1050_s9 = int_to_ptr.vmem [resolvable:$true] %s1049_s9 }
 0x2b5   : > { %s1074_s6 = sshll.u32 %s5610_s24, 4  ;;  %s1075_s6 = int_to_ptr.vmem [resolvable:$true] %s1074_s6 }
 0x2b8   : > { %s5247_s21 = scalar_lea.hbm %s6776_s8, 512 }
 0x2b9   : > { %p5248_p6 = scmp.ne.s32.totalorder %s6776_s8, %s5247_s21  ;;  %p5254_p5 = scmp.lt.u32.totalorder %s5247_s21, %s6776_s8 }
 0x2bb   : > { %p5250_p12 = pnand %p5248_p6, %p6765_p8 }
 0x2bd   : > { %p5251_p13 = pneg %p5250_p12 }
 0x2bf   : > { %p5256_p9 = pnand %p5254_p5, %p5251_p13 }
 0x2c1   : > { %5259 = shalt.err (!%p5256_p9)
}
 0x2c2   : > { %s5260_s13 = scalar_lea.vmem %s1050_s9, 512  ;;  %p5268_p7 = scmp.lt.s32.totalorder %s1050_s9, %s1050_s9 }
 0x2c3   : > { %p5261_p4 = scmp.ne.s32.totalorder %s1050_s9, %s5260_s13  ;;  %p5269_p3 = scmp.lt.s32.totalorder %s5260_s13, %s5260_s13 }
 0x2c5   : > { %p5263_p0 = pnand %p5261_p4, %p6765_p8  ;;  %p5270_p10 = por %p5269_p3, %p5268_p7 }
 0x2c7   : > { %p5264_p2 = pneg %p5263_p0 }
 0x2c9   : > { %p5271_p11 = pnand %p5270_p10, %p5264_p2 }
 0x2cb   : > { %5274 = shalt.err (!%p5271_p11)
}
 0x2cc   : > { %4287 = dma.hbm_to_vmem [thread:$0]  (!%p6766_p1), %s6776_s8, 512, %s1050_s9, [#allocation43], %s6764_s19, %s6764_s19, %s6763_s3  }
 0x2cd   : > { %s5275_s12 = scalar_lea.hbm %s6739_s5, 16 }
 0x2ce   : > { %p5276_p6 = scmp.ne.s32.totalorder %s6739_s5, %s5275_s12  ;;  %p5282_p5 = scmp.lt.u32.totalorder %s5275_s12, %s6739_s5 }
 0x2d0   : > { %p5278_p12 = pnand %p5276_p6, %p6765_p8 }
 0x2d2   : > { %p5279_p13 = pneg %p5278_p12 }
 0x2d4   : > { %p5284_p9 = pnand %p5282_p5, %p5279_p13 }
 0x2d6   : > { %5287 = shalt.err (!%p5284_p9)
}
 0x2d7   : > { %s5288_s13 = scalar_lea.vmem %s1075_s6, 16  ;;  %s5295_s11 = scalar_lea.vmem %s1075_s6, 32 }
 0x2d8   : > { %p5289_p4 = scmp.ne.s32.totalorder %s1075_s6, %s5288_s13  ;;  %p5296_p7 = scmp.lt.s32.totalorder %s1075_s6, %s1075_s6 }
 0x2d9   : > { %p5297_p3 = scmp.lt.s32.totalorder %s5295_s11, %s5288_s13 }
 0x2da   : > { %p5291_p0 = pnand %p5289_p4, %p6765_p8 }
 0x2db   : > { %p5298_p10 = por %p5297_p3, %p5296_p7 }
 0x2dc   : > { %p5292_p2 = pneg %p5291_p0 }
 0x2de   : > { %p5299_p11 = pnand %p5298_p10, %p5292_p2 }
 0x2e0   : > { %5302 = shalt.err (!%p5299_p11)
}
 0x2e1   : > { %s6777_s9 = sld [smem:[#allocation96_spill]]  ;;  %s5611_s24 = smov [#allocation48]  }
 0x2e2   : > { %4293 = dma.hbm_to_vmem [thread:$0]  (!%p6766_p1), %s6739_s5, 16, %s1075_s6, [#allocation46]  }
 0x2e3   : > { %s1085_s21 = sshll.u32 %s5611_s24, 4  ;;  %s1086_s21 = int_to_ptr.vmem [resolvable:$true] %s1085_s21 }
 0x2e7   : > { %s5303_s12 = scalar_lea.hbm %s6777_s9, 16 }
 0x2e8   : > { %p5304_p6 = scmp.ne.s32.totalorder %s6777_s9, %s5303_s12  ;;  %p5310_p5 = scmp.lt.u32.totalorder %s5303_s12, %s6777_s9 }
 0x2ea   : > { %p5306_p12 = pnand %p5304_p6, %p6765_p8 }
 0x2ec   : > { %p5307_p13 = pneg %p5306_p12 }
 0x2ee   : > { %p5312_p9 = pnand %p5310_p5, %p5307_p13 }
 0x2f0   : > { %5315 = shalt.err (!%p5312_p9)
}
 0x2f1   : > { %s5316_s13 = scalar_lea.vmem %s1086_s21, 16  ;;  %s5323_s11 = scalar_lea.vmem %s1086_s21, 32 }
 0x2f2   : > { %p5317_p4 = scmp.ne.s32.totalorder %s1086_s21, %s5316_s13  ;;  %p5324_p7 = scmp.lt.s32.totalorder %s1086_s21, %s1086_s21 }
 0x2f3   : > { %p5325_p3 = scmp.lt.s32.totalorder %s5323_s11, %s5316_s13 }
 0x2f4   : > { %p5319_p0 = pnand %p5317_p4, %p6765_p8 }
 0x2f5   : > { %p5326_p10 = por %p5325_p3, %p5324_p7 }
 0x2f6   : > { %p5320_p2 = pneg %p5319_p0 }
 0x2f8   : > { %p5327_p11 = pnand %p5326_p10, %p5320_p2 }
 0x2fa   : > { %5330 = shalt.err (!%p5327_p11)
}
 0x2fb   : > { %s6778_s6 = sld [smem:[#allocation69_spill]]  ;;  %s6779_s17 = sshll.u32 %s5551_s18, 7 }
 0x2fc   : > { %4296 = dma.hbm_to_vmem [thread:$0]  (!%p6766_p1), %s6777_s9, 16, %s1086_s21, [#allocation49]  }
 0x2fd   : > { %s6780_s12 = sshll.u32 %s6015_s23, 3  ;;  %s1097_s7 = scalar_lea.sflag [#allocation4], %s6015_s23 }
 0x2fe   : > { %s1100_s13 = scalar_lea.vmem [#allocation3], %s6780_s12  ;;  %p6781_p6 = scmp.ne.s32.totalorder %s6762_s20, 0 }
 0x2ff   : > { %s1107_s11 = sshll.u32 %s1100_s13, 4  ;;  %s6232_s11 = int_to_ptr.vmem [resolvable:$true] %s1107_s11 }
 0x301   : > { %s6228_s24 = scalar_lea.hbm %s6778_s6, %s6779_s17  ;;  %s5336_s8 = scalar_lea.hbm %s6778_s6, 256 }
 0x302   : > { %s5331_s5 = scalar_lea.hbm %s6228_s24, 128  ;;  %p5337_p1 = scmp.lt.u32.totalorder %s6228_s24, %s6778_s6 }
 0x303   : > { %p5332_p8 = scmp.ne.s32.totalorder %s6228_s24, %s5331_s5  ;;  %p5338_p5 = scmp.lt.u32.totalorder %s5336_s8, %s5331_s5 }
 0x304   : > { %p5340_p4 = scmp.lt.u32.totalorder %s5331_s5, %s6228_s24 }
 0x305   : > { %p5334_p12 = pnand %p5332_p8, %p6781_p6  ;;  %p5339_p9 = por %p5338_p5, %p5337_p1 }
 0x307   : > { %p5335_p13 = pneg %p5334_p12  ;;  %p5341_p0 = por %p5340_p4, %p5339_p9 }
 0x309   : > { %p5342_p2 = pnand %p5341_p0, %p5335_p13 }
 0x30b   : > { %5345 = shalt.err (!%p5342_p2)
}
 0x30c   : > { %s5346_s21 = scalar_lea.vmem %s6232_s11, 128  ;;  %s5612_s17 = smov [#allocation3]  }
 0x30d   : > { %p5347_p7 = scmp.ne.s32.totalorder %s6232_s11, %s5346_s21  ;;  %s5351_s12 = sshll.u32 %s5612_s17, 4  ;;  %s5352_s12 = int_to_ptr.vmem [resolvable:$false] %s5351_s12 }
 0x30e   : > { %s5353_s13 = scalar_lea.vmem %s5352_s12, 256  ;;  %p5354_p11 = scmp.lt.s32.totalorder %s6232_s11, %s5352_s12 }
 0x30f   : > { %p5349_p3 = pnand %p5347_p7, %p6781_p6  ;;  %p5355_p8 = scmp.lt.s32.totalorder %s5353_s13, %s5346_s21 }
 0x311   : > { %p5350_p10 = pneg %p5349_p3  ;;  %p5356_p12 = por %p5355_p8, %p5354_p11 }
 0x313   : > { %p5357_p1 = pnand %p5356_p12, %p5350_p10 }
 0x315   : > { %5360 = shalt.err (!%p5357_p1)
}
 0x316   : > { %p6782_p13 = scmp.ne.s32.totalorder %s6761_s4, 0  ;;  %s6783_s5 = sld [smem:[#allocation71_spill]] }
 0x317   : > { %s3748_s8 = sshll.u32 %s5551_s18, 4  ;;  %s1141_s21 = scalar_lea.vmem [#allocation8], %s6015_s23 }
 0x318   : > { %4300 = dma.hbm_to_vmem [thread:$0]  (!%p6782_p13), %s6228_s24, 128, %s6232_s11, %s1097_s7, %s6764_s19, %s6764_s19, %s6763_s3  }
 0x319   : > { %s1148_s17 = sshll.u32 %s1141_s21, 4  ;;  %s1149_s17 = int_to_ptr.vmem [resolvable:$true] %s1148_s17 }
 0x31c   : > { %s1146_s12 = scalar_lea.hbm %s6783_s5, %s3748_s8  ;;  %s5366_s6 = scalar_lea.hbm %s6783_s5, 32 }
 0x31d   : > { %s5361_s13 = scalar_lea.hbm %s1146_s12, 16  ;;  %p5367_p0 = scmp.lt.u32.totalorder %s1146_s12, %s6783_s5 }
 0x31e   : > { %p5362_p5 = scmp.ne.s32.totalorder %s1146_s12, %s5361_s13  ;;  %p5368_p2 = scmp.lt.u32.totalorder %s5366_s6, %s5361_s13 }
 0x31f   : > { %p5370_p3 = scmp.lt.u32.totalorder %s5361_s13, %s1146_s12 }
 0x320   : > { %p5364_p9 = pnand %p5362_p5, %p6781_p6  ;;  %p5369_p7 = por %p5368_p2, %p5367_p0 }
 0x322   : > { %p5365_p4 = pneg %p5364_p9  ;;  %p5371_p10 = por %p5370_p3, %p5369_p7 }
 0x324   : > { %p5372_p11 = pnand %p5371_p10, %p5365_p4 }
 0x326   : > { %5375 = shalt.err (!%p5372_p11)
}
 0x327   : > { %s5376_s3 = scalar_lea.vmem %s1149_s17, 16  ;;  %s5613_s19 = smov [#allocation8]  }
 0x328   : > { %p5377_p8 = scmp.ne.s32.totalorder %s1149_s17, %s5376_s3  ;;  %s5381_s24 = sshll.u32 %s5613_s19, 4  ;;  %s5382_s24 = int_to_ptr.vmem [resolvable:$false] %s5381_s24 }
 0x329   : > { %s5383_s11 = scalar_lea.vmem %s5382_s24, 32  ;;  %p5384_p5 = scmp.lt.s32.totalorder %s1149_s17, %s5382_s24 }
 0x32a   : > { %p5379_p12 = pnand %p5377_p8, %p6781_p6  ;;  %p5385_p9 = scmp.lt.s32.totalorder %s5383_s11, %s5376_s3 }
 0x32c   : > { %p5380_p1 = pneg %p5379_p12  ;;  %p5386_p13 = por %p5385_p9, %p5384_p5 }
 0x32e   : > { %p5387_p0 = pnand %p5386_p13, %p5380_p1 }
 0x330   : > { %5390 = shalt.err (!%p5387_p0)
}
 0x331   : > { %p6784_p2 = scmp.ne.s32.totalorder %s6761_s4, 0  ;;  %s6785_s6 = sld [smem:[#allocation72_spill]] }
 0x332   : > { %s1158_s21 = scalar_lea.vmem [#allocation9], %s6015_s23  ;;  %s6786_s3 = sand.u32 1, %s5551_s18  }
 0x333   : > { %4306 = dma.hbm_to_vmem [thread:$0]  (!%p6784_p2), %s1146_s12, 16, %s1149_s17, %s6039_s14  }
 0x334   : > { %s1165_s13 = sshll.u32 %s1158_s21, 4  ;;  %s1156_s19 = scalar_lea.sflag [#allocation10], %s6786_s3  ;;  %s1166_s13 = int_to_ptr.vmem [resolvable:$true] %s1165_s13 }
 0x337   : > { %s6274_s7 = scalar_lea.hbm %s6785_s6, %s3748_s8  ;;  %s5396_s11 = scalar_lea.hbm %s6785_s6, 32 }
 0x338   : > { %s5391_s24 = scalar_lea.hbm %s6274_s7, 16  ;;  %p5397_p3 = scmp.lt.u32.totalorder %s6274_s7, %s6785_s6 }
 0x339   : > { %p5392_p13 = scmp.ne.s32.totalorder %s6274_s7, %s5391_s24  ;;  %p5398_p10 = scmp.lt.u32.totalorder %s5396_s11, %s5391_s24 }
 0x33a   : > { %p5400_p8 = scmp.lt.u32.totalorder %s5391_s24, %s6274_s7 }
 0x33b   : > { %p5394_p4 = pnand %p5392_p13, %p6781_p6  ;;  %p5399_p11 = por %p5398_p10, %p5397_p3 }
 0x33d   : > { %p5395_p7 = pneg %p5394_p4  ;;  %p5401_p12 = por %p5400_p8, %p5399_p11 }
 0x33f   : > { %p5402_p1 = pnand %p5401_p12, %p5395_p7 }
 0x341   : > { %5405 = shalt.err (!%p5402_p1)
}
 0x342   : > { %s5406_s14 = scalar_lea.vmem %s1166_s13, 16  ;;  %s5614_s23 = smov [#allocation9]  }
 0x343   : > { %p5407_p5 = scmp.ne.s32.totalorder %s1166_s13, %s5406_s14  ;;  %s5411_s8 = sshll.u32 %s5614_s23, 4  ;;  %s5412_s8 = int_to_ptr.vmem [resolvable:$false] %s5411_s8 }
 0x344   : > { %s5413_s17 = scalar_lea.vmem %s5412_s8, 32  ;;  %p5414_p13 = scmp.lt.s32.totalorder %s1166_s13, %s5412_s8 }
 0x345   : > { %p5409_p9 = pnand %p5407_p5, %p6781_p6  ;;  %p5415_p4 = scmp.lt.s32.totalorder %s5413_s17, %s5406_s14 }
 0x347   : > { %p5410_p0 = pneg %p5409_p9  ;;  %p5416_p2 = por %p5415_p4, %p5414_p13 }
 0x349   : > { %p5417_p3 = pnand %p5416_p2, %p5410_p0 }
 0x34b   : > { %5420 = shalt.err (!%p5417_p3)
}
 0x34c   : > { %p6787_p10 = scmp.ne.s32.totalorder %s6761_s4, 0  ;;  %s6788_s12 = sld [smem:[#allocation98_spill]] }
 0x34e   : > { %4309 = dma.hbm_to_vmem [thread:$0]  (!%p6787_p10), %s6274_s7, 16, %s1166_s13, %s1156_s19  }
 0x352   : > { %p6789_p7 = scmp.ne.s32.totalorder %s6788_s12, 0 }
 0x353   : > { %s6295_s20 = sand.u32 (!%p6789_p7), 1, %s5543_s15   ;;  %p6790_p6 = scmp.ne.s32.totalorder (!%p6789_p7), %s6758_s10, 0 }
 0x354   : > { %1174 = sbr.rel (%p6789_p7) target bundleno = 5234 (0x1472), region = 140  ;;  %s6298_s21 = sshll.u32 (!%p6789_p7), %s6295_s20, 3 }
 0x355   : > { %s1177_s3 = scalar_lea.sflag (!%p6789_p7), [#allocation4], %s6295_s20  ;;  %s1180_s24 = scalar_lea.vmem (!%p6789_p7), [#allocation3], %s6298_s21 }
 0x35b   : > { %5466 = dma.done.wait (%p6790_p6), %s1177_s3, 128  }
 0x35c   : > { %5468 = vsyncadd (%p6790_p6), %s1177_s3, 4294967168  ;;  %s1185_s4 = sand.u32 1, %s5807_s26   ;;  %s1189_s13 = scalar_lea.vmem [#allocation6], %s6298_s21 }
 0x35d   : > { %s1186_s7 = scalar_lea.sflag [#allocation7], %s1185_s4 }
 0x35e   : > { %5470 = dma.done.wait (%p6790_p6), %s1186_s7, 144  }
 0x35f   : > { %5472 = vsyncadd (%p6790_p6), %s1186_s7, 4294967152  ;;  %s1197_s19 = scalar_lea.vmem [#allocation8], %s6295_s20  ;;  %s1203_s11 = scalar_lea.sflag [#allocation10], %s1185_s4 }
 0x360   : > { %s1205_s14 = scalar_lea.vmem [#allocation9], %s6295_s20 }
 0x361   : > { %5474 = dma.done.wait (%p6790_p6), %s1203_s11, 16  }
 0x362   : > { %5476 = vsyncadd (%p6790_p6), %s1203_s11, 4294967280  ;;  %p6791_p2 = scmp.eq.s32.totalorder %s5807_s26, 0 }
 0x364   : > { %5478 = dma.done.wait (%p6791_p2), [#allocation10], 256   ;;  %p6792_p11 = pmov %p6791_p2 }
 0x365   : > { %p6793_p8 = pmov %p6791_p2 }
 0x366   : > { %5480 = vsyncadd (%p6792_p11), [#allocation10], 4294967040 }
 0x367   : > { %5482 = dma.done.wait (%p6793_p8), [#allocation13], 272   ;;  %p6794_p12 = pmov %p6791_p2 }
 0x368   : > { %p6795_p1 = pmov %p6791_p2 }
 0x369   : > { %5484 = vsyncadd (%p6794_p12), [#allocation13], 4294967024 }
 0x36a   : > { %5486 = dma.done.wait (%p6795_p1), [#allocation16], 272   ;;  %p6796_p5 = pmov %p6795_p1 }
 0x36b   : > { %p6797_p9 = pmov %p6795_p1 }
 0x36c   : > { %5488 = vsyncadd (%p6796_p5), [#allocation16], 4294967024 }
 0x36d   : > { %5490 = dma.done.wait (%p6797_p9), [#allocation19], 272   ;;  %p6798_p0 = pmov %p6795_p1 }
 0x36f   : > { %5492 = vsyncadd (%p6798_p0), [#allocation19], 4294967024  ;;  %p6799_p13 = pmov %p6798_p0 }
 0x370   : > { %p6800_p4 = pmov %p6798_p0 }
 0x371   : > { %5494 = dma.done.wait (%p6799_p13), [#allocation22], 32  }
 0x372   : > { %5496 = vsyncadd (%p6800_p4), [#allocation22], 4294967264  ;;  %p6801_p3 = pmov %p6798_p0 }
 0x373   : > { %p6802_p10 = pmov %p6798_p0 }
 0x374   : > { %5498 = dma.done.wait (%p6801_p3), [#allocation25], 272  }
 0x375   : > { %5500 = vsyncadd (%p6802_p10), [#allocation25], 4294967024  ;;  %p6803_p7 = pmov %p6798_p0 }
 0x376   : > { %p6804_p6 = pmov %p6798_p0 }
 0x377   : > { %5502 = dma.done.wait (%p6803_p7), [#allocation28], 272  }
 0x378   : > { %5504 = vsyncadd (%p6804_p6), [#allocation28], 4294967024  ;;  %p6805_p2 = pmov %p6798_p0 }
 0x379   : > { %p6806_p11 = pmov %p6798_p0 }
 0x37a   : > { %5506 = dma.done.wait (%p6805_p2), [#allocation31], 272  }
 0x37b   : > { %5508 = vsyncadd (%p6806_p11), [#allocation31], 4294967024  ;;  %p6807_p8 = pmov %p6798_p0 }
 0x37c   : > { %p6808_p12 = pmov %p6798_p0 }
 0x37d   : > { %5510 = dma.done.wait (%p6807_p8), [#allocation34], 272  }
 0x37e   : > { %5512 = vsyncadd (%p6808_p12), [#allocation34], 4294967024  ;;  %p6809_p1 = pmov %p6798_p0 }
 0x37f   : > { %p6810_p5 = pmov %p6798_p0 }
 0x380   : > { %5514 = dma.done.wait (%p6809_p1), [#allocation37], 32  }
 0x381   : > { %5516 = vsyncadd (%p6810_p5), [#allocation37], 4294967264  ;;  %p6811_p9 = pmov %p6798_p0 }
 0x383   : > { %5518 = dma.done.wait (%p6811_p9), [#allocation40], 272  }
 0x384   : > { %5520 = vsyncadd (%p6798_p0), [#allocation40], 4294967024  ;;  %p6812_p13 = pmov %p6798_p0 }
 0x385   : > { %p6813_p4 = pmov %p6798_p0 }
 0x386   : > { %5522 = dma.done.wait (%p6812_p13), [#allocation43], 528  }
 0x387   : > { %5524 = vsyncadd (%p6813_p4), [#allocation43], 4294966768  ;;  %p6814_p3 = pmov %p6798_p0 }
 0x388   : > { %p6815_p10 = pmov %p6798_p0 }
 0x389   : > { %5526 = dma.done.wait (%p6814_p3), [#allocation46], 32  }
 0x38a   : > { %5528 = vsyncadd (%p6815_p10), [#allocation46], 4294967264  ;;  %p6816_p7 = pmov %p6798_p0 }
 0x38b   : > { %p6817_p6 = pmov %p6798_p0 }
 0x38c   : > { %5530 = dma.done.wait (%p6816_p7), [#allocation49], 16  }
 0x38d   : > { %5532 = vsyncadd (%p6817_p6), [#allocation49], 4294967280  ;;  %v5615_v0 = vmov 0.0   ;;  %vm5616_vm0 = vmmov 0   ;;  %v4468_v1 = vld [vmem:[#allocation14] sm:$0xff]   ;;  %v4469_v2 = vld [vmem:[#allocation11] sm:$0xff]  }
 0x38e   : > { %3932 = vmatprep.subr.bf16.mxu1 %v5615_v0  ;;  %3924 = vmatprep.subr.bf16.mxu0 %v5615_v0  ;;  %v4470_v3 = vld [vmem:[#allocation14 + $0x8] sm:$0xff]   ;;  %v4471_v4 = vld [vmem:[#allocation11 + $0x8] sm:$0xff]   ;;  %vm1433_vm1 = vcmask 261120   ;;  %v3780_v7 = vld [vmem:[#allocation12] ss:$0 sm:$0xff]  ;;  %vm1625_vm2 = vcmask 64512  }
 0x38f   : > { %3936 = vmatprep.mubr.msk.bf16.mxu1 %vm5616_vm0, %v5615_v0  ;;  %3928 = vmatprep.mubr.msk.bf16.mxu0 %vm5616_vm0, %v5615_v0  ;;  %v4472_v5 = vld [vmem:[%s1189_s13] sm:$0xff]   ;;  %v6386_v6 = vld [vmem:[%s1180_s24] sm:$0xff]   ;;  %s5617_s10 = smov 112   ;;  %s5618_s23 = smov 120   ;;  %vm1673_vm3 = vcmask 130048   ;;  %vm1872_vm4 = vcmask 130112  }
 0x390   : > { %3933 = vmatpush3.bf16.msra.mxu1 %v4468_v1  ;;  %3925 = vmatpush3.bf16.msra.mxu0 %v4469_v2  ;;  %v3785_v8 = vld [vmem:[#allocation15] ss:$0 sm:$0xff]  ;;  %s5619_s8 = smov 104   ;;  %v4474_v26 = vld [vmem:[#allocation17] sm:$0xff]   ;;  %v4475_v27 = vld [vmem:[#allocation17 + $0x8] sm:$0xff]   ;;  %s5620_s17 = smov 8  }
 0x391   : > { %3934 = vmatprep.subr.bf16.mxu1 %v5615_v0  ;;  %3926 = vmatprep.subr.bf16.mxu0 %v5615_v0  ;;  %v3794_v37 = vld [vmem:[%s1197_s19] ss:$0 sm:$0xff]  ;;  %s5621_s12 = smov 16   ;;  %s5622_s3 = smov 24   ;;  %vm2000_vm5 = vcmask 195712   ;;  %vm2128_vm6 = vcmask 261312  }
 0x392   : > { %v3790_v46 = vld [vmem:[#allocation18] ss:$0 sm:$0xff]  ;;  %vm3187_vm7 = vcmask 523264   ;;  %s6818_s24 = sld [smem:[#allocation97_spill]]  ;;  %s3859_s4 = sshll.u32 %s5807_s26, 7  ;;  %vm3286_vm8 = vcmask 257024  }
 0x393   : > { %s1398_s7 = scalar_lea.vmem [#allocation50], %s6298_s21  ;;  %s3290_s11 = scalar_lea.sflag [#allocation5], %s6295_s20 }
 0x394   : > { %3935 = vmatpush3.bf16.msra.mxu1 %v4470_v3  ;;  %3927 = vmatpush3.bf16.msra.mxu0 %v4471_v4  ;;  %s3303_s13 = sshll.u32 %s1398_s7, 4  ;;  %p6819_p11 = scmp.ne.s32.totalorder %s6759_s2, 0  ;;  %s6611_s13 = int_to_ptr.vmem [resolvable:$true] %s3303_s13 }
 0x395   : > { %3948 = vmatprep.subr.bf16.mxu1 %v5615_v0  ;;  %3940 = vmatprep.subr.bf16.mxu0 %v5615_v0  ;;  %s5623_s26 = smov [#allocation50]  }
 0x396   : > { %s5425_s21 = sshll.u32 %s5623_s26, 4  ;;  %s5426_s21 = int_to_ptr.vmem [resolvable:$false] %s5425_s21 }
 0x397   : > { %3937 = vmatmul.mubr.msk.bf16.vlgmr.msra.gmra.mrb[0].mxu1 %vm1433_vm1, %v4472_v5  ;;  %3929 = vmatmul.mubr.msk.bf16.vlgmr.msra.gmra.mrb[0].mxu0 %vm1433_vm1, %v6386_v6  ;;  %p5428_p1 = scmp.lt.s32.totalorder %s6611_s13, %s5426_s21 }
 0x398   : > { %3950 = vmatprep.mubr.msk.bf16.mxu1 %vm5616_vm0, %v5615_v0  ;;  %3944 = vmatprep.mubr.msk.bf16.mxu0 %vm5616_vm0, %v5615_v0  ;;  %s6609_s19 = scalar_lea.hbm %s6818_s24, %s3859_s4 }
 0x399   : > { %3941 = vmatpush3.bf16.msra.mxu0 %v4474_v26 }
 0x39a   : > { %3942 = vmatprep.subr.bf16.mxu0 %v5615_v0 }
 0x39d   : > { %3943 = vmatpush3.bf16.msra.mxu0 %v4475_v27 }
 0x39e   : > { %3954 = vmatprep.subr.bf16.mxu0 %v5615_v0 }
 0x3a0   : > { %3945 = vmatmul.mubr.msk.bf16.vlgmr.msra.gmra.mrb[4].mxu0 %vm1433_vm1, %v4472_v5 }
 0x3a1   : > { %3956 = vmatprep.mubr.msk.bf16.mxu0 %vm5616_vm0, %v5615_v0 }
 0x46a   : > { %v1546_v9 = vpop.f32.mrb[0].mxu1  ;;  %v1471_v11 = vpop.f32.mrb[0].mxu0 }
 0x46b   : > { %v3938_v10 = vpop.f32.mrb[1].mxu1  ;;  %v1472_v12 = vadd.f32 %v3780_v7, %v1471_v11  ;;  %v3930_v14 = vpop.f32.mrb[1].mxu0  ;;  %v1547_v15 = vadd.f32 %v3785_v8, %v1546_v9 }
 0x46c   : > { %v1549_v13 = vpop.f32.mrb[2].mxu1  ;;  %v1474_v18 = vpop.f32.mrb[2].mxu0 }
 0x46d   : > { %v1550_v16 = vadd.f32 %v3785_v8, %v1549_v13  ;;  %v3939_v17 = vpop.f32.mrb[3].mxu1  ;;  %v1478_v19 = vmul.f32 0.35355338, %v1472_v12  ;;  %v1475_v20 = vadd.f32 %v3780_v7, %v1474_v18  ;;  %v3931_v21 = vpop.f32.mrb[3].mxu0 }
 0x46f   : > { %v1553_v22 = vpack.c.bf16 %v1550_v16, %v1547_v15  ;;  %v1479_v23 = vmul.f32 0.35355338, %v1475_v20 }
 0x471   : > { %1876 = vrot.lane.b32.xlu1 %v1553_v22, %s5617_s10  ;;  %1747 = vrot.lane.b32.xlu0 %v1553_v22, %s5618_s23  ;;  %v1630_v24 = vsel %vm1625_vm2, %v1553_v22, 0  ;;  %v1480_v25 = vpack.c.bf16 %v1479_v23, %v1478_v19 }
 0x472   : > { %3949 = vmatpush3.bf16.xpose.msra.mxu1 %v1630_v24 }
 0x473   : > { %3960 = vmatprep.subr.bf16.mxu1 %v5615_v0  ;;  %v1611_v47 = vpop.f32.mrb[4].mxu0 }
 0x474   : > { %v1612_v48 = vadd.f32 %v3790_v46, %v1611_v47  ;;  %v3946_v49 = vpop.f32.mrb[5].mxu0 }
 0x475   : > { %1874 = vrot.lane.b32.xlu1 %v1480_v25, %s5617_s10  ;;  %1744 = vrot.lane.b32.xlu0 %v1480_v25, %s5618_s23  ;;  %v1614_v50 = vpop.f32.mrb[6].mxu0 }
 0x476   : > { %v1615_v51 = vadd.f32 %v3790_v46, %v1614_v50  ;;  %v3947_v52 = vpop.f32.mrb[7].mxu0 }
 0x478   : > { %v6432_v53 = vpack.c.bf16 %v1615_v51, %v1612_v48 }
 0x479   : > { %2002 = vrot.lane.b32.xlu1 %v1480_v25, %s5619_s8  ;;  %2004 = vrot.lane.b32.xlu0 %v1553_v22, %s5619_s8 }
 0x47a   : > { %3951 = vmatmul.mubr.msk.bf16.vlgmr.msra.gmra.mrb[4].mxu1 %vm1625_vm2, %v1480_v25  ;;  %3955 = vmatpush3.bf16.msra.mxu0 %v6432_v53 }
 0x47b   : > { %3962 = vmatprep.mubr.msk.bf16.mxu1 %vm5616_vm0, %v5615_v0  ;;  %3966 = vmatprep.subr.bf16.mxu0 %v5615_v0 }
 0x4e3   : > { %v1748_v28 = vpop.permute.xlu0 %1747  ;;  %v1877_v30 = vpop.permute.xlu1 %1876 }
 0x4e4   : > { %v1753_v29 = vsel %vm1625_vm2, %v1748_v28, 0  ;;  %v1882_v32 = vsel %vm1625_vm2, %v1877_v30, 0 }
 0x4e5   : > { %3961 = vmatpush3.bf16.xpose.msra.mxu1 %v1753_v29 }
 0x4e6   : > { %3972 = vmatprep.subr.bf16.mxu1 %v5615_v0 }
 0x4e7   : > { %v1745_v31 = vpop.permute.xlu0 %1744  ;;  %v1875_v34 = vpop.permute.xlu1 %1874 }
 0x4eb   : > { %v2005_v33 = vpop.permute.xlu0 %2004  ;;  %v2003_v36 = vpop.permute.xlu1 %2002 }
 0x4ec   : > { %3963 = vmatmul.mubr.msk.bf16.vlgmr.msra.gmra.mrb[8].mxu1 %vm1625_vm2, %v1745_v31  ;;  %v2010_v35 = vsel %vm1625_vm2, %v2005_v33, 0 }
 0x4ed   : > { %3973 = vmatpush3.bf16.xpose.msra.mxu1 %v1882_v32  ;;  %3974 = vmatprep.mubr.msk.bf16.mxu1 %vm5616_vm0, %v5615_v0 }
 0x4ee   : > { %3984 = vmatprep.subr.bf16.mxu1 %v5615_v0 }
 0x4f4   : > { %3975 = vmatmul.mubr.msk.bf16.vlgmr.msra.gmra.mrb[12].mxu1 %vm1625_vm2, %v1875_v34 }
 0x4f5   : > { %3985 = vmatpush3.bf16.xpose.msra.mxu1 %v2010_v35  ;;  %3986 = vmatprep.mubr.msk.bf16.mxu1 %vm5616_vm0, %v5615_v0 }
 0x4f6   : > { %3996 = vmatprep.subr.bf16.mxu1 %v5615_v0 }
 0x4fc   : > { %3987 = vmatmul.mubr.msk.bf16.vlgmr.msra.gmra.mrb[16].mxu1 %vm1625_vm2, %v2003_v36 }
 0x4fd   : > { %4000 = vmatprep.mubr.msk.bf16.mxu1 %vm5616_vm0, %v5615_v0 }
 0x54d   : > { %v1666_v38 = vpop.f32.mrb[4].mxu1 }
 0x54e   : > { %v1667_v39 = vadd.f32 %v3794_v37, %v1666_v38  ;;  %v3952_v40 = vpop.f32.mrb[5].mxu1 }
 0x54f   : > { %v1669_v41 = vpop.f32.mrb[6].mxu1 }
 0x550   : > { %v1670_v42 = vadd.f32 %v3794_v37, %v1669_v41  ;;  %v3953_v43 = vpop.f32.mrb[7].mxu1  ;;  %v1674_v44 = vsel %vm1673_vm3, %v1667_v39, -inf }
 0x551   : > { %1675 = vmax.xlane.f32.xlu0 %v1674_v44 }
 0x552   : > { %v1677_v45 = vsel %vm1673_vm3, %v1670_v42, -inf }
 0x553   : > { %1678 = vmax.xlane.f32.xlu1 %v1677_v45 }
 0x5bf   : > { %v1789_v54 = vpop.f32.mrb[8].mxu1 }
 0x5c0   : > { %v1790_v55 = vadd.f32 %v3794_v37, %v1789_v54  ;;  %v3964_v56 = vpop.f32.mrb[9].mxu1 }
 0x5c1   : > { %v1792_v57 = vpop.f32.mrb[10].mxu1 }
 0x5c2   : > { %v1793_v58 = vadd.f32 %v3794_v37, %v1792_v57  ;;  %v3965_v59 = vpop.f32.mrb[11].mxu1  ;;  %v1796_v60 = vsel %vm1673_vm3, %v1790_v55, -inf }
 0x5c3   : > { %1797 = vmax.xlane.f32.xlu0 %v1796_v60 }
 0x5c4   : > { %v1799_v61 = vsel %vm1673_vm3, %v1793_v58, -inf }
 0x5c7   : > { %1800 = vmax.xlane.f32.xlu0 %v1799_v61  ;;  %v1918_v62 = vpop.f32.mrb[12].mxu1 }
 0x5c8   : > { %v1919_v63 = vadd.f32 %v3794_v37, %v1918_v62  ;;  %v3976_v1 = vpop.f32.mrb[13].mxu1 }
 0x5c9   : > { %v1921_v2 = vpop.f32.mrb[14].mxu1 }
 0x5ca   : > { %v1922_v3 = vadd.f32 %v3794_v37, %v1921_v2  ;;  %v3977_v4 = vpop.f32.mrb[15].mxu1  ;;  %v1925_v5 = vsel %vm1673_vm3, %v1919_v63, -inf }
 0x5cb   : > { %1926 = vmax.xlane.f32.xlu1 %v1925_v5 }
 0x5cc   : > { %v1928_v7 = vsel %vm1673_vm3, %v1922_v3, -inf }
 0x5cd   : > { %1929 = vmax.xlane.f32.xlu0 %v1928_v7 }
 0x5cf   : > { %v2046_v8 = vpop.f32.mrb[16].mxu1 }
 0x5d0   : > { %v2047_v9 = vadd.f32 %v3794_v37, %v2046_v8  ;;  %v3988_v10 = vpop.f32.mrb[17].mxu1 }
 0x5d1   : > { %v2049_v11 = vpop.f32.mrb[18].mxu1 }
 0x5d2   : > { %v2050_v12 = vadd.f32 %v3794_v37, %v2049_v11  ;;  %v3989_v13 = vpop.f32.mrb[19].mxu1  ;;  %v2053_v14 = vsel %vm1673_vm3, %v2047_v9, -inf }
 0x5d3   : > { %2054 = vmax.xlane.f32.xlu1 %v2053_v14 }
 0x5d4   : > { %v2056_v15 = vsel %vm1673_vm3, %v2050_v12, -inf }
 0x5d5   : > { %2057 = vmax.xlane.f32.xlu0 %v2056_v15 }
 0x5de   : > { %v1676_v16 = vpop.xlane.xlu0 %1675 }
 0x5df   : > { %v1680_v17 = vsub.f32 %v1667_v39, %v1676_v16 }
 0x5e0   : > { %v1679_v18 = vpop.xlane.xlu1 %1678 }
 0x5e1   : > { %v1682_v19 = vmul.f32 1.442695, %v1680_v17  ;;  %v1681_v20 = vsub.f32 %v1670_v42, %v1679_v18 }
 0x5e3   : > { %4493 = vpow2.f32 %v1682_v19  ;;  %v1684_v21 = vmul.f32 1.442695, %v1681_v20 }
 0x5e5   : > { %4495 = vpow2.f32 %v1684_v21 }
 0x5ed   : > { %v4494_v22 = vpop.eup %4493 }
 0x5ee   : > { %v1686_v23 = vsel %vm1673_vm3, %v4494_v22, 0.0 }
 0x5ef   : > { %v4496_v24 = vpop.eup %4495  ;;  %1687 = vadd.xlane.f32.xlu1 %v1686_v23 }
 0x5f0   : > { %v1689_v25 = vsel %vm1673_vm3, %v4496_v24, 0.0 }
 0x5f1   : > { %1690 = vadd.xlane.f32.xlu0 %v1689_v25 }
 0x600   : > { %1820 = vrot.lane.b32.xlu1 %v6432_v53, %s5618_s23 }
 0x650   : > { %v1798_v26 = vpop.xlane.xlu0 %1797 }
 0x651   : > { %v1802_v27 = vsub.f32 %v1790_v55, %v1798_v26 }
 0x653   : > { %v1804_v28 = vmul.f32 1.442695, %v1802_v27 }
 0x654   : > { %v1801_v29 = vpop.xlane.xlu0 %1800 }
 0x655   : > { %4497 = vpow2.f32 %v1804_v28  ;;  %v1803_v30 = vsub.f32 %v1793_v58, %v1801_v29 }
 0x657   : > { %v1806_v31 = vmul.f32 1.442695, %v1803_v30 }
 0x658   : > { %v1927_v32 = vpop.xlane.xlu1 %1926 }
 0x659   : > { %4499 = vpow2.f32 %v1806_v31  ;;  %v1931_v33 = vsub.f32 %v1919_v63, %v1927_v32 }
 0x65a   : > { %v1930_v34 = vpop.xlane.xlu0 %1929 }
 0x65b   : > { %v1933_v35 = vmul.f32 1.442695, %v1931_v33  ;;  %v1932_v36 = vsub.f32 %v1922_v3, %v1930_v34 }
 0x65d   : > { %4501 = vpow2.f32 %v1933_v35  ;;  %v1935_v37 = vmul.f32 1.442695, %v1932_v36  ;;  %v4476_v36 = vld [vmem:[#allocation20] sm:$0xff]  }
 0x65e   : > { %3997 = vmatpush3.bf16.msra.mxu1 %v4476_v36  ;;  %v3813_v36 = vld [vmem:[#allocation30] ss:$0 sm:$0xff] }
 0x65f   : > { %v4498_v38 = vpop.eup %4497  ;;  %4503 = vpow2.f32 %v1935_v37  ;;  %3998 = vmatprep.subr.bf16.mxu1 %v5615_v0 }
 0x660   : > { %v2055_v39 = vpop.xlane.xlu1 %2054  ;;  %v1808_v40 = vsel %vm1673_vm3, %v4498_v38, 0.0 }
 0x661   : > { %v2059_v41 = vsub.f32 %v2047_v9, %v2055_v39  ;;  %1809 = vadd.xlane.f32.xlu1 %v1808_v40  ;;  %v4477_v39 = vld [vmem:[#allocation20 + $0x8] sm:$0xff]  }
 0x662   : > { %v2058_v42 = vpop.xlane.xlu0 %2057  ;;  %3999 = vmatpush3.bf16.msra.mxu1 %v4477_v39 }
 0x663   : > { %v4500_v43 = vpop.eup %4499  ;;  %v2061_v44 = vmul.f32 1.442695, %v2059_v41  ;;  %v2060_v45 = vsub.f32 %v2050_v12, %v2058_v42  ;;  %4012 = vmatprep.subr.bf16.mxu1 %v5615_v0 }
 0x664   : > { %v1811_v46 = vsel %vm1673_vm3, %v4500_v43, 0.0 }
 0x665   : > { %4505 = vpow2.f32 %v2061_v44  ;;  %v2063_v47 = vmul.f32 1.442695, %v2060_v45  ;;  %1812 = vadd.xlane.f32.xlu0 %v1811_v46 }
 0x667   : > { %v4502_v48 = vpop.eup %4501  ;;  %4507 = vpow2.f32 %v2063_v47 }
 0x668   : > { %v1937_v49 = vsel %vm1673_vm3, %v4502_v48, 0.0 }
 0x669   : > { %v4504_v50 = vpop.eup %4503  ;;  %1938 = vadd.xlane.f32.xlu1 %v1937_v49 }
 0x66a   : > { %v1940_v51 = vsel %vm1673_vm3, %v4504_v50, 0.0 }
 0x66b   : > { %1941 = vadd.xlane.f32.xlu0 %v1940_v51  ;;  %v3803_v51 = vld [vmem:[#allocation21] ss:$0 sm:$0xff] }
 0x66f   : > { %v4506_v52 = vpop.eup %4505 }
 0x670   : > { %v2065_v54 = vsel %vm1673_vm3, %v4506_v52, 0.0 }
 0x671   : > { %v4508_v55 = vpop.eup %4507  ;;  %2066 = vadd.xlane.f32.xlu1 %v2065_v54 }
 0x672   : > { %v2068_v56 = vsel %vm1673_vm3, %v4508_v55, 0.0 }
 0x673   : > { %2069 = vadd.xlane.f32.xlu0 %v2068_v56 }
 0x67c   : > { %v1688_v57 = vpop.xlane.xlu1 %1687 }
 0x67d   : > { %4509 = vrcp.f32 %v1688_v57  ;;  %v2199_v57 = vunpack.c.h.bf16 %v6386_v6 }
 0x67e   : > { %v1691_v58 = vpop.xlane.xlu0 %1690 }
 0x67f   : > { %4511 = vrcp.f32 %v1691_v58 }
 0x680   : > { %v1821_v1 = vpop.permute.xlu1 %1820 }
 0x682   : > { %2076 = vrot.lane.b32.xlu1 %v6432_v53, %s5619_s8 }
 0x687   : > { %v4510_v59 = vpop.eup %4509 }
 0x688   : > { %v1694_v61 = vmul.f32 %v4510_v59, %v4494_v22 }
 0x689   : > { %v4512_v60 = vpop.eup %4511  ;;  %1948 = vrot.lane.b32.xlu0 %v6432_v53, %s5617_s10 }
 0x68a   : > { %v1695_v62 = vmul.f32 %v4512_v60, %v4496_v24 }
 0x68c   : > { %v1696_v63 = vpack.c.bf16 %v1695_v62, %v1694_v61 }
 0x68e   : > { %3957 = vmatmul.mubr.msk.bf16.vlgmr.msra.gmra.mrb[8].mxu0 %vm1673_vm3, %v1696_v63 }
 0x68f   : > { %3967 = vmatpush3.bf16.msra.mxu0 %v1821_v1  ;;  %3968 = vmatprep.mubr.msk.bf16.mxu0 %vm5616_vm0, %v5615_v0 }
 0x690   : > { %3978 = vmatprep.subr.bf16.mxu0 %v5615_v0 }
 0x6ee   : > { %v1810_v2 = vpop.xlane.xlu1 %1809 }
 0x6ef   : > { %4513 = vrcp.f32 %v1810_v2 }
 0x6f2   : > { %v1813_v3 = vpop.xlane.xlu0 %1812 }
 0x6f3   : > { %4515 = vrcp.f32 %v1813_v3 }
 0x6f6   : > { %v1939_v4 = vpop.xlane.xlu1 %1938 }
 0x6f7   : > { %4517 = vrcp.f32 %v1939_v4 }
 0x6f8   : > { %v1942_v5 = vpop.xlane.xlu0 %1941 }
 0x6f9   : > { %4519 = vrcp.f32 %v1942_v5  ;;  %v4514_v53 = vpop.eup %4513 }
 0x6fa   : > { %v1816_v8 = vmul.f32 %v4514_v53, %v4498_v38 }
 0x6fd   : > { %v4516_v7 = vpop.eup %4515 }
 0x6fe   : > { %v1817_v9 = vmul.f32 %v4516_v7, %v4500_v43  ;;  %v2067_v10 = vpop.xlane.xlu1 %2066 }
 0x6ff   : > { %4521 = vrcp.f32 %v2067_v10 }
 0x700   : > { %v2070_v11 = vpop.xlane.xlu0 %2069  ;;  %v1818_v12 = vpack.c.bf16 %v1817_v9, %v1816_v8 }
 0x701   : > { %4523 = vrcp.f32 %v2070_v11  ;;  %v4518_v13 = vpop.eup %4517  ;;  %v4478_v11 = vld [vmem:[#allocation26] sm:$0xff]  }
 0x702   : > { %3969 = vmatmul.mubr.msk.bf16.vlgmr.msra.gmra.mrb[12].mxu0 %vm1673_vm3, %v1818_v12  ;;  %v1945_v17 = vmul.f32 %v4518_v13, %v4502_v48  ;;  %v2077_v20 = vpop.permute.xlu1 %2076  ;;  %v4479_v12 = vld [vmem:[#allocation29] sm:$0xff]   ;;  %v4480_v13 = vld [vmem:[#allocation26 + $0x8] sm:$0xff]  }
 0x703   : > { %v4520_v14 = vpop.eup %4519  ;;  %3980 = vmatprep.mubr.msk.bf16.mxu0 %vm5616_vm0, %v5615_v0 }
 0x704   : > { %v1946_v15 = vmul.f32 %v4520_v14, %v4504_v50  ;;  %v1949_v16 = vpop.permute.xlu0 %1948  ;;  %v4481_v14 = vld [vmem:[#allocation29 + $0x8] sm:$0xff]  }
 0x705   : > { %3979 = vmatpush3.bf16.msra.mxu0 %v1949_v16 }
 0x706   : > { %3990 = vmatprep.subr.bf16.mxu0 %v5615_v0  ;;  %v1947_v18 = vpack.c.bf16 %v1946_v15, %v1945_v17 }
 0x709   : > { %v4522_v19 = vpop.eup %4521 }
 0x70a   : > { %3981 = vmatmul.mubr.msk.bf16.vlgmr.msra.gmra.mrb[16].mxu0 %vm1673_vm3, %v1947_v18  ;;  %v2073_v23 = vmul.f32 %v4522_v19, %v4506_v52  ;;  %v2198_v52 = vunpack.c.l.bf16 %v6386_v6 }
 0x70b   : > { %v4524_v21 = vpop.eup %4523  ;;  %3991 = vmatpush3.bf16.msra.mxu0 %v2077_v20  ;;  %3992 = vmatprep.mubr.msk.bf16.mxu0 %vm5616_vm0, %v5615_v0 }
 0x70c   : > { %v2074_v22 = vmul.f32 %v4524_v21, %v4508_v55  ;;  %4004 = vmatprep.subr.bf16.mxu0 %v5615_v0 }
 0x70e   : > { %v2075_v24 = vpack.c.bf16 %v2074_v22, %v2073_v23  ;;  %v3807_v23 = vld [vmem:[#allocation23] ss:$0 sm:$0xff] }
 0x712   : > { %3993 = vmatmul.mubr.msk.bf16.vlgmr.msra.gmra.mrb[20].mxu0 %vm1673_vm3, %v2075_v24 }
 0x713   : > { %4008 = vmatprep.mubr.msk.bf16.mxu0 %vm5616_vm0, %v5615_v0  ;;  %4005 = vmatpush3.bf16.msra.mxu0 %v4478_v11 }
 0x714   : > { %4006 = vmatprep.subr.bf16.mxu0 %v5615_v0 }
 0x717   : > { %4007 = vmatpush3.bf16.msra.mxu0 %v4480_v13 }
 0x718   : > { %4020 = vmatprep.subr.bf16.mxu0 %v5615_v0 }
 0x761   : > { %v1734_v25 = vpop.f32.mrb[8].mxu0 }
 0x762   : > { %v3958_v26 = vpop.f32.mrb[9].mxu0 }
 0x763   : > { %v1737_v27 = vpop.f32.mrb[10].mxu0 }
 0x764   : > { %v1741_v28 = vpack.c.bf16 %v1737_v27, %v1734_v25  ;;  %v3959_v29 = vpop.f32.mrb[11].mxu0  ;;  %v3808_v27 = vld [vmem:[#allocation24] ss:$0 sm:$0xff] }
 0x766   : > { %1742 = vst.msk [vmem:[#allocation2] sm:$0xff] %vm1625_vm2, %v1741_v28 }
 0x7d5   : > { %v1860_v30 = vpop.f32.mrb[12].mxu0 }
 0x7d6   : > { %v3970_v31 = vpop.f32.mrb[13].mxu0 }
 0x7d7   : > { %v1863_v32 = vpop.f32.mrb[14].mxu0  ;;  %v4482_v31 = vld [vmem:[#allocation32] sm:$0xff]  }
 0x7d8   : > { %v1867_v33 = vpack.c.bf16 %v1863_v32, %v1860_v30  ;;  %v3971_v34 = vpop.f32.mrb[15].mxu0 }
 0x7d9   : > { %v3809_v34 = vld [vmem:[#allocation27] ss:$0 sm:$0xff] }
 0x7da   : > { %1869 = vrot.lane.b32.xlu1 %v1867_v33, %s5620_s17  ;;  %v4483_v33 = vld [vmem:[#allocation32 + $0x8] sm:$0xff]  }
 0x7dd   : > { %v1988_v35 = vpop.f32.mrb[16].mxu0 }
 0x7de   : > { %v3982_v37 = vpop.f32.mrb[17].mxu0 }
 0x7df   : > { %v1991_v38 = vpop.f32.mrb[18].mxu0 }
 0x7e0   : > { %v1995_v40 = vpack.c.bf16 %v1991_v38, %v1988_v35  ;;  %v3983_v41 = vpop.f32.mrb[19].mxu0 }
 0x7e2   : > { %1997 = vrot.lane.b32.xlu0 %v1995_v40, %s5621_s12 }
 0x7e5   : > { %v2116_v42 = vpop.f32.mrb[20].mxu0 }
 0x7e6   : > { %v3994_v43 = vpop.f32.mrb[21].mxu0 }
 0x7e7   : > { %v2119_v44 = vpop.f32.mrb[22].mxu0 }
 0x7e8   : > { %v2123_v45 = vpack.c.bf16 %v2119_v44, %v2116_v42  ;;  %v3995_v46 = vpop.f32.mrb[23].mxu0 }
 0x7ea   : > { %2125 = vrot.lane.b32.xlu1 %v2123_v45, %s5622_s3 }
 0x84c   : > { %v1870_v47 = vpop.permute.xlu1 %1869 }
 0x84d   : > { %1873 = vst.msk [vmem:[#allocation2] sm:$0xff] %vm1872_vm4, %v1870_v47 }
 0x854   : > { %v1998_v48 = vpop.permute.xlu0 %1997 }
 0x855   : > { %2001 = vst.msk [vmem:[#allocation2] sm:$0xff] %vm2000_vm5, %v1998_v48 }
 0x85c   : > { %v2126_v49 = vpop.permute.xlu1 %2125 }
 0x85d   : > { %2129 = vst.msk [vmem:[#allocation2] sm:$0xff] %vm2128_vm6, %v2126_v49 }
 0x864   : > { %v2130_v50 = vld [vmem:[#allocation2] sm:$0xff] }
 0x865   : > { %4001 = vmatmul.mubr.msk.bf16.vlgmr.msra.gmra.mrb[20].mxu1 %vm1433_vm1, %v2130_v50 }
 0x866   : > { %4016 = vmatprep.mubr.msk.bf16.mxu1 %vm5616_vm0, %v5615_v0  ;;  %4013 = vmatpush3.bf16.msra.mxu1 %v4479_v12 }
 0x867   : > { %4014 = vmatprep.subr.bf16.mxu1 %v5615_v0 }
 0x86a   : > { %4015 = vmatpush3.bf16.msra.mxu1 %v4481_v14 }
 0x86b   : > { %4028 = vmatprep.subr.bf16.mxu1 %v5615_v0 }
 0x938   : > { %v2191_v54 = vpop.f32.mrb[20].mxu1 }
 0x939   : > { %v2192_v55 = vadd.f32 %v3803_v51, %v2191_v54  ;;  %v4002_v56 = vpop.f32.mrb[21].mxu1  ;;  %v3817_v54 = vld [vmem:[#allocation33] ss:$0 sm:$0xff] }
 0x93a   : > { %v2194_v58 = vpop.f32.mrb[22].mxu1 }
 0x93b   : > { %v2195_v59 = vadd.f32 %v3803_v51, %v2194_v58  ;;  %v4003_v60 = vpop.f32.mrb[23].mxu1  ;;  %v2200_v61 = vadd.f32 %v2198_v52, %v2192_v55 }
 0x93d   : > { %v2204_v62 = vsel %vm1433_vm1, %v2200_v61, 0.0  ;;  %v2201_v63 = vadd.f32 %v2199_v57, %v2195_v59 }
 0x93e   : > { %2205 = vadd.xlane.f32.xlu0 %v2204_v62 }
 0x93f   : > { %v2207_v1 = vsel %vm1433_vm1, %v2201_v63, 0.0 }
 0x940   : > { %2208 = vadd.xlane.f32.xlu1 %v2207_v1 }
 0x9cb   : > { %v2206_v2 = vpop.xlane.xlu0 %2205 }
 0x9cc   : > { %v2211_v3 = vmul.f32 0.03125, %v2206_v2 }
 0x9cd   : > { %v2209_v4 = vpop.xlane.xlu1 %2208 }
 0x9ce   : > { %v2213_v5 = vsub.f32 %v2200_v61, %v2211_v3  ;;  %v2212_v53 = vmul.f32 0.03125, %v2209_v4 }
 0x9d0   : > { %v2214_v7 = vsub.f32 %v2201_v63, %v2212_v53  ;;  %v2215_v8 = vmul.f32 %v2213_v5, %v2213_v5 }
 0x9d2   : > { %v2217_v6 = vsel %vm1433_vm1, %v2215_v8, 0.0  ;;  %v2216_v9 = vmul.f32 %v2214_v7, %v2214_v7  ;;  %v3821_v8 = vld [vmem:[%s1205_s14] ss:$0 sm:$0xff]  ;;  %s5421_s14 = scalar_lea.vmem %s6611_s13, 128 }
 0x9d3   : > { %2218 = vadd.xlane.f32.xlu0 %v2217_v6  ;;  %p5422_p2 = scmp.ne.s32.totalorder %s6611_s13, %s5421_s14 }
 0x9d4   : > { %v2220_v10 = vsel %vm1433_vm1, %v2216_v9, 0.0 }
 0x9d5   : > { %p5423_p8 = pnand %p5422_p2, %p6819_p11 }
 0x9d7   : > { %2221 = vadd.xlane.f32.xlu0 %v2220_v10  ;;  %p5424_p12 = pneg %p5423_p8 }
 0xa60   : > { %v2219_v15 = vpop.xlane.xlu0 %2218 }
 0xa61   : > { %v2223_v16 = vmul.f32 0.03125, %v2219_v15 }
 0xa63   : > { %v2225_v17 = vadd.f32 1e-12, %v2223_v16 }
 0xa64   : > { %v2222_v18 = vpop.xlane.xlu0 %2221 }
 0xa65   : > { %4525 = vrsqrt.f32 %v2225_v17  ;;  %v2224_v19 = vmul.f32 0.03125, %v2222_v18 }
 0xa67   : > { %v2226_v20 = vadd.f32 1e-12, %v2224_v19 }
 0xa69   : > { %4527 = vrsqrt.f32 %v2226_v20 }
 0xa6f   : > { %v4526_v21 = vpop.eup %4525 }
 0xa70   : > { %v2229_v22 = vmul.f32 %v4526_v21, %v2213_v5 }
 0xa72   : > { %v2237_v25 = vmul.f32 %v3807_v23, %v2229_v22 }
 0xa73   : > { %v4528_v24 = vpop.eup %4527 }
 0xa74   : > { %v2230_v26 = vmul.f32 %v4528_v24, %v2214_v7  ;;  %v6493_v29 = vadd.f32 %v3808_v27, %v2237_v25 }
 0xa76   : > { %v2238_v28 = vmul.f32 %v3807_v23, %v2230_v26 }
 0xa78   : > { %v6495_v30 = vadd.f32 %v3808_v27, %v2238_v28 }
 0xa7a   : > { %v2247_v32 = vpack.c.bf16 %v6495_v30, %v6493_v29 }
 0xa7c   : > { %4009 = vmatmul.mubr.msk.bf16.vlgmr.msra.gmra.mrb[24].mxu0 %vm1433_vm1, %v2247_v32  ;;  %4017 = vmatmul.mubr.msk.bf16.vlgmr.msra.gmra.mrb[24].mxu1 %vm1433_vm1, %v2247_v32 }
 0xa7d   : > { %4021 = vmatpush3.bf16.msra.mxu0 %v4482_v31  ;;  %4024 = vmatprep.mubr.msk.bf16.mxu0 %vm5616_vm0, %v5615_v0 }
 0xa7e   : > { %4022 = vmatprep.subr.bf16.mxu0 %v5615_v0  ;;  %4030 = vmatprep.mubr.msk.bf16.mxu1 %vm5616_vm0, %v5615_v0 }
 0xa81   : > { %4023 = vmatpush3.bf16.msra.mxu0 %v4483_v33 }
 0xa82   : > { %4034 = vmatprep.subr.bf16.mxu0 %v5615_v0 }
 0xa84   : > { %4025 = vmatmul.mubr.msk.bf16.vlgmr.msra.gmra.mrb[28].mxu0 %vm1433_vm1, %v2247_v32 }
 0xa85   : > { %4036 = vmatprep.mubr.msk.bf16.mxu0 %vm5616_vm0, %v5615_v0 }
 0xb4f   : > { %v2309_v35 = vpop.f32.mrb[24].mxu0  ;;  %v2376_v37 = vpop.f32.mrb[24].mxu1 }
 0xb50   : > { %v2310_v38 = vadd.f32 %v3809_v34, %v2309_v35  ;;  %v4010_v39 = vpop.f32.mrb[25].mxu0  ;;  %v4018_v40 = vpop.f32.mrb[25].mxu1  ;;  %v2377_v43 = vadd.f32 %v3813_v36, %v2376_v37 }
 0xb51   : > { %v2312_v41 = vpop.f32.mrb[26].mxu0  ;;  %v2379_v42 = vpop.f32.mrb[26].mxu1 }
 0xb52   : > { %v2313_v44 = vadd.f32 %v3809_v34, %v2312_v41  ;;  %v2380_v45 = vadd.f32 %v3813_v36, %v2379_v42  ;;  %v4011_v46 = vpop.f32.mrb[27].mxu0  ;;  %v4019_v47 = vpop.f32.mrb[27].mxu1  ;;  %v2316_v48 = vmul.f32 0.35355338, %v2310_v38 }
 0xb54   : > { %v2317_v49 = vmul.f32 0.35355338, %v2313_v44  ;;  %v2383_v50 = vpack.c.bf16 %v2380_v45, %v2377_v43 }
 0xb56   : > { %v2318_v51 = vpack.c.bf16 %v2317_v49, %v2316_v48  ;;  %2575 = vrot.lane.b32.xlu1 %v2383_v50, %s5618_s23  ;;  %v2459_v52 = vsel %vm1625_vm2, %v2383_v50, 0 }
 0xb57   : > { %v2441_v55 = vpop.f32.mrb[28].mxu0  ;;  %4029 = vmatpush3.bf16.xpose.msra.mxu1 %v2459_v52 }
 0xb58   : > { %2572 = vrot.lane.b32.xlu0 %v2318_v51, %s5618_s23  ;;  %v4026_v56 = vpop.f32.mrb[29].mxu0  ;;  %4040 = vmatprep.subr.bf16.mxu1 %v5615_v0  ;;  %v2442_v58 = vadd.f32 %v3817_v54, %v2441_v55 }
 0xb59   : > { %v2444_v57 = vpop.f32.mrb[30].mxu0 }
 0xb5a   : > { %v2445_v59 = vadd.f32 %v3817_v54, %v2444_v57  ;;  %2703 = vrot.lane.b32.xlu1 %v2383_v50, %s5617_s10  ;;  %v4027_v60 = vpop.f32.mrb[31].mxu0 }
 0xb5c   : > { %v6515_v61 = vpack.c.bf16 %v2445_v59, %v2442_v58  ;;  %2830 = vrot.lane.b32.xlu0 %v2383_v50, %s5619_s8 }
 0xb5e   : > { %2701 = vrot.lane.b32.xlu1 %v2318_v51, %s5617_s10  ;;  %4031 = vmatmul.mubr.msk.bf16.vlgmr.msra.gmra.mrb[28].mxu1 %vm1625_vm2, %v2318_v51 }
 0xb5f   : > { %4035 = vmatpush3.bf16.msra.mxu0 %v6515_v61  ;;  %4042 = vmatprep.mubr.msk.bf16.mxu1 %vm5616_vm0, %v5615_v0 }
 0xb60   : > { %4046 = vmatprep.subr.bf16.mxu0 %v5615_v0 }
 0xb62   : > { %2828 = vrot.lane.b32.xlu1 %v2318_v51, %s5619_s8 }
 0xbc8   : > { %v2576_v62 = vpop.permute.xlu1 %2575 }
 0xbc9   : > { %v2581_v63 = vsel %vm1625_vm2, %v2576_v62, 0 }
 0xbca   : > { %4041 = vmatpush3.bf16.xpose.msra.mxu1 %v2581_v63  ;;  %v2573_v2 = vpop.permute.xlu0 %2572 }
 0xbcb   : > { %4052 = vmatprep.subr.bf16.mxu1 %v5615_v0 }
 0xbcc   : > { %v2704_v1 = vpop.permute.xlu1 %2703 }
 0xbcd   : > { %v2709_v3 = vsel %vm1625_vm2, %v2704_v1, 0 }
 0xbce   : > { %v2831_v4 = vpop.permute.xlu0 %2830 }
 0xbcf   : > { %v2836_v53 = vsel %vm1625_vm2, %v2831_v4, 0 }
 0xbd0   : > { %v2702_v5 = vpop.permute.xlu1 %2701 }
 0xbd1   : > { %4043 = vmatmul.mubr.msk.bf16.vlgmr.msra.gmra.mrb[32].mxu1 %vm1625_vm2, %v2573_v2 }
 0xbd2   : > { %4053 = vmatpush3.bf16.xpose.msra.mxu1 %v2709_v3  ;;  %4054 = vmatprep.mubr.msk.bf16.mxu1 %vm5616_vm0, %v5615_v0 }
 0xbd3   : > { %4064 = vmatprep.subr.bf16.mxu1 %v5615_v0 }
 0xbd4   : > { %v2829_v7 = vpop.permute.xlu1 %2828 }
 0xbd9   : > { %4055 = vmatmul.mubr.msk.bf16.vlgmr.msra.gmra.mrb[36].mxu1 %vm1625_vm2, %v2702_v5 }
 0xbda   : > { %4065 = vmatpush3.bf16.xpose.msra.mxu1 %v2836_v53  ;;  %4066 = vmatprep.mubr.msk.bf16.mxu1 %vm5616_vm0, %v5615_v0 }
 0xbdb   : > { %4076 = vmatprep.subr.bf16.mxu1 %v5615_v0 }
 0xbe1   : > { %4067 = vmatmul.mubr.msk.bf16.vlgmr.msra.gmra.mrb[40].mxu1 %vm1625_vm2, %v2829_v7 }
 0xbe2   : > { %4080 = vmatprep.mubr.msk.bf16.mxu1 %vm5616_vm0, %v5615_v0 }
 0xc31   : > { %v2495_v6 = vpop.f32.mrb[28].mxu1 }
 0xc32   : > { %v2496_v9 = vadd.f32 %v3821_v8, %v2495_v6  ;;  %v4032_v10 = vpop.f32.mrb[29].mxu1 }
 0xc33   : > { %v2498_v11 = vpop.f32.mrb[30].mxu1 }
 0xc34   : > { %v2499_v12 = vadd.f32 %v3821_v8, %v2498_v11  ;;  %v4033_v13 = vpop.f32.mrb[31].mxu1  ;;  %v2502_v14 = vsel %vm1673_vm3, %v2496_v9, -inf }
 0xc35   : > { %2503 = vmax.xlane.f32.xlu0 %v2502_v14 }
 0xc36   : > { %v2505_v15 = vsel %vm1673_vm3, %v2499_v12, -inf }
 0xc37   : > { %2506 = vmax.xlane.f32.xlu1 %v2505_v15 }
 0xca4   : > { %v2617_v16 = vpop.f32.mrb[32].mxu1 }
 0xca5   : > { %v2618_v17 = vadd.f32 %v3821_v8, %v2617_v16  ;;  %v4044_v18 = vpop.f32.mrb[33].mxu1 }
 0xca6   : > { %v2620_v19 = vpop.f32.mrb[34].mxu1 }
 0xca7   : > { %v2621_v20 = vadd.f32 %v3821_v8, %v2620_v19  ;;  %v4045_v21 = vpop.f32.mrb[35].mxu1  ;;  %v2624_v22 = vsel %vm1673_vm3, %v2618_v17, -inf }
 0xca8   : > { %2625 = vmax.xlane.f32.xlu0 %v2624_v22 }
 0xca9   : > { %v2627_v23 = vsel %vm1673_vm3, %v2621_v20, -inf }
 0xcac   : > { %2628 = vmax.xlane.f32.xlu0 %v2627_v23  ;;  %v2745_v24 = vpop.f32.mrb[36].mxu1 }
 0xcad   : > { %v2746_v25 = vadd.f32 %v3821_v8, %v2745_v24  ;;  %v4056_v26 = vpop.f32.mrb[37].mxu1 }
 0xcae   : > { %v2748_v27 = vpop.f32.mrb[38].mxu1 }
 0xcaf   : > { %v2749_v28 = vadd.f32 %v3821_v8, %v2748_v27  ;;  %v4057_v31 = vpop.f32.mrb[39].mxu1  ;;  %v2752_v32 = vsel %vm1673_vm3, %v2746_v25, -inf }
 0xcb0   : > { %2753 = vmax.xlane.f32.xlu1 %v2752_v32 }
 0xcb1   : > { %v2755_v33 = vsel %vm1673_vm3, %v2749_v28, -inf }
 0xcb2   : > { %2756 = vmax.xlane.f32.xlu0 %v2755_v33 }
 0xcb4   : > { %v2872_v34 = vpop.f32.mrb[40].mxu1 }
 0xcb5   : > { %v2873_v35 = vadd.f32 %v3821_v8, %v2872_v34  ;;  %v4068_v36 = vpop.f32.mrb[41].mxu1 }
 0xcb6   : > { %v2875_v37 = vpop.f32.mrb[42].mxu1 }
 0xcb7   : > { %v2876_v38 = vadd.f32 %v3821_v8, %v2875_v37  ;;  %v4069_v39 = vpop.f32.mrb[43].mxu1  ;;  %v2879_v40 = vsel %vm1673_vm3, %v2873_v35, -inf }
 0xcb8   : > { %2880 = vmax.xlane.f32.xlu1 %v2879_v40 }
 0xcb9   : > { %v2882_v41 = vsel %vm1673_vm3, %v2876_v38, -inf }
 0xcba   : > { %2883 = vmax.xlane.f32.xlu0 %v2882_v41 }
 0xcc2   : > { %v2504_v42 = vpop.xlane.xlu0 %2503 }
 0xcc3   : > { %v2508_v43 = vsub.f32 %v2496_v9, %v2504_v42 }
 0xcc4   : > { %v2507_v44 = vpop.xlane.xlu1 %2506 }
 0xcc5   : > { %v2510_v45 = vmul.f32 1.442695, %v2508_v43  ;;  %v2509_v46 = vsub.f32 %v2499_v12, %v2507_v44 }
 0xcc7   : > { %4529 = vpow2.f32 %v2510_v45  ;;  %v2512_v47 = vmul.f32 1.442695, %v2509_v46 }
 0xcc9   : > { %4531 = vpow2.f32 %v2512_v47 }
 0xcd1   : > { %v4530_v48 = vpop.eup %4529 }
 0xcd2   : > { %v2514_v49 = vsel %vm1673_vm3, %v4530_v48, 0.0 }
 0xcd3   : > { %v4532_v50 = vpop.eup %4531  ;;  %2515 = vadd.xlane.f32.xlu1 %v2514_v49 }
 0xcd4   : > { %v2517_v51 = vsel %vm1673_vm3, %v4532_v50, 0.0 }
 0xcd5   : > { %2518 = vadd.xlane.f32.xlu0 %v2517_v51 }
 0xce4   : > { %2648 = vrot.lane.b32.xlu1 %v6515_v61, %s5618_s23 }
 0xd35   : > { %v2626_v52 = vpop.xlane.xlu0 %2625 }
 0xd36   : > { %v2630_v54 = vsub.f32 %v2618_v17, %v2626_v52 }
 0xd38   : > { %v2632_v55 = vmul.f32 1.442695, %v2630_v54 }
 0xd39   : > { %v2629_v56 = vpop.xlane.xlu0 %2628 }
 0xd3a   : > { %4533 = vpow2.f32 %v2632_v55  ;;  %v2631_v57 = vsub.f32 %v2621_v20, %v2629_v56 }
 0xd3c   : > { %v2634_v58 = vmul.f32 1.442695, %v2631_v57 }
 0xd3d   : > { %v2754_v59 = vpop.xlane.xlu1 %2753 }
 0xd3e   : > { %4535 = vpow2.f32 %v2634_v58  ;;  %v2758_v60 = vsub.f32 %v2746_v25, %v2754_v59 }
 0xd3f   : > { %v2757_v62 = vpop.xlane.xlu0 %2756 }
 0xd40   : > { %v2760_v63 = vmul.f32 1.442695, %v2758_v60  ;;  %v2759_v1 = vsub.f32 %v2749_v28, %v2757_v62 }
 0xd42   : > { %4537 = vpow2.f32 %v2760_v63  ;;  %v2762_v2 = vmul.f32 1.442695, %v2759_v1 }
 0xd44   : > { %v4534_v3 = vpop.eup %4533  ;;  %4539 = vpow2.f32 %v2762_v2  ;;  %v4484_v2 = vld [vmem:[#allocation35] sm:$0xff]  }
 0xd45   : > { %v2881_v4 = vpop.xlane.xlu1 %2880  ;;  %v2636_v5 = vsel %vm1673_vm3, %v4534_v3, 0.0  ;;  %4077 = vmatpush3.bf16.msra.mxu1 %v4484_v2 }
 0xd46   : > { %v2885_v53 = vsub.f32 %v2873_v35, %v2881_v4  ;;  %2637 = vadd.xlane.f32.xlu1 %v2636_v5  ;;  %v4485_v5 = vld [vmem:[#allocation35 + $0x8] sm:$0xff]   ;;  %4078 = vmatprep.subr.bf16.mxu1 %v5615_v0 }
 0xd47   : > { %v2884_v7 = vpop.xlane.xlu0 %2883 }
 0xd48   : > { %v4536_v8 = vpop.eup %4535  ;;  %v2887_v6 = vmul.f32 1.442695, %v2885_v53  ;;  %v2886_v9 = vsub.f32 %v2876_v38, %v2884_v7 }
 0xd49   : > { %v2639_v10 = vsel %vm1673_vm3, %v4536_v8, 0.0  ;;  %4079 = vmatpush3.bf16.msra.mxu1 %v4485_v5 }
 0xd4a   : > { %4541 = vpow2.f32 %v2887_v6  ;;  %v2889_v11 = vmul.f32 1.442695, %v2886_v9  ;;  %2640 = vadd.xlane.f32.xlu0 %v2639_v10  ;;  %4092 = vmatprep.subr.bf16.mxu1 %v5615_v0 }
 0xd4c   : > { %v4538_v12 = vpop.eup %4537  ;;  %4543 = vpow2.f32 %v2889_v11 }
 0xd4d   : > { %v2764_v13 = vsel %vm1673_vm3, %v4538_v12, 0.0 }
 0xd4e   : > { %v4540_v14 = vpop.eup %4539  ;;  %2765 = vadd.xlane.f32.xlu1 %v2764_v13 }
 0xd4f   : > { %v2767_v15 = vsel %vm1673_vm3, %v4540_v14, 0.0 }
 0xd50   : > { %2768 = vadd.xlane.f32.xlu0 %v2767_v15 }
 0xd54   : > { %v4542_v16 = vpop.eup %4541 }
 0xd55   : > { %v2891_v17 = vsel %vm1673_vm3, %v4542_v16, 0.0 }
 0xd56   : > { %v4544_v18 = vpop.eup %4543  ;;  %2892 = vadd.xlane.f32.xlu1 %v2891_v17 }
 0xd57   : > { %v2894_v19 = vsel %vm1673_vm3, %v4544_v18, 0.0 }
 0xd58   : > { %2895 = vadd.xlane.f32.xlu0 %v2894_v19 }
 0xd60   : > { %v2516_v20 = vpop.xlane.xlu1 %2515 }
 0xd61   : > { %4545 = vrcp.f32 %v2516_v20 }
 0xd62   : > { %v2519_v21 = vpop.xlane.xlu0 %2518 }
 0xd63   : > { %4547 = vrcp.f32 %v2519_v21 }
 0xd64   : > { %v2649_v27 = vpop.permute.xlu1 %2648 }
 0xd67   : > { %2902 = vrot.lane.b32.xlu1 %v6515_v61, %s5619_s8 }
 0xd6b   : > { %v4546_v22 = vpop.eup %4545 }
 0xd6c   : > { %v2522_v24 = vmul.f32 %v4546_v22, %v4530_v48 }
 0xd6d   : > { %v4548_v23 = vpop.eup %4547 }
 0xd6e   : > { %v2523_v25 = vmul.f32 %v4548_v23, %v4532_v50  ;;  %2775 = vrot.lane.b32.xlu0 %v6515_v61, %s5617_s10  ;;  %s5427_s10 = scalar_lea.vmem %s5426_s21, 256 }
 0xd6f   : > { %p5429_p5 = scmp.lt.s32.totalorder %s5427_s10, %s5421_s14 }
 0xd70   : > { %v2524_v26 = vpack.c.bf16 %v2523_v25, %v2522_v24 }
 0xd71   : > { %p5430_p9 = por %p5429_p5, %p5428_p1 }
 0xd72   : > { %4037 = vmatmul.mubr.msk.bf16.vlgmr.msra.gmra.mrb[32].mxu0 %vm1673_vm3, %v2524_v26 }
 0xd73   : > { %4047 = vmatpush3.bf16.msra.mxu0 %v2649_v27  ;;  %4048 = vmatprep.mubr.msk.bf16.mxu0 %vm5616_vm0, %v5615_v0  ;;  %p5431_p0 = pnand %p5430_p9, %p5424_p12 }
 0xd74   : > { %4058 = vmatprep.subr.bf16.mxu0 %v5615_v0 }
 0xdd3   : > { %v2638_v28 = vpop.xlane.xlu1 %2637 }
 0xdd4   : > { %4549 = vrcp.f32 %v2638_v28 }
 0xdd7   : > { %v2641_v31 = vpop.xlane.xlu0 %2640 }
 0xdd8   : > { %4551 = vrcp.f32 %v2641_v31 }
 0xddb   : > { %v2766_v32 = vpop.xlane.xlu1 %2765 }
 0xddc   : > { %4553 = vrcp.f32 %v2766_v32 }
 0xddd   : > { %v2769_v33 = vpop.xlane.xlu0 %2768 }
 0xdde   : > { %4555 = vrcp.f32 %v2769_v33  ;;  %v4550_v34 = vpop.eup %4549 }
 0xddf   : > { %v2644_v35 = vmul.f32 %v4550_v34, %v4534_v3 }
 0xde2   : > { %v4552_v61 = vpop.eup %4551 }
 0xde3   : > { %v2645_v36 = vmul.f32 %v4552_v61, %v4536_v8  ;;  %v2893_v37 = vpop.xlane.xlu1 %2892 }
 0xde4   : > { %4557 = vrcp.f32 %v2893_v37  ;;  %v4486_v37 = vld [vmem:[#allocation41] sm:$0xff]  }
 0xde5   : > { %v2896_v38 = vpop.xlane.xlu0 %2895  ;;  %v2646_v39 = vpack.c.bf16 %v2645_v36, %v2644_v35 }
 0xde6   : > { %4559 = vrcp.f32 %v2896_v38  ;;  %v4554_v40 = vpop.eup %4553 }
 0xde7   : > { %4049 = vmatmul.mubr.msk.bf16.vlgmr.msra.gmra.mrb[36].mxu0 %vm1673_vm3, %v2646_v39  ;;  %v2772_v44 = vmul.f32 %v4554_v40, %v4538_v12  ;;  %v2903_v47 = vpop.permute.xlu1 %2902 }
 0xde8   : > { %v4556_v41 = vpop.eup %4555  ;;  %4060 = vmatprep.mubr.msk.bf16.mxu0 %vm5616_vm0, %v5615_v0 }
 0xde9   : > { %v2773_v42 = vmul.f32 %v4556_v41, %v4540_v14  ;;  %v2776_v43 = vpop.permute.xlu0 %2775 }
 0xdea   : > { %4059 = vmatpush3.bf16.msra.mxu0 %v2776_v43 }
 0xdeb   : > { %4070 = vmatprep.subr.bf16.mxu0 %v5615_v0  ;;  %v2774_v45 = vpack.c.bf16 %v2773_v42, %v2772_v44 }
 0xdee   : > { %v4558_v46 = vpop.eup %4557 }
 0xdef   : > { %4061 = vmatmul.mubr.msk.bf16.vlgmr.msra.gmra.mrb[40].mxu0 %vm1673_vm3, %v2774_v45  ;;  %v2899_v50 = vmul.f32 %v4558_v46, %v4542_v16  ;;  %v3830_v16 = vld [vmem:[#allocation36] ss:$0 sm:$0xff]  ;;  %v3834_v46 = vld [vmem:[#allocation38] ss:$0 sm:$0xff] }
 0xdf0   : > { %v4560_v48 = vpop.eup %4559  ;;  %4071 = vmatpush3.bf16.msra.mxu0 %v2903_v47  ;;  %4072 = vmatprep.mubr.msk.bf16.mxu0 %vm5616_vm0, %v5615_v0 }
 0xdf1   : > { %v2900_v49 = vmul.f32 %v4560_v48, %v4544_v18  ;;  %4084 = vmatprep.subr.bf16.mxu0 %v5615_v0 }
 0xdf3   : > { %v2901_v51 = vpack.c.bf16 %v2900_v49, %v2899_v50  ;;  %v3835_v50 = vld [vmem:[#allocation39] ss:$0 sm:$0xff] }
 0xdf7   : > { %4073 = vmatmul.mubr.msk.bf16.vlgmr.msra.gmra.mrb[44].mxu0 %vm1673_vm3, %v2901_v51 }
 0xdf8   : > { %4088 = vmatprep.mubr.msk.bf16.mxu0 %vm5616_vm0, %v5615_v0  ;;  %4085 = vmatpush3.bf16.msra.mxu0 %v4486_v37 }
 0xdf9   : > { %4086 = vmatprep.subr.bf16.mxu0 %v5615_v0 }
 0xe45   : > { %v2562_v52 = vpop.f32.mrb[32].mxu0 }
 0xe46   : > { %v4038_v54 = vpop.f32.mrb[33].mxu0 }
 0xe47   : > { %v2565_v55 = vpop.f32.mrb[34].mxu0 }
 0xe48   : > { %v2569_v56 = vpack.c.bf16 %v2565_v55, %v2562_v52  ;;  %v4039_v57 = vpop.f32.mrb[35].mxu0 }
 0xe49   : > { %v4489_v57 = vld [vmem:[#allocation44 + $0x8] sm:$0xff]  }
 0xe4a   : > { %2570 = vst.msk [vmem:[#allocation2] sm:$0xff] %vm1625_vm2, %v2569_v56  ;;  %v4488_v56 = vld [vmem:[#allocation44] sm:$0xff]  }
 0xeba   : > { %v2688_v58 = vpop.f32.mrb[36].mxu0 }
 0xebb   : > { %v4050_v59 = vpop.f32.mrb[37].mxu0 }
 0xebc   : > { %v2691_v60 = vpop.f32.mrb[38].mxu0  ;;  %v4491_v59 = vld [vmem:[#allocation44 + $0x18] sm:$0xff]  }
 0xebd   : > { %v2695_v62 = vpack.c.bf16 %v2691_v60, %v2688_v58  ;;  %v4051_v63 = vpop.f32.mrb[39].mxu0  ;;  %v4490_v58 = vld [vmem:[#allocation44 + $0x10] sm:$0xff]   ;;  %v3836_v60 = vld [vmem:[#allocation42] ss:$0 sm:$0xff] }
 0xebf   : > { %2697 = vrot.lane.b32.xlu1 %v2695_v62, %s5620_s17 }
 0xec2   : > { %v2815_v1 = vpop.f32.mrb[40].mxu0 }
 0xec3   : > { %v4062_v3 = vpop.f32.mrb[41].mxu0 }
 0xec4   : > { %v2818_v4 = vpop.f32.mrb[42].mxu0 }
 0xec5   : > { %v2822_v53 = vpack.c.bf16 %v2818_v4, %v2815_v1  ;;  %v4063_v7 = vpop.f32.mrb[43].mxu0 }
 0xec7   : > { %2824 = vrot.lane.b32.xlu0 %v2822_v53, %s5621_s12 }
 0xeca   : > { %v2942_v8 = vpop.f32.mrb[44].mxu0 }
 0xecb   : > { %v4074_v6 = vpop.f32.mrb[45].mxu0 }
 0xecc   : > { %v2945_v9 = vpop.f32.mrb[46].mxu0 }
 0xecd   : > { %v2949_v10 = vpack.c.bf16 %v2945_v9, %v2942_v8  ;;  %v4075_v11 = vpop.f32.mrb[47].mxu0 }
 0xecf   : > { %2951 = vrot.lane.b32.xlu1 %v2949_v10, %s5622_s3 }
 0xf31   : > { %v2698_v12 = vpop.permute.xlu1 %2697 }
 0xf32   : > { %2700 = vst.msk [vmem:[#allocation2] sm:$0xff] %vm1872_vm4, %v2698_v12 }
 0xf39   : > { %v2825_v13 = vpop.permute.xlu0 %2824 }
 0xf3a   : > { %2827 = vst.msk [vmem:[#allocation2] sm:$0xff] %vm2000_vm5, %v2825_v13 }
 0xf41   : > { %v2952_v14 = vpop.permute.xlu1 %2951 }
 0xf42   : > { %2954 = vst.msk [vmem:[#allocation2] sm:$0xff] %vm2128_vm6, %v2952_v14  ;;  %v3840_v14 = vld [vmem:[#allocation45] ss:$0 sm:$0xff] }
 0xf49   : > { %v2955_v15 = vld [vmem:[#allocation2] sm:$0xff] }
 0xf4a   : > { %4081 = vmatmul.mubr.msk.bf16.vlgmr.msra.gmra.mrb[44].mxu1 %vm1433_vm1, %v2955_v15 }
 0xf4b   : > { %4100 = vmatprep.mubr.msk.bf16.mxu1 %vm5616_vm0, %v5615_v0  ;;  %4093 = vmatpush3.bf16.msra.mxu1 %v4488_v56 }
 0xf4c   : > { %4094 = vmatprep.subr.bf16.mxu1 %v5615_v0 }
 0xf4f   : > { %4095 = vmatpush3.bf16.msra.mxu1 %v4489_v57 }
 0xf50   : > { %4096 = vmatprep.subr.bf16.mxu1 %v5615_v0 }
 0xf53   : > { %4097 = vmatpush3.bf16.msra.mxu1 %v4490_v58 }
 0xf54   : > { %4098 = vmatprep.subr.bf16.mxu1 %v5615_v0 }
 0xf57   : > { %4099 = vmatpush3.bf16.msra.mxu1 %v4491_v59 }
0x101d   : > { %v3016_v17 = vpop.f32.mrb[44].mxu1 }
0x101e   : > { %v3017_v18 = vadd.f32 %v3830_v16, %v3016_v17  ;;  %v4082_v19 = vpop.f32.mrb[45].mxu1 }
0x101f   : > { %v3019_v20 = vpop.f32.mrb[46].mxu1 }
0x1020   : > { %v3020_v21 = vadd.f32 %v3830_v16, %v3019_v20  ;;  %v4083_v22 = vpop.f32.mrb[47].mxu1  ;;  %v3023_v23 = vadd.f32 %v3017_v18, %v6493_v29 }
0x1022   : > { %v3027_v24 = vsel %vm1433_vm1, %v3023_v23, 0.0  ;;  %v3024_v25 = vadd.f32 %v3020_v21, %v6495_v30  ;;  %v4487_v30 = vld [vmem:[#allocation41 + $0x8] sm:$0xff]  }
0x1023   : > { %3028 = vadd.xlane.f32.xlu0 %v3027_v24  ;;  %4087 = vmatpush3.bf16.msra.mxu0 %v4487_v30 }
0x1024   : > { %v3030_v26 = vsel %vm1433_vm1, %v3024_v25, 0.0 }
0x1025   : > { %3031 = vadd.xlane.f32.xlu1 %v3030_v26 }
0x10b0   : > { %v3029_v27 = vpop.xlane.xlu0 %3028 }
0x10b1   : > { %v3033_v28 = vmul.f32 0.03125, %v3029_v27 }
0x10b2   : > { %v3032_v31 = vpop.xlane.xlu1 %3031 }
0x10b3   : > { %v3035_v32 = vsub.f32 %v3023_v23, %v3033_v28  ;;  %v3034_v33 = vmul.f32 0.03125, %v3032_v31 }
0x10b5   : > { %v3036_v34 = vsub.f32 %v3024_v25, %v3034_v33  ;;  %v3037_v61 = vmul.f32 %v3035_v32, %v3035_v32 }
0x10b7   : > { %v3039_v35 = vsel %vm1433_vm1, %v3037_v61, 0.0  ;;  %v3038_v36 = vmul.f32 %v3036_v34, %v3036_v34 }
0x10b8   : > { %3040 = vadd.xlane.f32.xlu0 %v3039_v35 }
0x10b9   : > { %v3042_v29 = vsel %vm1433_vm1, %v3038_v36, 0.0 }
0x10bc   : > { %3043 = vadd.xlane.f32.xlu0 %v3042_v29 }
0x1145   : > { %v3041_v38 = vpop.xlane.xlu0 %3040 }
0x1146   : > { %v3045_v39 = vmul.f32 0.03125, %v3041_v38 }
0x1148   : > { %v3047_v40 = vadd.f32 1e-12, %v3045_v39 }
0x1149   : > { %v3044_v41 = vpop.xlane.xlu0 %3043 }
0x114a   : > { %4561 = vrsqrt.f32 %v3047_v40  ;;  %v3046_v42 = vmul.f32 0.03125, %v3044_v41  ;;  %v3846_v41 = vld [vmem:[#allocation47] ss:$0 sm:$0xff] }
0x114c   : > { %v3048_v43 = vadd.f32 1e-12, %v3046_v42 }
0x114e   : > { %4563 = vrsqrt.f32 %v3048_v43 }
0x1154   : > { %v4562_v44 = vpop.eup %4561 }
0x1155   : > { %v3051_v45 = vmul.f32 %v4562_v44, %v3035_v32  ;;  %v3847_v44 = vld [vmem:[#allocation48] ss:$0 sm:$0xff] }
0x1157   : > { %v3059_v48 = vmul.f32 %v3834_v46, %v3051_v45 }
0x1158   : > { %v4564_v47 = vpop.eup %4563 }
0x1159   : > { %v3052_v49 = vmul.f32 %v4564_v47, %v3036_v34  ;;  %v3067_v52 = vadd.f32 %v3835_v50, %v3059_v48 }
0x115b   : > { %v3060_v51 = vmul.f32 %v3834_v46, %v3052_v49 }
0x115d   : > { %v3068_v54 = vadd.f32 %v3835_v50, %v3060_v51 }
0x115f   : > { %v3069_v55 = vpack.c.bf16 %v3068_v54, %v3067_v52 }
0x1161   : > { %4089 = vmatmul.mubr.msk.bf16.vlgmr.msra.gmra.mrb[48].mxu0 %vm1433_vm1, %v3069_v55 }
0x1234   : > { %v3130_v62 = vpop.f32.mrb[48].mxu0 }
0x1235   : > { %v3131_v63 = vadd.f32 %v3836_v60, %v3130_v62  ;;  %v4090_v1 = vpop.f32.mrb[49].mxu0 }
0x1236   : > { %v3133_v2 = vpop.f32.mrb[50].mxu0 }
0x1237   : > { %v3137_v3 = vmul.f32 0.70710677, %v3131_v63  ;;  %v3134_v4 = vadd.f32 %v3836_v60, %v3133_v2  ;;  %v4091_v5 = vpop.f32.mrb[51].mxu0 }
0x1239   : > { %4565 = verf.f32 %v3137_v3  ;;  %v3138_v53 = vmul.f32 0.70710677, %v3134_v4 }
0x123b   : > { %4567 = verf.f32 %v3138_v53 }
0x1243   : > { %v4566_v7 = vpop.eup %4565 }
0x1244   : > { %v3141_v8 = vadd.f32 1.0, %v4566_v7 }
0x1245   : > { %v4568_v6 = vpop.eup %4567 }
0x1246   : > { %v3143_v9 = vmul.f32 0.5, %v3141_v8  ;;  %v3142_v10 = vadd.f32 1.0, %v4568_v6 }
0x1248   : > { %v3144_v11 = vmul.f32 0.5, %v3142_v10  ;;  %v3145_v0 = vmul.f32 %v3143_v9, %v3131_v63 }
0x124a   : > { %v3146_v12 = vmul.f32 %v3144_v11, %v3134_v4 }
0x124c   : > { %v3147_v13 = vpack.c.bf16 %v3146_v12, %v3145_v0 }
0x124e   : > { %4101 = vmatmul.mubr.msk.bf16.vlgmr.msra.gmra.mrb[48].mxu1 %vm3187_vm7, %v3147_v13 }
0x1321   : > { %v3225_v15 = vpop.f32.mrb[48].mxu1 }
0x1322   : > { %v3226_v16 = vadd.f32 %v3840_v14, %v3225_v15  ;;  %v4102_v17 = vpop.f32.mrb[49].mxu1 }
0x1323   : > { %v3228_v18 = vpop.f32.mrb[50].mxu1 }
0x1324   : > { %v3229_v19 = vadd.f32 %v3840_v14, %v3228_v18  ;;  %v4103_v20 = vpop.f32.mrb[51].mxu1  ;;  %v3232_v21 = vadd.f32 %v3226_v16, %v3067_v52 }
0x1326   : > { %v3236_v22 = vsel %vm1433_vm1, %v3232_v21, 0.0  ;;  %v3233_v23 = vadd.f32 %v3229_v19, %v3068_v54 }
0x1327   : > { %3237 = vadd.xlane.f32.xlu1 %v3236_v22 }
0x1328   : > { %v3239_v24 = vsel %vm1433_vm1, %v3233_v23, 0.0 }
0x1329   : > { %3240 = vadd.xlane.f32.xlu0 %v3239_v24 }
0x13b4   : > { %v3238_v25 = vpop.xlane.xlu1 %3237 }
0x13b5   : > { %v3242_v26 = vmul.f32 0.03125, %v3238_v25 }
0x13b6   : > { %v3241_v27 = vpop.xlane.xlu0 %3240 }
0x13b7   : > { %v3244_v28 = vsub.f32 %v3232_v21, %v3242_v26  ;;  %v3243_v31 = vmul.f32 0.03125, %v3241_v27 }
0x13b9   : > { %v3245_v32 = vsub.f32 %v3233_v23, %v3243_v31  ;;  %v3246_v33 = vmul.f32 %v3244_v28, %v3244_v28 }
0x13bb   : > { %v3248_v34 = vsel %vm1433_vm1, %v3246_v33, 0.0  ;;  %v3247_v61 = vmul.f32 %v3245_v32, %v3245_v32 }
0x13bc   : > { %3249 = vadd.xlane.f32.xlu1 %v3248_v34 }
0x13bd   : > { %v3251_v35 = vsel %vm1433_vm1, %v3247_v61, 0.0 }
0x13be   : > { %3252 = vadd.xlane.f32.xlu0 %v3251_v35 }
0x1449   : > { %v3250_v36 = vpop.xlane.xlu1 %3249 }
0x144a   : > { %v3254_v29 = vmul.f32 0.03125, %v3250_v36 }
0x144b   : > { %v3253_v37 = vpop.xlane.xlu0 %3252 }
0x144c   : > { %v3256_v30 = vadd.f32 1e-12, %v3254_v29  ;;  %v3255_v38 = vmul.f32 0.03125, %v3253_v37 }
0x144e   : > { %4569 = vrsqrt.f32 %v3256_v30  ;;  %v3257_v39 = vadd.f32 1e-12, %v3255_v38 }
0x1450   : > { %4571 = vrsqrt.f32 %v3257_v39 }
0x1458   : > { %v4570_v40 = vpop.eup %4569 }
0x1459   : > { %v3260_v42 = vmul.f32 %v4570_v40, %v3244_v28 }
0x145a   : > { %v4572_v43 = vpop.eup %4571 }
0x145b   : > { %v3268_v45 = vmul.f32 %v3846_v41, %v3260_v42  ;;  %v3261_v46 = vmul.f32 %v4572_v43, %v3245_v32 }
0x145d   : > { %v3276_v47 = vadd.f32 %v3847_v44, %v3268_v45  ;;  %v3269_v48 = vmul.f32 %v3846_v41, %v3261_v46 }
0x145f   : > { %v3857_v49 = vpack.c.bf16 %v3276_v47, %v3276_v47  ;;  %v3277_v50 = vadd.f32 %v3847_v44, %v3269_v48 }
0x1461   : > { %v3858_v51 = vpack.c.bf16 %v3277_v50, %v3277_v50  ;;  %3287 = vst.msk [vmem:[%s1398_s7] sm:$0xf] %vm3286_vm8, %v3857_v49 }
0x1463   : > { %3288 = vst.msk [vmem:[%s1398_s7 + $0x4] sm:$0xf] %vm3286_vm8, %v3858_v51 }
0x1464   : > { %5434 = shalt.err (!%p5431_p0)
}
0x1465   : > { %s5435_s23 = scalar_lea.hbm %s6609_s19, 128  ;;  %s5439_s8 = scalar_lea.hbm %s6818_s24, 256 }
0x1466   : > { %p5436_p13 = scmp.ne.s32.totalorder %s6609_s19, %s5435_s23  ;;  %p5440_p10 = scmp.lt.u32.totalorder %s6609_s19, %s6818_s24 }
0x1467   : > { %p5441_p7 = scmp.lt.u32.totalorder %s5439_s8, %s5435_s23  ;;  %p5443_p2 = scmp.lt.u32.totalorder %s5435_s23, %s6609_s19 }
0x1468   : > { %p5437_p4 = pnand %p5436_p13, %p6819_p11 }
0x1469   : > { %p5442_p6 = por %p5441_p7, %p5440_p10 }
0x146a   : > { %p5438_p3 = pneg %p5437_p4 }
0x146b   : > { %p5444_p8 = por %p5443_p2, %p5442_p6 }
0x146d   : > { %p5445_p12 = pnand %p5444_p8, %p5438_p3 }
0x146f   : > { %5448 = shalt.err (!%p5445_p12)
}
0x1470   : > { %s5624_s17 = smov 64   ;;  %s5625_s12 = smov 4  }
0x1471   : > { %4216 = dma.vmem_to_hbm [thread:$0]  (%p6819_p11), %s6611_s13, 128, %s6609_s19, %s3290_s11, %s5624_s17, %s5624_s17, %s5625_s12  }
0x1472 PF: > { %s3318_s3 = sand.u32 1, %s5539_s0   ;;  %p6820_p1 = scmp.ne.s32.totalorder %s6760_s22, 0 }
0x1473   : > { %p6821_p5 = scmp.ge.s32.totalorder %s5551_s18, 2  ;;  %s3319_s4 = scalar_lea.sflag [#allocation5], %s3318_s3 }
0x1475   : > { %p4311_p9 = pnand %p6821_p5, %p6820_p1 }
0x1477   : > { %5534 = dma.done.wait (!%p4311_p9), %s3319_s4, 128  }
0x1478   : > { %5536 = vsyncadd (!%p4311_p9), %s3319_s4, 4294967168  ;;  %p93_p0 = scmp.ge.s32.totalorder %s5989_s28, 4   ;;  %s6822_s0 = smov %s5543_s15 }
0x1479   : > { %s6823_s15 = smov %s5547_s16  ;;  %s6824_s16 = smov %s6001_s1 }
0x147a   : > { %s6825_s18 = smov %s5989_s28  ;;  %95 = sbr.rel (!%p93_p0) target bundleno = 89 (0x59), region = 356 }
0x1481   :  { %3324 = vsyncpa [#allocation4], 1 }
0x1482   :  { %3326 = vsyncpa [#allocation4 + $0x1], 1 }
0x1483   :  { %3327 = vsyncpa [#allocation7], 1 }
0x1484   :  { %3329 = vsyncpa [#allocation7 + $0x1], 1 }
0x1485   :  { %3330 = vsyncpa [#allocation10], 1 }
0x1486   :  { %3332 = vsyncpa [#allocation10 + $0x1], 1 }
0x1487   :  { %3333 = vsyncpa [#allocation13], 1 }
0x1488   :  { %3334 = vsyncpa [#allocation16], 1 }
0x1489   :  { %3335 = vsyncpa [#allocation19], 1 }
0x148a   :  { %3336 = vsyncpa [#allocation22], 1 }
0x148b   :  { %3337 = vsyncpa [#allocation25], 1 }
0x148c   :  { %3338 = vsyncpa [#allocation28], 1 }
0x148d   :  { %3339 = vsyncpa [#allocation31], 1 }
0x148e   :  { %3340 = vsyncpa [#allocation34], 1 }
0x148f   :  { %3341 = vsyncpa [#allocation37], 1 }
0x1490   :  { %3342 = vsyncpa [#allocation40], 1 }
0x1491   :  { %3343 = vsyncpa [#allocation43], 1 }
0x1492   :  { %3344 = vsyncpa [#allocation46], 1 }
0x1493   :  { %3345 = vsyncpa [#allocation49], 1 }
0x1494   :  { %3346 = vsyncpa [#allocation5], 1 }
0x1495   :  { %3348 = vsyncpa [#allocation5 + $0x1], 1 }

</bundles_post_ra>
